<compile_context>
chip_gen: v7x
topology: tpu7x:2x2x1
jax: 0.10.0
libtpu: 0.0.40
codegen_flags: <defaults>
</compile_context>

<pallas_src>
import functools
import math

import jax
import jax.numpy as jnp
from jax import lax
from jax.experimental import pallas as pl
from jax.experimental.pallas import tpu as pltpu

NEG_SLOPE = 0.1   # nn.LeakyReLU(0.1)
BN_EPS = 1e-5


def _leaky(v):
    return jnp.where(v >= 0, v, NEG_SLOPE * v)


# ----------------------------------------------------------------------------
# Fused STAttentionBlock kernel (optionally prefixed by the part input_map)
# ----------------------------------------------------------------------------
def _fused_block_kernel(*refs, S, TI, inv_kt, has_im):
    """Whole STAttentionBlock for one batch element.

    Activation layout everywhere: rows = joints V (sublanes), lanes = (t, c).
    """
    if has_im:
        (x_ref, im_w_ref, im_b_ref, pe_ref, w_in_ref, b_in_ref, alphas_ref,
         att0_ref, w_out_ref, b_out_ref, w_ff_ref, b_ff_ref, w_t_ref, b_t_ref,
         o_ref) = refs
        h = jnp.dot(x_ref[0], im_w_ref[...],
                    preferred_element_type=jnp.float32) + im_b_ref[...]
        x = _leaky(h)                                             # (V, T*C)
    else:
        (x_ref, pe_ref, w_in_ref, b_in_ref, alphas_ref, att0_ref, w_out_ref,
         b_out_ref, w_ff_ref, b_ff_ref, w_t_ref, b_t_ref, o_ref) = refs
        x = x_ref[0]                                              # (V, T*C)

    # positional encoding + in_nets (block-diagonal 1x1 conv) -> q/k per subset
    y = x + pe_ref[...]
    qk = jnp.dot(y, w_in_ref[...],
                 preferred_element_type=jnp.float32) + b_in_ref[...]  # (V, 2*S*T*inter)

    ys = []
    for s in range(S):                                            # static, small
        q = qk[:, s * TI:(s + 1) * TI]                            # (V, T*inter)
        k = qk[:, (S + s) * TI:(S + s + 1) * TI]                  # (V, T*inter)
        # scores^T[v, u] = sum_{t,i} q[u,(t,i)] k[v,(t,i)]  == einsum('nsctu,nsctv->nsuv')^T
        scores_t = lax.dot_general(k, q, (((1,), (1,)), ((), ())),
                                   preferred_element_type=jnp.float32)   # (V, V)
        attn_t = jnp.tanh(scores_t * inv_kt) * alphas_ref[s] + att0_ref[s]
        # y_s[v, (t,c)] = sum_u attention[u,v] * x[u,(t,c)]   (lane-dense output)
        ys.append(jnp.dot(attn_t, x, preferred_element_type=jnp.float32))  # (V, T*C)
    y_cat = ys[0] if S == 1 else jnp.concatenate(ys, axis=1)       # (V, S*T*C)

    # out_nets (+ downs1 skip) and ff_nets (+ downs2 skip), both LeakyReLU(0.1)
    y1 = _leaky(jnp.dot(y_cat, w_out_ref[...],
                        preferred_element_type=jnp.float32) + b_out_ref[...] + x)
    y2 = _leaky(jnp.dot(y1, w_ff_ref[...],
                        preferred_element_type=jnp.float32) + b_ff_ref[...] + x)

    # out_nett: (t_kernel,1) temporal conv as one banded-block matmul, + downt2 skip
    z = _leaky(jnp.dot(y2, w_t_ref[...],
                       preferred_element_type=jnp.float32) + b_t_ref[...] + y2)
    o_ref[0] = z                                                  # 128-lane dense store


def st_block_fused(x, p, *, S, inter, T, has_im, im=None):
    """x: (N, V, Lin) lane-dense activation. Returns (N, V, T*Cout)."""
    N, V, Lin = x.shape
    Lout = p['w_out_big'].shape[1]
    inv_kt = 1.0 / float(inter * T)

    def vspec(a):
        zeros = (0,) * a.ndim
        return pl.BlockSpec(a.shape, lambda n, _z=zeros: _z)

    args = [x]
    in_specs = [pl.BlockSpec((1, V, Lin), lambda n: (n, 0, 0))]
    if has_im:
        args += [im['w_big'], im['b_big']]
        in_specs += [vspec(im['w_big']), vspec(im['b_big'])]
    args += [p['pe_b'], p['w_in_big'], p['b_in_big'], p['alphas'], p['att0_t'],
             p['w_out_big'], p['b_out_big'], p['w_ff_big'], p['b_ff_big'],
             p['w_t_big'], p['b_t_big']]
    in_specs += [vspec(p['pe_b']), vspec(p['w_in_big']), vspec(p['b_in_big']),
                 pl.BlockSpec(memory_space=pltpu.MemorySpace.SMEM),   # alphas scalars
                 vspec(p['att0_t']),
                 vspec(p['w_out_big']), vspec(p['b_out_big']),
                 vspec(p['w_ff_big']), vspec(p['b_ff_big']),
                 vspec(p['w_t_big']), vspec(p['b_t_big'])]

    kernel = functools.partial(_fused_block_kernel, S=S, TI=T * inter,
                               inv_kt=inv_kt, has_im=has_im)
    return pl.pallas_call(
        kernel,
        grid=(N,),
        in_specs=in_specs,
        out_specs=pl.BlockSpec((1, V, Lout), lambda n: (n, 0, 0)),
        out_shape=jax.ShapeDtypeStruct((N, V, Lout), jnp.float32),
        compiler_params=pltpu.CompilerParams(dimension_semantics=("parallel",)),
    )(*args)


# ----------------------------------------------------------------------------
# Parameter construction (deterministic, synthetic), BN folding, and host-side
# expansion of weights into the lane-dense block-diagonal / banded form.
# ----------------------------------------------------------------------------
def fold_bn(w, b, gamma, beta, mean, var):
    scale = gamma / jnp.sqrt(var + BN_EPS)
    return w * scale, (b - mean) * scale + beta


def positional_encoding(channel, joint_num, time_len):
    # 'spatial' domain: position = joint index, repeated for every frame
    pos = jnp.tile(jnp.arange(joint_num, dtype=jnp.float32), (time_len,))[:, None]
    div = jnp.exp(jnp.arange(0, channel, 2, dtype=jnp.float32)
                  * (-math.log(10000.0) / channel))
    pe = jnp.zeros((time_len * joint_num, channel), jnp.float32)
    pe = pe.at[:, 0::2].set(jnp.sin(pos * div))
    pe = pe.at[:, 1::2].set(jnp.cos(pos * div))
    return pe.reshape(time_len, joint_num, channel)               # (T, V, C)


def _block_diag(w, T):
    # (Cin, Cout) -> (T*Cin, T*Cout), w on every diagonal (t,t) block
    return jnp.kron(jnp.eye(T, dtype=w.dtype), w)


def _tile_bias(b, T):
    return jnp.tile(b, T).reshape(1, -1)


def init_input_map(key, num_channel, in_c, T):
    ks = jax.random.split(key, 4)
    w = 0.1 * jax.random.normal(ks[0], (num_channel, in_c), jnp.float32)
    b = 0.1 * jax.random.normal(ks[1], (in_c,), jnp.float32)
    g = 1.0 + 0.1 * jax.random.normal(ks[2], (in_c,), jnp.float32)
    bt = 0.1 * jax.random.normal(ks[3], (in_c,), jnp.float32)
    wf, bf = fold_bn(w, b, g, bt, jnp.zeros(in_c), jnp.ones(in_c))
    return {'w_big': _block_diag(wf, T), 'b_big': _tile_bias(bf, T)}


def init_block_params(key, in_c, out_c, inter_c, t_kernel, num_subset, num_node, num_frame):
    assert in_c == out_c, "small config keeps identity skip paths (stride=1, in==out)"
    T, V, C, S = num_frame, num_node, in_c, num_subset
    ks = jax.random.split(key, 16)
    rnd = lambda k, s: 0.1 * jax.random.normal(k, s, jnp.float32)
    eyeT = jnp.eye(T, dtype=jnp.float32)
    p = {}

    # positional encoding, pre-arranged into lane-dense layout (V, T*C)
    pe = positional_encoding(C, V, T)                              # (T, V, C)
    p['pe_b'] = jnp.transpose(pe, (1, 0, 2)).reshape(V, T * C)

    # in_nets: Conv2d(C, 2*S*inter, 1, bias=True)  (no BN)
    in_w = rnd(ks[0], (C, 2 * S * inter_c))
    in_b = rnd(ks[1], (2 * S * inter_c,))
    w_in_r = in_w.reshape(C, 2 * S, inter_c)                       # cols ordered (q/k, s, i)
    big = jnp.einsum('tu,cgi->tcgui', eyeT, w_in_r)                # (T, C, 2S, T, inter)
    p['w_in_big'] = big.reshape(T * C, 2 * S * T * inter_c)        # out lanes (g, t, i)
    p['b_in_big'] = jnp.tile(in_b.reshape(2 * S, 1, inter_c),
                             (1, T, 1)).reshape(1, 2 * S * T * inter_c)

    p['alphas'] = jnp.ones((S,), jnp.float32)                      # torch.ones(1,S,1,1)
    att0 = jnp.full((S, V, V), 1.0 / V, jnp.float32)               # attention0s
    p['att0_t'] = jnp.transpose(att0, (0, 2, 1))                   # pre-transposed

    # out_nets: Conv2d(S*C, out_c, 1) + BN -> folded, block-diagonal over t
    g = 1.0 + 0.1 * jax.random.normal(ks[4], (out_c,), jnp.float32)
    bt = 0.1 * jax.random.normal(ks[5], (out_c,), jnp.float32)
    out_w, out_b = fold_bn(rnd(ks[2], (S * C, out_c)), rnd(ks[3], (out_c,)),
                           g, bt, jnp.zeros(out_c), jnp.ones(out_c))
    out_w_r = out_w.reshape(S, C, out_c)
    big = jnp.einsum('tu,scj->stcuj', eyeT, out_w_r)               # (S, T, C, T, Cout)
    p['w_out_big'] = big.reshape(S * T * C, T * out_c)
    p['b_out_big'] = _tile_bias(out_b, T)

    # ff_nets: Conv2d(out_c, out_c, 1) + BN -> folded, block-diagonal over t
    g = 1.0 + 0.1 * jax.random.normal(ks[8], (out_c,), jnp.float32)
    bt = 0.1 * jax.random.normal(ks[9], (out_c,), jnp.float32)
    ff_w, ff_b = fold_bn(rnd(ks[6], (out_c, out_c)), rnd(ks[7], (out_c,)),
                         g, bt, jnp.zeros(out_c), jnp.ones(out_c))
    p['w_ff_big'] = _block_diag(ff_w, T)
    p['b_ff_big'] = _tile_bias(ff_b, T)

    # out_nett: Conv2d(out_c, out_c, (tk,1), pad tk//2) + BN -> folded, banded block matrix
    g = 1.0 + 0.1 * jax.random.normal(ks[12], (out_c,), jnp.float32)
    bt = 0.1 * jax.random.normal(ks[13], (out_c,), jnp.float32)
    t_w, t_b = fold_bn(rnd(ks[10], (t_kernel, out_c, out_c)), rnd(ks[11], (out_c,)),
                       g, bt, jnp.zeros(out_c), jnp.ones(out_c))
    pad = t_kernel // 2
    t1 = jnp.arange(T)[:, None]
    t2 = jnp.arange(T)[None, :]
    d = t1 - t2 + pad                                              # tap index per (t_in, t_out)
    valid = ((d >= 0) & (d < t_kernel)).astype(jnp.float32)
    band = t_w[jnp.clip(d, 0, t_kernel - 1)] * valid[..., None, None]   # (T, T, C, Cout)
    p['w_t_big'] = jnp.transpose(band, (0, 2, 1, 3)).reshape(T * out_c, T * out_c)
    p['b_t_big'] = _tile_bias(t_b, T)
    return p


# ----------------------------------------------------------------------------
# Model forward (one fused Pallas kernel per part per block; tiny glue in XLA)
# ----------------------------------------------------------------------------
def dsta_forward(x_nctv, params, cfg):
    # x_nctv: (N, C, T, V) like src_input['keypoint']
    N, Craw, T, _ = x_nctv.shape
    S = cfg['num_subset']
    C_out = cfg['net'][-1][1]
    pooled = {}
    for part in ('left', 'right', 'face', 'body'):
        idx = jnp.asarray(cfg[part], dtype=jnp.int32)
        Vp = len(cfg[part])
        xp = x_nctv[:, :, :, idx]                                  # (N, Craw, T, Vp)
        h = jnp.transpose(xp, (0, 3, 2, 1)).reshape(N, Vp, T * Craw)   # lane-dense raw input
        pp = params[part]
        for li, ((ic, oc, inter, tk, stride), lp) in enumerate(zip(cfg['net'], pp['layers'])):
            h = st_block_fused(h, lp, S=S, inter=inter, T=T,
                               has_im=(li == 0),
                               im=pp['input_map'] if li == 0 else None)
        # mean over joints (tiny, once per part) -> (N, T, C_out)
        pooled[part] = jnp.mean(h, axis=1).reshape(N, T, C_out)
    output = jnp.concatenate([pooled['left'], pooled['face'],
                              pooled['right'], pooled['body']], axis=-1)
    left_output = jnp.concatenate([pooled['left'], pooled['face']], axis=-1)
    right_output = jnp.concatenate([pooled['right'], pooled['face']], axis=-1)
    return output, left_output, right_output, pooled['body']


# ----------------------------------------------------------------------------
if __name__ == "__main__":
    key = jax.random.PRNGKey(0)
    N, Craw, T = 2, 2, 8            # batch, keypoint channels, frames
    V_total = 20                    # total joints in the input
    num_subset = 2
    # cfg['net'] rows: (in_channels, out_channels, inter_channels, t_kernel, stride)
    cfg = {
        'net': [[16, 16, 8, 3, 1], [16, 16, 8, 3, 1]],
        'num_subset': num_subset,
        'left': list(range(0, 7)),
        'right': list(range(7, 14)),
        'face': list(range(14, 20)),
        'body': list(range(0, 20)),
    }

    kin, kparam = jax.random.split(key)
    x = jax.random.normal(kin, (N, Craw, T, V_total), jnp.float32)

    in_channels = cfg['net'][0][0]
    keys = jax.random.split(kparam, 4 * (1 + len(cfg['net'])))
    params, ki = {}, 0
    for part in ('left', 'right', 'face', 'body'):
        Vp = len(cfg[part])
        pdict = {'input_map': init_input_map(keys[ki], Craw, in_channels, T)}
        ki += 1
        layers, nf = [], T
        for (ic, oc, inter, tk, stride) in cfg['net']:
            layers.append(init_block_params(keys[ki], ic, oc, inter, tk,
                                            num_subset, Vp, nf))
            ki += 1
            nf = int(nf / stride + 0.5)
        pdict['layers'] = layers
        params[part] = pdict

    fwd = jax.jit(lambda xx, pp: dsta_forward(xx, pp, cfg))
    out, left_out, right_out, body = fwd(x, params)
    jax.block_until_ready((out, left_out, right_out, body))

    C_out = cfg['net'][-1][1]
    assert out.shape == (N, T, 4 * C_out)
    assert left_out.shape == (N, T, 2 * C_out)
    assert right_out.shape == (N, T, 2 * C_out)
    assert body.shape == (N, T, C_out)
    assert bool(jnp.all(jnp.isfinite(out)))
    print("KERNEL_OK")
</pallas_src>

<mosaic_0001>
module attributes {stable_mosaic.version = 11 : i64} {
  func.func @_fused_block_kernel(%arg0: i32, %arg1: memref<1x20x16xf32, #tpu.memory_space<vmem>>, %arg2: memref<16x128xf32, #tpu.memory_space<vmem>>, %arg3: memref<1x128xf32, #tpu.memory_space<vmem>>, %arg4: memref<20x128xf32, #tpu.memory_space<vmem>>, %arg5: memref<128x256xf32, #tpu.memory_space<vmem>>, %arg6: memref<1x256xf32, #tpu.memory_space<vmem>>, %arg7: memref<2xf32, #tpu.memory_space<smem>>, %arg8: memref<2x20x20xf32, #tpu.memory_space<vmem>>, %arg9: memref<256x128xf32, #tpu.memory_space<vmem>>, %arg10: memref<1x128xf32, #tpu.memory_space<vmem>>, %arg11: memref<128x128xf32, #tpu.memory_space<vmem>>, %arg12: memref<1x128xf32, #tpu.memory_space<vmem>>, %arg13: memref<128x128xf32, #tpu.memory_space<vmem>>, %arg14: memref<1x128xf32, #tpu.memory_space<vmem>>, %arg15: memref<1x20x128xf32, #tpu.memory_space<vmem>>) attributes {dimension_semantics = [#tpu.dimension_semantics<parallel>], iteration_bounds = array<i64: 2>, scalar_prefetch = 0 : i64, scratch_operands = 0 : i64, tpu.core_type = #tpu.core_type<tc>, window_params = [{transform_indices = @transform_0, window_bounds = array<i64: 1, 20, 16>}, {pipeline_mode = #tpu.pipeline_mode<synchronous>, transform_indices = @transform_1, window_bounds = array<i64: 16, 128>}, {pipeline_mode = #tpu.pipeline_mode<synchronous>, transform_indices = @transform_2, window_bounds = array<i64: 1, 128>}, {pipeline_mode = #tpu.pipeline_mode<synchronous>, transform_indices = @transform_3, window_bounds = array<i64: 20, 128>}, {pipeline_mode = #tpu.pipeline_mode<synchronous>, transform_indices = @transform_4, window_bounds = array<i64: 128, 256>}, {pipeline_mode = #tpu.pipeline_mode<synchronous>, transform_indices = @transform_5, window_bounds = array<i64: 1, 256>}, {transform_indices = @transform_6, window_bounds = array<i64: 2>}, {pipeline_mode = #tpu.pipeline_mode<synchronous>, transform_indices = @transform_7, window_bounds = array<i64: 2, 20, 20>}, {pipeline_mode = #tpu.pipeline_mode<synchronous>, transform_indices = @transform_8, window_bounds = array<i64: 256, 128>}, {pipeline_mode = #tpu.pipeline_mode<synchronous>, transform_indices = @transform_9, window_bounds = array<i64: 1, 128>}, {pipeline_mode = #tpu.pipeline_mode<synchronous>, transform_indices = @transform_10, window_bounds = array<i64: 128, 128>}, {pipeline_mode = #tpu.pipeline_mode<synchronous>, transform_indices = @transform_11, window_bounds = array<i64: 1, 128>}, {pipeline_mode = #tpu.pipeline_mode<synchronous>, transform_indices = @transform_12, window_bounds = array<i64: 128, 128>}, {pipeline_mode = #tpu.pipeline_mode<synchronous>, transform_indices = @transform_13, window_bounds = array<i64: 1, 128>}, {transform_indices = @transform_14, window_bounds = array<i64: 1, 20, 128>}]} {
    %c0 = arith.constant 0 : index
    %c0_0 = arith.constant 0 : index
    %c0_1 = arith.constant 0 : index
    %0 = vector.load %arg1[%c0, %c0_0, %c0_1] : memref<1x20x16xf32, #tpu.memory_space<vmem>>, vector<1x20x16xf32>
    %1 = vector.shape_cast %0 : vector<1x20x16xf32> to vector<20x16xf32>
    %c0_2 = arith.constant 0 : index
    %c0_3 = arith.constant 0 : index
    %2 = vector.load %arg2[%c0_2, %c0_3] : memref<16x128xf32, #tpu.memory_space<vmem>>, vector<16x128xf32>
    %cst = arith.constant dense<0.000000e+00> : vector<20x128xf32>
    %3 = tpu.matmul %1, %2, %cst {dimension_numbers = #tpu.dot_dimension_numbers<[1], [0], [0], [1], [0, 0, 1, 1], [], []>} : vector<20x16xf32>, vector<16x128xf32>, vector<20x128xf32> -> vector<20x128xf32>
    %c0_4 = arith.constant 0 : index
    %c0_5 = arith.constant 0 : index
    %4 = vector.load %arg3[%c0_4, %c0_5] : memref<1x128xf32, #tpu.memory_space<vmem>>, vector<1x128xf32>
    %5 = vector.broadcast %4 : vector<1x128xf32> to vector<20x128xf32>
    %6 = arith.addf %3, %5 : vector<20x128xf32>
    %cst_6 = arith.constant 0.000000e+00 : f32
    %7 = vector.broadcast %cst_6 : f32 to vector<20x128xf32>
    %8 = arith.cmpf oge, %6, %7 : vector<20x128xf32>
    %cst_7 = arith.constant 1.000000e-01 : f32
    %9 = vector.broadcast %cst_7 : f32 to vector<20x128xf32>
    %10 = arith.mulf %9, %6 : vector<20x128xf32>
    %11 = arith.select %8, %6, %10 : vector<20x128xi1>, vector<20x128xf32>
    %c0_8 = arith.constant 0 : index
    %c0_9 = arith.constant 0 : index
    %12 = vector.load %arg4[%c0_8, %c0_9] : memref<20x128xf32, #tpu.memory_space<vmem>>, vector<20x128xf32>
    %13 = arith.addf %11, %12 : vector<20x128xf32>
    %c0_10 = arith.constant 0 : index
    %c0_11 = arith.constant 0 : index
    %14 = vector.load %arg5[%c0_10, %c0_11] : memref<128x256xf32, #tpu.memory_space<vmem>>, vector<128x256xf32>
    %cst_12 = arith.constant dense<0.000000e+00> : vector<20x256xf32>
    %15 = tpu.matmul %13, %14, %cst_12 {dimension_numbers = #tpu.dot_dimension_numbers<[1], [0], [0], [1], [0, 0, 1, 1], [], []>} : vector<20x128xf32>, vector<128x256xf32>, vector<20x256xf32> -> vector<20x256xf32>
    %c0_13 = arith.constant 0 : index
    %c0_14 = arith.constant 0 : index
    %16 = vector.load %arg6[%c0_13, %c0_14] : memref<1x256xf32, #tpu.memory_space<vmem>>, vector<1x256xf32>
    %17 = vector.broadcast %16 : vector<1x256xf32> to vector<20x256xf32>
    %18 = arith.addf %15, %17 : vector<20x256xf32>
    %19 = vector.extract_strided_slice %18 {offsets = [0, 0], sizes = [20, 64], strides = [1, 1]} : vector<20x256xf32> to vector<20x64xf32>
    %20 = vector.extract_strided_slice %18 {offsets = [0, 128], sizes = [20, 64], strides = [1, 1]} : vector<20x256xf32> to vector<20x64xf32>
    %cst_15 = arith.constant dense<0.000000e+00> : vector<20x20xf32>
    %21 = tpu.matmul %20, %19, %cst_15 {dimension_numbers = #tpu.dot_dimension_numbers<[1], [1], [0], [0], [0, 0, 1, 0], [], []>} : vector<20x64xf32>, vector<20x64xf32>, vector<20x20xf32> -> vector<20x20xf32>
    %cst_16 = arith.constant 1.562500e-02 : f32
    %22 = vector.broadcast %cst_16 : f32 to vector<20x20xf32>
    %23 = arith.mulf %21, %22 : vector<20x20xf32>
    %24 = math.tanh %23 : vector<20x20xf32>
    %c0_17 = arith.constant 0 : index
    %25 = memref.load %arg7[%c0_17] : memref<2xf32, #tpu.memory_space<smem>>
    %26 = vector.broadcast %25 : f32 to vector<20x20xf32>
    %27 = arith.mulf %24, %26 : vector<20x20xf32>
    %c0_18 = arith.constant 0 : index
    %c0_19 = arith.constant 0 : index
    %c0_20 = arith.constant 0 : index
    %28 = vector.load %arg8[%c0_18, %c0_19, %c0_20] : memref<2x20x20xf32, #tpu.memory_space<vmem>>, vector<1x20x20xf32>
    %29 = vector.shape_cast %28 : vector<1x20x20xf32> to vector<20x20xf32>
    %30 = arith.addf %27, %29 : vector<20x20xf32>
    %cst_21 = arith.constant dense<0.000000e+00> : vector<20x128xf32>
    %31 = tpu.matmul %30, %11, %cst_21 {dimension_numbers = #tpu.dot_dimension_numbers<[1], [0], [0], [1], [0, 0, 1, 1], [], []>} : vector<20x20xf32>, vector<20x128xf32>, vector<20x128xf32> -> vector<20x128xf32>
    %32 = vector.extract_strided_slice %18 {offsets = [0, 64], sizes = [20, 64], strides = [1, 1]} : vector<20x256xf32> to vector<20x64xf32>
    %33 = vector.extract_strided_slice %18 {offsets = [0, 192], sizes = [20, 64], strides = [1, 1]} : vector<20x256xf32> to vector<20x64xf32>
    %cst_22 = arith.constant dense<0.000000e+00> : vector<20x20xf32>
    %34 = tpu.matmul %33, %32, %cst_22 {dimension_numbers = #tpu.dot_dimension_numbers<[1], [1], [0], [0], [0, 0, 1, 0], [], []>} : vector<20x64xf32>, vector<20x64xf32>, vector<20x20xf32> -> vector<20x20xf32>
    %cst_23 = arith.constant 1.562500e-02 : f32
    %35 = vector.broadcast %cst_23 : f32 to vector<20x20xf32>
    %36 = arith.mulf %34, %35 : vector<20x20xf32>
    %37 = math.tanh %36 : vector<20x20xf32>
    %c1 = arith.constant 1 : index
    %38 = memref.load %arg7[%c1] : memref<2xf32, #tpu.memory_space<smem>>
    %39 = vector.broadcast %38 : f32 to vector<20x20xf32>
    %40 = arith.mulf %37, %39 : vector<20x20xf32>
    %c1_24 = arith.constant 1 : index
    %c0_25 = arith.constant 0 : index
    %c0_26 = arith.constant 0 : index
    %41 = vector.load %arg8[%c1_24, %c0_25, %c0_26] : memref<2x20x20xf32, #tpu.memory_space<vmem>>, vector<1x20x20xf32>
    %42 = vector.shape_cast %41 : vector<1x20x20xf32> to vector<20x20xf32>
    %43 = arith.addf %40, %42 : vector<20x20xf32>
    %cst_27 = arith.constant dense<0.000000e+00> : vector<20x128xf32>
    %44 = tpu.matmul %43, %11, %cst_27 {dimension_numbers = #tpu.dot_dimension_numbers<[1], [0], [0], [1], [0, 0, 1, 1], [], []>} : vector<20x20xf32>, vector<20x128xf32>, vector<20x128xf32> -> vector<20x128xf32>
    %45 = tpu.concatenate %31, %44 in 1 : vector<20x128xf32>, vector<20x128xf32> -> vector<20x256xf32>
    %c0_28 = arith.constant 0 : index
    %c0_29 = arith.constant 0 : index
    %46 = vector.load %arg9[%c0_28, %c0_29] : memref<256x128xf32, #tpu.memory_space<vmem>>, vector<256x128xf32>
    %cst_30 = arith.constant dense<0.000000e+00> : vector<20x128xf32>
    %47 = tpu.matmul %45, %46, %cst_30 {dimension_numbers = #tpu.dot_dimension_numbers<[1], [0], [0], [1], [0, 0, 1, 1], [], []>} : vector<20x256xf32>, vector<256x128xf32>, vector<20x128xf32> -> vector<20x128xf32>
    %c0_31 = arith.constant 0 : index
    %c0_32 = arith.constant 0 : index
    %48 = vector.load %arg10[%c0_31, %c0_32] : memref<1x128xf32, #tpu.memory_space<vmem>>, vector<1x128xf32>
    %49 = vector.broadcast %48 : vector<1x128xf32> to vector<20x128xf32>
    %50 = arith.addf %47, %49 : vector<20x128xf32>
    %51 = arith.addf %50, %11 : vector<20x128xf32>
    %cst_33 = arith.constant 0.000000e+00 : f32
    %52 = vector.broadcast %cst_33 : f32 to vector<20x128xf32>
    %53 = arith.cmpf oge, %51, %52 : vector<20x128xf32>
    %cst_34 = arith.constant 1.000000e-01 : f32
    %54 = vector.broadcast %cst_34 : f32 to vector<20x128xf32>
    %55 = arith.mulf %54, %51 : vector<20x128xf32>
    %56 = arith.select %53, %51, %55 : vector<20x128xi1>, vector<20x128xf32>
    %c0_35 = arith.constant 0 : index
    %c0_36 = arith.constant 0 : index
    %57 = vector.load %arg11[%c0_35, %c0_36] : memref<128x128xf32, #tpu.memory_space<vmem>>, vector<128x128xf32>
    %cst_37 = arith.constant dense<0.000000e+00> : vector<20x128xf32>
    %58 = tpu.matmul %56, %57, %cst_37 {dimension_numbers = #tpu.dot_dimension_numbers<[1], [0], [0], [1], [0, 0, 1, 1], [], []>} : vector<20x128xf32>, vector<128x128xf32>, vector<20x128xf32> -> vector<20x128xf32>
    %c0_38 = arith.constant 0 : index
    %c0_39 = arith.constant 0 : index
    %59 = vector.load %arg12[%c0_38, %c0_39] : memref<1x128xf32, #tpu.memory_space<vmem>>, vector<1x128xf32>
    %60 = vector.broadcast %59 : vector<1x128xf32> to vector<20x128xf32>
    %61 = arith.addf %58, %60 : vector<20x128xf32>
    %62 = arith.addf %61, %11 : vector<20x128xf32>
    %cst_40 = arith.constant 0.000000e+00 : f32
    %63 = vector.broadcast %cst_40 : f32 to vector<20x128xf32>
    %64 = arith.cmpf oge, %62, %63 : vector<20x128xf32>
    %cst_41 = arith.constant 1.000000e-01 : f32
    %65 = vector.broadcast %cst_41 : f32 to vector<20x128xf32>
    %66 = arith.mulf %65, %62 : vector<20x128xf32>
    %67 = arith.select %64, %62, %66 : vector<20x128xi1>, vector<20x128xf32>
    %c0_42 = arith.constant 0 : index
    %c0_43 = arith.constant 0 : index
    %68 = vector.load %arg13[%c0_42, %c0_43] : memref<128x128xf32, #tpu.memory_space<vmem>>, vector<128x128xf32>
    %cst_44 = arith.constant dense<0.000000e+00> : vector<20x128xf32>
    %69 = tpu.matmul %67, %68, %cst_44 {dimension_numbers = #tpu.dot_dimension_numbers<[1], [0], [0], [1], [0, 0, 1, 1], [], []>} : vector<20x128xf32>, vector<128x128xf32>, vector<20x128xf32> -> vector<20x128xf32>
    %c0_45 = arith.constant 0 : index
    %c0_46 = arith.constant 0 : index
    %70 = vector.load %arg14[%c0_45, %c0_46] : memref<1x128xf32, #tpu.memory_space<vmem>>, vector<1x128xf32>
    %71 = vector.broadcast %70 : vector<1x128xf32> to vector<20x128xf32>
    %72 = arith.addf %69, %71 : vector<20x128xf32>
    %73 = arith.addf %72, %67 : vector<20x128xf32>
    %cst_47 = arith.constant 0.000000e+00 : f32
    %74 = vector.broadcast %cst_47 : f32 to vector<20x128xf32>
    %75 = arith.cmpf oge, %73, %74 : vector<20x128xf32>
    %cst_48 = arith.constant 1.000000e-01 : f32
    %76 = vector.broadcast %cst_48 : f32 to vector<20x128xf32>
    %77 = arith.mulf %76, %73 : vector<20x128xf32>
    %78 = arith.select %75, %73, %77 : vector<20x128xi1>, vector<20x128xf32>
    %c0_49 = arith.constant 0 : index
    %c0_50 = arith.constant 0 : index
    %c0_51 = arith.constant 0 : index
    %79 = vector.load %arg15[%c0_49, %c0_50, %c0_51] : memref<1x20x128xf32, #tpu.memory_space<vmem>>, vector<1x20x128xf32>
    %80 = vector.shape_cast %79 : vector<1x20x128xf32> to vector<20x128xf32>
    %81 = vector.shape_cast %78 : vector<20x128xf32> to vector<1x20x128xf32>
    tpu.vector_store %arg15[%c0_49, %c0_50, %c0_51], %81 {strides = array<i32>} : memref<1x20x128xf32, #tpu.memory_space<vmem>>, vector<1x20x128xf32>,
    return
  }
  func.func @transform_0(%arg0: i32) -> (i32, i32, i32) {
    %c0_i32 = arith.constant 0 : i32
    %c0_i32_0 = arith.constant 0 : i32
    %c0_i32_1 = arith.constant 0 : i32
    return %arg0, %c0_i32, %c0_i32_0 : i32, i32, i32
  }
  func.func @transform_1(%arg0: i32) -> (i32, i32) {
    %c0_i32 = arith.constant 0 : i32
    %c0_i32_0 = arith.constant 0 : i32
    %c0_i32_1 = arith.constant 0 : i32
    return %c0_i32, %c0_i32_0 : i32, i32
  }
  func.func @transform_2(%arg0: i32) -> (i32, i32) {
    %c0_i32 = arith.constant 0 : i32
    %c0_i32_0 = arith.constant 0 : i32
    %c0_i32_1 = arith.constant 0 : i32
    return %c0_i32, %c0_i32_0 : i32, i32
  }
  func.func @transform_3(%arg0: i32) -> (i32, i32) {
    %c0_i32 = arith.constant 0 : i32
    %c0_i32_0 = arith.constant 0 : i32
    %c0_i32_1 = arith.constant 0 : i32
    return %c0_i32, %c0_i32_0 : i32, i32
  }
  func.func @transform_4(%arg0: i32) -> (i32, i32) {
    %c0_i32 = arith.constant 0 : i32
    %c0_i32_0 = arith.constant 0 : i32
    %c0_i32_1 = arith.constant 0 : i32
    return %c0_i32, %c0_i32_0 : i32, i32
  }
  func.func @transform_5(%arg0: i32) -> (i32, i32) {
    %c0_i32 = arith.constant 0 : i32
    %c0_i32_0 = arith.constant 0 : i32
    %c0_i32_1 = arith.constant 0 : i32
    return %c0_i32, %c0_i32_0 : i32, i32
  }
  func.func @transform_6(%arg0: i32) -> i32 {
    %c0_i32 = arith.constant 0 : i32
    %c0_i32_0 = arith.constant 0 : i32
    return %c0_i32 : i32
  }
  func.func @transform_7(%arg0: i32) -> (i32, i32, i32) {
    %c0_i32 = arith.constant 0 : i32
    %c0_i32_0 = arith.constant 0 : i32
    %c0_i32_1 = arith.constant 0 : i32
    %c0_i32_2 = arith.constant 0 : i32
    return %c0_i32, %c0_i32_0, %c0_i32_1 : i32, i32, i32
  }
  func.func @transform_8(%arg0: i32) -> (i32, i32) {
    %c0_i32 = arith.constant 0 : i32
    %c0_i32_0 = arith.constant 0 : i32
    %c0_i32_1 = arith.constant 0 : i32
    return %c0_i32, %c0_i32_0 : i32, i32
  }
  func.func @transform_9(%arg0: i32) -> (i32, i32) {
    %c0_i32 = arith.constant 0 : i32
    %c0_i32_0 = arith.constant 0 : i32
    %c0_i32_1 = arith.constant 0 : i32
    return %c0_i32, %c0_i32_0 : i32, i32
  }
  func.func @transform_10(%arg0: i32) -> (i32, i32) {
    %c0_i32 = arith.constant 0 : i32
    %c0_i32_0 = arith.constant 0 : i32
    %c0_i32_1 = arith.constant 0 : i32
    return %c0_i32, %c0_i32_0 : i32, i32
  }
  func.func @transform_11(%arg0: i32) -> (i32, i32) {
    %c0_i32 = arith.constant 0 : i32
    %c0_i32_0 = arith.constant 0 : i32
    %c0_i32_1 = arith.constant 0 : i32
    return %c0_i32, %c0_i32_0 : i32, i32
  }
  func.func @transform_12(%arg0: i32) -> (i32, i32) {
    %c0_i32 = arith.constant 0 : i32
    %c0_i32_0 = arith.constant 0 : i32
    %c0_i32_1 = arith.constant 0 : i32
    return %c0_i32, %c0_i32_0 : i32, i32
  }
  func.func @transform_13(%arg0: i32) -> (i32, i32) {
    %c0_i32 = arith.constant 0 : i32
    %c0_i32_0 = arith.constant 0 : i32
    %c0_i32_1 = arith.constant 0 : i32
    return %c0_i32, %c0_i32_0 : i32, i32
  }
  func.func @transform_14(%arg0: i32) -> (i32, i32, i32) {
    %c0_i32 = arith.constant 0 : i32
    %c0_i32_0 = arith.constant 0 : i32
    %c0_i32_1 = arith.constant 0 : i32
    return %arg0, %c0_i32, %c0_i32_0 : i32, i32, i32
  }
}

module attributes {stable_mosaic.version = 11 : i64} {
  func.func @_fused_block_kernel(%arg0: i32, %arg1: memref<1x20x128xf32, #tpu.memory_space<vmem>>, %arg2: memref<20x128xf32, #tpu.memory_space<vmem>>, %arg3: memref<128x256xf32, #tpu.memory_space<vmem>>, %arg4: memref<1x256xf32, #tpu.memory_space<vmem>>, %arg5: memref<2xf32, #tpu.memory_space<smem>>, %arg6: memref<2x20x20xf32, #tpu.memory_space<vmem>>, %arg7: memref<256x128xf32, #tpu.memory_space<vmem>>, %arg8: memref<1x128xf32, #tpu.memory_space<vmem>>, %arg9: memref<128x128xf32, #tpu.memory_space<vmem>>, %arg10: memref<1x128xf32, #tpu.memory_space<vmem>>, %arg11: memref<128x128xf32, #tpu.memory_space<vmem>>, %arg12: memref<1x128xf32, #tpu.memory_space<vmem>>, %arg13: memref<1x20x128xf32, #tpu.memory_space<vmem>>) attributes {dimension_semantics = [#tpu.dimension_semantics<parallel>], iteration_bounds = array<i64: 2>, scalar_prefetch = 0 : i64, scratch_operands = 0 : i64, tpu.core_type = #tpu.core_type<tc>, window_params = [{transform_indices = @transform_0, window_bounds = array<i64: 1, 20, 128>}, {pipeline_mode = #tpu.pipeline_mode<synchronous>, transform_indices = @transform_1, window_bounds = array<i64: 20, 128>}, {pipeline_mode = #tpu.pipeline_mode<synchronous>, transform_indices = @transform_2, window_bounds = array<i64: 128, 256>}, {pipeline_mode = #tpu.pipeline_mode<synchronous>, transform_indices = @transform_3, window_bounds = array<i64: 1, 256>}, {transform_indices = @transform_4, window_bounds = array<i64: 2>}, {pipeline_mode = #tpu.pipeline_mode<synchronous>, transform_indices = @transform_5, window_bounds = array<i64: 2, 20, 20>}, {pipeline_mode = #tpu.pipeline_mode<synchronous>, transform_indices = @transform_6, window_bounds = array<i64: 256, 128>}, {pipeline_mode = #tpu.pipeline_mode<synchronous>, transform_indices = @transform_7, window_bounds = array<i64: 1, 128>}, {pipeline_mode = #tpu.pipeline_mode<synchronous>, transform_indices = @transform_8, window_bounds = array<i64: 128, 128>}, {pipeline_mode = #tpu.pipeline_mode<synchronous>, transform_indices = @transform_9, window_bounds = array<i64: 1, 128>}, {pipeline_mode = #tpu.pipeline_mode<synchronous>, transform_indices = @transform_10, window_bounds = array<i64: 128, 128>}, {pipeline_mode = #tpu.pipeline_mode<synchronous>, transform_indices = @transform_11, window_bounds = array<i64: 1, 128>}, {transform_indices = @transform_12, window_bounds = array<i64: 1, 20, 128>}]} {
    %c0 = arith.constant 0 : index
    %c0_0 = arith.constant 0 : index
    %c0_1 = arith.constant 0 : index
    %0 = vector.load %arg1[%c0, %c0_0, %c0_1] : memref<1x20x128xf32, #tpu.memory_space<vmem>>, vector<1x20x128xf32>
    %1 = vector.shape_cast %0 : vector<1x20x128xf32> to vector<20x128xf32>
    %c0_2 = arith.constant 0 : index
    %c0_3 = arith.constant 0 : index
    %2 = vector.load %arg2[%c0_2, %c0_3] : memref<20x128xf32, #tpu.memory_space<vmem>>, vector<20x128xf32>
    %3 = arith.addf %1, %2 : vector<20x128xf32>
    %c0_4 = arith.constant 0 : index
    %c0_5 = arith.constant 0 : index
    %4 = vector.load %arg3[%c0_4, %c0_5] : memref<128x256xf32, #tpu.memory_space<vmem>>, vector<128x256xf32>
    %cst = arith.constant dense<0.000000e+00> : vector<20x256xf32>
    %5 = tpu.matmul %3, %4, %cst {dimension_numbers = #tpu.dot_dimension_numbers<[1], [0], [0], [1], [0, 0, 1, 1], [], []>} : vector<20x128xf32>, vector<128x256xf32>, vector<20x256xf32> -> vector<20x256xf32>
    %c0_6 = arith.constant 0 : index
    %c0_7 = arith.constant 0 : index
    %6 = vector.load %arg4[%c0_6, %c0_7] : memref<1x256xf32, #tpu.memory_space<vmem>>, vector<1x256xf32>
    %7 = vector.broadcast %6 : vector<1x256xf32> to vector<20x256xf32>
    %8 = arith.addf %5, %7 : vector<20x256xf32>
    %9 = vector.extract_strided_slice %8 {offsets = [0, 0], sizes = [20, 64], strides = [1, 1]} : vector<20x256xf32> to vector<20x64xf32>
    %10 = vector.extract_strided_slice %8 {offsets = [0, 128], sizes = [20, 64], strides = [1, 1]} : vector<20x256xf32> to vector<20x64xf32>
    %cst_8 = arith.constant dense<0.000000e+00> : vector<20x20xf32>
    %11 = tpu.matmul %10, %9, %cst_8 {dimension_numbers = #tpu.dot_dimension_numbers<[1], [1], [0], [0], [0, 0, 1, 0], [], []>} : vector<20x64xf32>, vector<20x64xf32>, vector<20x20xf32> -> vector<20x20xf32>
    %cst_9 = arith.constant 1.562500e-02 : f32
    %12 = vector.broadcast %cst_9 : f32 to vector<20x20xf32>
    %13 = arith.mulf %11, %12 : vector<20x20xf32>
    %14 = math.tanh %13 : vector<20x20xf32>
    %c0_10 = arith.constant 0 : index
    %15 = memref.load %arg5[%c0_10] : memref<2xf32, #tpu.memory_space<smem>>
    %16 = vector.broadcast %15 : f32 to vector<20x20xf32>
    %17 = arith.mulf %14, %16 : vector<20x20xf32>
    %c0_11 = arith.constant 0 : index
    %c0_12 = arith.constant 0 : index
    %c0_13 = arith.constant 0 : index
    %18 = vector.load %arg6[%c0_11, %c0_12, %c0_13] : memref<2x20x20xf32, #tpu.memory_space<vmem>>, vector<1x20x20xf32>
    %19 = vector.shape_cast %18 : vector<1x20x20xf32> to vector<20x20xf32>
    %20 = arith.addf %17, %19 : vector<20x20xf32>
    %cst_14 = arith.constant dense<0.000000e+00> : vector<20x128xf32>
    %21 = tpu.matmul %20, %1, %cst_14 {dimension_numbers = #tpu.dot_dimension_numbers<[1], [0], [0], [1], [0, 0, 1, 1], [], []>} : vector<20x20xf32>, vector<20x128xf32>, vector<20x128xf32> -> vector<20x128xf32>
    %22 = vector.extract_strided_slice %8 {offsets = [0, 64], sizes = [20, 64], strides = [1, 1]} : vector<20x256xf32> to vector<20x64xf32>
    %23 = vector.extract_strided_slice %8 {offsets = [0, 192], sizes = [20, 64], strides = [1, 1]} : vector<20x256xf32> to vector<20x64xf32>
    %cst_15 = arith.constant dense<0.000000e+00> : vector<20x20xf32>
    %24 = tpu.matmul %23, %22, %cst_15 {dimension_numbers = #tpu.dot_dimension_numbers<[1], [1], [0], [0], [0, 0, 1, 0], [], []>} : vector<20x64xf32>, vector<20x64xf32>, vector<20x20xf32> -> vector<20x20xf32>
    %cst_16 = arith.constant 1.562500e-02 : f32
    %25 = vector.broadcast %cst_16 : f32 to vector<20x20xf32>
    %26 = arith.mulf %24, %25 : vector<20x20xf32>
    %27 = math.tanh %26 : vector<20x20xf32>
    %c1 = arith.constant 1 : index
    %28 = memref.load %arg5[%c1] : memref<2xf32, #tpu.memory_space<smem>>
    %29 = vector.broadcast %28 : f32 to vector<20x20xf32>
    %30 = arith.mulf %27, %29 : vector<20x20xf32>
    %c1_17 = arith.constant 1 : index
    %c0_18 = arith.constant 0 : index
    %c0_19 = arith.constant 0 : index
    %31 = vector.load %arg6[%c1_17, %c0_18, %c0_19] : memref<2x20x20xf32, #tpu.memory_space<vmem>>, vector<1x20x20xf32>
    %32 = vector.shape_cast %31 : vector<1x20x20xf32> to vector<20x20xf32>
    %33 = arith.addf %30, %32 : vector<20x20xf32>
    %cst_20 = arith.constant dense<0.000000e+00> : vector<20x128xf32>
    %34 = tpu.matmul %33, %1, %cst_20 {dimension_numbers = #tpu.dot_dimension_numbers<[1], [0], [0], [1], [0, 0, 1, 1], [], []>} : vector<20x20xf32>, vector<20x128xf32>, vector<20x128xf32> -> vector<20x128xf32>
    %35 = tpu.concatenate %21, %34 in 1 : vector<20x128xf32>, vector<20x128xf32> -> vector<20x256xf32>
    %c0_21 = arith.constant 0 : index
    %c0_22 = arith.constant 0 : index
    %36 = vector.load %arg7[%c0_21, %c0_22] : memref<256x128xf32, #tpu.memory_space<vmem>>, vector<256x128xf32>
    %cst_23 = arith.constant dense<0.000000e+00> : vector<20x128xf32>
    %37 = tpu.matmul %35, %36, %cst_23 {dimension_numbers = #tpu.dot_dimension_numbers<[1], [0], [0], [1], [0, 0, 1, 1], [], []>} : vector<20x256xf32>, vector<256x128xf32>, vector<20x128xf32> -> vector<20x128xf32>
    %c0_24 = arith.constant 0 : index
    %c0_25 = arith.constant 0 : index
    %38 = vector.load %arg8[%c0_24, %c0_25] : memref<1x128xf32, #tpu.memory_space<vmem>>, vector<1x128xf32>
    %39 = vector.broadcast %38 : vector<1x128xf32> to vector<20x128xf32>
    %40 = arith.addf %37, %39 : vector<20x128xf32>
    %41 = arith.addf %40, %1 : vector<20x128xf32>
    %cst_26 = arith.constant 0.000000e+00 : f32
    %42 = vector.broadcast %cst_26 : f32 to vector<20x128xf32>
    %43 = arith.cmpf oge, %41, %42 : vector<20x128xf32>
    %cst_27 = arith.constant 1.000000e-01 : f32
    %44 = vector.broadcast %cst_27 : f32 to vector<20x128xf32>
    %45 = arith.mulf %44, %41 : vector<20x128xf32>
    %46 = arith.select %43, %41, %45 : vector<20x128xi1>, vector<20x128xf32>
    %c0_28 = arith.constant 0 : index
    %c0_29 = arith.constant 0 : index
    %47 = vector.load %arg9[%c0_28, %c0_29] : memref<128x128xf32, #tpu.memory_space<vmem>>, vector<128x128xf32>
    %cst_30 = arith.constant dense<0.000000e+00> : vector<20x128xf32>
    %48 = tpu.matmul %46, %47, %cst_30 {dimension_numbers = #tpu.dot_dimension_numbers<[1], [0], [0], [1], [0, 0, 1, 1], [], []>} : vector<20x128xf32>, vector<128x128xf32>, vector<20x128xf32> -> vector<20x128xf32>
    %c0_31 = arith.constant 0 : index
    %c0_32 = arith.constant 0 : index
    %49 = vector.load %arg10[%c0_31, %c0_32] : memref<1x128xf32, #tpu.memory_space<vmem>>, vector<1x128xf32>
    %50 = vector.broadcast %49 : vector<1x128xf32> to vector<20x128xf32>
    %51 = arith.addf %48, %50 : vector<20x128xf32>
    %52 = arith.addf %51, %1 : vector<20x128xf32>
    %cst_33 = arith.constant 0.000000e+00 : f32
    %53 = vector.broadcast %cst_33 : f32 to vector<20x128xf32>
    %54 = arith.cmpf oge, %52, %53 : vector<20x128xf32>
    %cst_34 = arith.constant 1.000000e-01 : f32
    %55 = vector.broadcast %cst_34 : f32 to vector<20x128xf32>
    %56 = arith.mulf %55, %52 : vector<20x128xf32>
    %57 = arith.select %54, %52, %56 : vector<20x128xi1>, vector<20x128xf32>
    %c0_35 = arith.constant 0 : index
    %c0_36 = arith.constant 0 : index
    %58 = vector.load %arg11[%c0_35, %c0_36] : memref<128x128xf32, #tpu.memory_space<vmem>>, vector<128x128xf32>
    %cst_37 = arith.constant dense<0.000000e+00> : vector<20x128xf32>
    %59 = tpu.matmul %57, %58, %cst_37 {dimension_numbers = #tpu.dot_dimension_numbers<[1], [0], [0], [1], [0, 0, 1, 1], [], []>} : vector<20x128xf32>, vector<128x128xf32>, vector<20x128xf32> -> vector<20x128xf32>
    %c0_38 = arith.constant 0 : index
    %c0_39 = arith.constant 0 : index
    %60 = vector.load %arg12[%c0_38, %c0_39] : memref<1x128xf32, #tpu.memory_space<vmem>>, vector<1x128xf32>
    %61 = vector.broadcast %60 : vector<1x128xf32> to vector<20x128xf32>
    %62 = arith.addf %59, %61 : vector<20x128xf32>
    %63 = arith.addf %62, %57 : vector<20x128xf32>
    %cst_40 = arith.constant 0.000000e+00 : f32
    %64 = vector.broadcast %cst_40 : f32 to vector<20x128xf32>
    %65 = arith.cmpf oge, %63, %64 : vector<20x128xf32>
    %cst_41 = arith.constant 1.000000e-01 : f32
    %66 = vector.broadcast %cst_41 : f32 to vector<20x128xf32>
    %67 = arith.mulf %66, %63 : vector<20x128xf32>
    %68 = arith.select %65, %63, %67 : vector<20x128xi1>, vector<20x128xf32>
    %c0_42 = arith.constant 0 : index
    %c0_43 = arith.constant 0 : index
    %c0_44 = arith.constant 0 : index
    %69 = vector.load %arg13[%c0_42, %c0_43, %c0_44] : memref<1x20x128xf32, #tpu.memory_space<vmem>>, vector<1x20x128xf32>
    %70 = vector.shape_cast %69 : vector<1x20x128xf32> to vector<20x128xf32>
    %71 = vector.shape_cast %68 : vector<20x128xf32> to vector<1x20x128xf32>
    tpu.vector_store %arg13[%c0_42, %c0_43, %c0_44], %71 {strides = array<i32>} : memref<1x20x128xf32, #tpu.memory_space<vmem>>, vector<1x20x128xf32>,
    return
  }
  func.func @transform_0(%arg0: i32) -> (i32, i32, i32) {
    %c0_i32 = arith.constant 0 : i32
    %c0_i32_0 = arith.constant 0 : i32
    %c0_i32_1 = arith.constant 0 : i32
    return %arg0, %c0_i32, %c0_i32_0 : i32, i32, i32
  }
  func.func @transform_1(%arg0: i32) -> (i32, i32) {
    %c0_i32 = arith.constant 0 : i32
    %c0_i32_0 = arith.constant 0 : i32
    %c0_i32_1 = arith.constant 0 : i32
    return %c0_i32, %c0_i32_0 : i32, i32
  }
  func.func @transform_2(%arg0: i32) -> (i32, i32) {
    %c0_i32 = arith.constant 0 : i32
    %c0_i32_0 = arith.constant 0 : i32
    %c0_i32_1 = arith.constant 0 : i32
    return %c0_i32, %c0_i32_0 : i32, i32
  }
  func.func @transform_3(%arg0: i32) -> (i32, i32) {
    %c0_i32 = arith.constant 0 : i32
    %c0_i32_0 = arith.constant 0 : i32
    %c0_i32_1 = arith.constant 0 : i32
    return %c0_i32, %c0_i32_0 : i32, i32
  }
  func.func @transform_4(%arg0: i32) -> i32 {
    %c0_i32 = arith.constant 0 : i32
    %c0_i32_0 = arith.constant 0 : i32
    return %c0_i32 : i32
  }
  func.func @transform_5(%arg0: i32) -> (i32, i32, i32) {
    %c0_i32 = arith.constant 0 : i32
    %c0_i32_0 = arith.constant 0 : i32
    %c0_i32_1 = arith.constant 0 : i32
    %c0_i32_2 = arith.constant 0 : i32
    return %c0_i32, %c0_i32_0, %c0_i32_1 : i32, i32, i32
  }
  func.func @transform_6(%arg0: i32) -> (i32, i32) {
    %c0_i32 = arith.constant 0 : i32
    %c0_i32_0 = arith.constant 0 : i32
    %c0_i32_1 = arith.constant 0 : i32
    return %c0_i32, %c0_i32_0 : i32, i32
  }
  func.func @transform_7(%arg0: i32) -> (i32, i32) {
    %c0_i32 = arith.constant 0 : i32
    %c0_i32_0 = arith.constant 0 : i32
    %c0_i32_1 = arith.constant 0 : i32
    return %c0_i32, %c0_i32_0 : i32, i32
  }
  func.func @transform_8(%arg0: i32) -> (i32, i32) {
    %c0_i32 = arith.constant 0 : i32
    %c0_i32_0 = arith.constant 0 : i32
    %c0_i32_1 = arith.constant 0 : i32
    return %c0_i32, %c0_i32_0 : i32, i32
  }
  func.func @transform_9(%arg0: i32) -> (i32, i32) {
    %c0_i32 = arith.constant 0 : i32
    %c0_i32_0 = arith.constant 0 : i32
    %c0_i32_1 = arith.constant 0 : i32
    return %c0_i32, %c0_i32_0 : i32, i32
  }
  func.func @transform_10(%arg0: i32) -> (i32, i32) {
    %c0_i32 = arith.constant 0 : i32
    %c0_i32_0 = arith.constant 0 : i32
    %c0_i32_1 = arith.constant 0 : i32
    return %c0_i32, %c0_i32_0 : i32, i32
  }
  func.func @transform_11(%arg0: i32) -> (i32, i32) {
    %c0_i32 = arith.constant 0 : i32
    %c0_i32_0 = arith.constant 0 : i32
    %c0_i32_1 = arith.constant 0 : i32
    return %c0_i32, %c0_i32_0 : i32, i32
  }
  func.func @transform_12(%arg0: i32) -> (i32, i32, i32) {
    %c0_i32 = arith.constant 0 : i32
    %c0_i32_0 = arith.constant 0 : i32
    %c0_i32_1 = arith.constant 0 : i32
    return %arg0, %c0_i32, %c0_i32_0 : i32, i32, i32
  }
}

module attributes {stable_mosaic.version = 11 : i64} {
  func.func @_fused_block_kernel(%arg0: i32, %arg1: memref<1x7x16xf32, #tpu.memory_space<vmem>>, %arg2: memref<16x128xf32, #tpu.memory_space<vmem>>, %arg3: memref<1x128xf32, #tpu.memory_space<vmem>>, %arg4: memref<7x128xf32, #tpu.memory_space<vmem>>, %arg5: memref<128x256xf32, #tpu.memory_space<vmem>>, %arg6: memref<1x256xf32, #tpu.memory_space<vmem>>, %arg7: memref<2xf32, #tpu.memory_space<smem>>, %arg8: memref<2x7x7xf32, #tpu.memory_space<vmem>>, %arg9: memref<256x128xf32, #tpu.memory_space<vmem>>, %arg10: memref<1x128xf32, #tpu.memory_space<vmem>>, %arg11: memref<128x128xf32, #tpu.memory_space<vmem>>, %arg12: memref<1x128xf32, #tpu.memory_space<vmem>>, %arg13: memref<128x128xf32, #tpu.memory_space<vmem>>, %arg14: memref<1x128xf32, #tpu.memory_space<vmem>>, %arg15: memref<1x7x128xf32, #tpu.memory_space<vmem>>) attributes {dimension_semantics = [#tpu.dimension_semantics<parallel>], iteration_bounds = array<i64: 2>, scalar_prefetch = 0 : i64, scratch_operands = 0 : i64, tpu.core_type = #tpu.core_type<tc>, window_params = [{transform_indices = @transform_0, window_bounds = array<i64: 1, 7, 16>}, {pipeline_mode = #tpu.pipeline_mode<synchronous>, transform_indices = @transform_1, window_bounds = array<i64: 16, 128>}, {pipeline_mode = #tpu.pipeline_mode<synchronous>, transform_indices = @transform_2, window_bounds = array<i64: 1, 128>}, {pipeline_mode = #tpu.pipeline_mode<synchronous>, transform_indices = @transform_3, window_bounds = array<i64: 7, 128>}, {pipeline_mode = #tpu.pipeline_mode<synchronous>, transform_indices = @transform_4, window_bounds = array<i64: 128, 256>}, {pipeline_mode = #tpu.pipeline_mode<synchronous>, transform_indices = @transform_5, window_bounds = array<i64: 1, 256>}, {transform_indices = @transform_6, window_bounds = array<i64: 2>}, {pipeline_mode = #tpu.pipeline_mode<synchronous>, transform_indices = @transform_7, window_bounds = array<i64: 2, 7, 7>}, {pipeline_mode = #tpu.pipeline_mode<synchronous>, transform_indices = @transform_8, window_bounds = array<i64: 256, 128>}, {pipeline_mode = #tpu.pipeline_mode<synchronous>, transform_indices = @transform_9, window_bounds = array<i64: 1, 128>}, {pipeline_mode = #tpu.pipeline_mode<synchronous>, transform_indices = @transform_10, window_bounds = array<i64: 128, 128>}, {pipeline_mode = #tpu.pipeline_mode<synchronous>, transform_indices = @transform_11, window_bounds = array<i64: 1, 128>}, {pipeline_mode = #tpu.pipeline_mode<synchronous>, transform_indices = @transform_12, window_bounds = array<i64: 128, 128>}, {pipeline_mode = #tpu.pipeline_mode<synchronous>, transform_indices = @transform_13, window_bounds = array<i64: 1, 128>}, {transform_indices = @transform_14, window_bounds = array<i64: 1, 7, 128>}]} {
    %c0 = arith.constant 0 : index
    %c0_0 = arith.constant 0 : index
    %c0_1 = arith.constant 0 : index
    %0 = vector.load %arg1[%c0, %c0_0, %c0_1] : memref<1x7x16xf32, #tpu.memory_space<vmem>>, vector<1x7x16xf32>
    %1 = vector.shape_cast %0 : vector<1x7x16xf32> to vector<7x16xf32>
    %c0_2 = arith.constant 0 : index
    %c0_3 = arith.constant 0 : index
    %2 = vector.load %arg2[%c0_2, %c0_3] : memref<16x128xf32, #tpu.memory_space<vmem>>, vector<16x128xf32>
    %cst = arith.constant dense<0.000000e+00> : vector<7x128xf32>
    %3 = tpu.matmul %1, %2, %cst {dimension_numbers = #tpu.dot_dimension_numbers<[1], [0], [0], [1], [0, 0, 1, 1], [], []>} : vector<7x16xf32>, vector<16x128xf32>, vector<7x128xf32> -> vector<7x128xf32>
    %c0_4 = arith.constant 0 : index
    %c0_5 = arith.constant 0 : index
    %4 = vector.load %arg3[%c0_4, %c0_5] : memref<1x128xf32, #tpu.memory_space<vmem>>, vector<1x128xf32>
    %5 = vector.broadcast %4 : vector<1x128xf32> to vector<7x128xf32>
    %6 = arith.addf %3, %5 : vector<7x128xf32>
    %cst_6 = arith.constant 0.000000e+00 : f32
    %7 = vector.broadcast %cst_6 : f32 to vector<7x128xf32>
    %8 = arith.cmpf oge, %6, %7 : vector<7x128xf32>
    %cst_7 = arith.constant 1.000000e-01 : f32
    %9 = vector.broadcast %cst_7 : f32 to vector<7x128xf32>
    %10 = arith.mulf %9, %6 : vector<7x128xf32>
    %11 = arith.select %8, %6, %10 : vector<7x128xi1>, vector<7x128xf32>
    %c0_8 = arith.constant 0 : index
    %c0_9 = arith.constant 0 : index
    %12 = vector.load %arg4[%c0_8, %c0_9] : memref<7x128xf32, #tpu.memory_space<vmem>>, vector<7x128xf32>
    %13 = arith.addf %11, %12 : vector<7x128xf32>
    %c0_10 = arith.constant 0 : index
    %c0_11 = arith.constant 0 : index
    %14 = vector.load %arg5[%c0_10, %c0_11] : memref<128x256xf32, #tpu.memory_space<vmem>>, vector<128x256xf32>
    %cst_12 = arith.constant dense<0.000000e+00> : vector<7x256xf32>
    %15 = tpu.matmul %13, %14, %cst_12 {dimension_numbers = #tpu.dot_dimension_numbers<[1], [0], [0], [1], [0, 0, 1, 1], [], []>} : vector<7x128xf32>, vector<128x256xf32>, vector<7x256xf32> -> vector<7x256xf32>
    %c0_13 = arith.constant 0 : index
    %c0_14 = arith.constant 0 : index
    %16 = vector.load %arg6[%c0_13, %c0_14] : memref<1x256xf32, #tpu.memory_space<vmem>>, vector<1x256xf32>
    %17 = vector.broadcast %16 : vector<1x256xf32> to vector<7x256xf32>
    %18 = arith.addf %15, %17 : vector<7x256xf32>
    %19 = vector.extract_strided_slice %18 {offsets = [0, 0], sizes = [7, 64], strides = [1, 1]} : vector<7x256xf32> to vector<7x64xf32>
    %20 = vector.extract_strided_slice %18 {offsets = [0, 128], sizes = [7, 64], strides = [1, 1]} : vector<7x256xf32> to vector<7x64xf32>
    %cst_15 = arith.constant dense<0.000000e+00> : vector<7x7xf32>
    %21 = tpu.matmul %20, %19, %cst_15 {dimension_numbers = #tpu.dot_dimension_numbers<[1], [1], [0], [0], [0, 0, 1, 0], [], []>} : vector<7x64xf32>, vector<7x64xf32>, vector<7x7xf32> -> vector<7x7xf32>
    %cst_16 = arith.constant 1.562500e-02 : f32
    %22 = vector.broadcast %cst_16 : f32 to vector<7x7xf32>
    %23 = arith.mulf %21, %22 : vector<7x7xf32>
    %24 = math.tanh %23 : vector<7x7xf32>
    %c0_17 = arith.constant 0 : index
    %25 = memref.load %arg7[%c0_17] : memref<2xf32, #tpu.memory_space<smem>>
    %26 = vector.broadcast %25 : f32 to vector<7x7xf32>
    %27 = arith.mulf %24, %26 : vector<7x7xf32>
    %c0_18 = arith.constant 0 : index
    %c0_19 = arith.constant 0 : index
    %c0_20 = arith.constant 0 : index
    %28 = vector.load %arg8[%c0_18, %c0_19, %c0_20] : memref<2x7x7xf32, #tpu.memory_space<vmem>>, vector<1x7x7xf32>
    %29 = vector.shape_cast %28 : vector<1x7x7xf32> to vector<7x7xf32>
    %30 = arith.addf %27, %29 : vector<7x7xf32>
    %cst_21 = arith.constant dense<0.000000e+00> : vector<7x128xf32>
    %31 = tpu.matmul %30, %11, %cst_21 {dimension_numbers = #tpu.dot_dimension_numbers<[1], [0], [0], [1], [0, 0, 1, 1], [], []>} : vector<7x7xf32>, vector<7x128xf32>, vector<7x128xf32> -> vector<7x128xf32>
    %32 = vector.extract_strided_slice %18 {offsets = [0, 64], sizes = [7, 64], strides = [1, 1]} : vector<7x256xf32> to vector<7x64xf32>
    %33 = vector.extract_strided_slice %18 {offsets = [0, 192], sizes = [7, 64], strides = [1, 1]} : vector<7x256xf32> to vector<7x64xf32>
    %cst_22 = arith.constant dense<0.000000e+00> : vector<7x7xf32>
    %34 = tpu.matmul %33, %32, %cst_22 {dimension_numbers = #tpu.dot_dimension_numbers<[1], [1], [0], [0], [0, 0, 1, 0], [], []>} : vector<7x64xf32>, vector<7x64xf32>, vector<7x7xf32> -> vector<7x7xf32>
    %cst_23 = arith.constant 1.562500e-02 : f32
    %35 = vector.broadcast %cst_23 : f32 to vector<7x7xf32>
    %36 = arith.mulf %34, %35 : vector<7x7xf32>
    %37 = math.tanh %36 : vector<7x7xf32>
    %c1 = arith.constant 1 : index
    %38 = memref.load %arg7[%c1] : memref<2xf32, #tpu.memory_space<smem>>
    %39 = vector.broadcast %38 : f32 to vector<7x7xf32>
    %40 = arith.mulf %37, %39 : vector<7x7xf32>
    %c1_24 = arith.constant 1 : index
    %c0_25 = arith.constant 0 : index
    %c0_26 = arith.constant 0 : index
    %41 = vector.load %arg8[%c1_24, %c0_25, %c0_26] : memref<2x7x7xf32, #tpu.memory_space<vmem>>, vector<1x7x7xf32>
    %42 = vector.shape_cast %41 : vector<1x7x7xf32> to vector<7x7xf32>
    %43 = arith.addf %40, %42 : vector<7x7xf32>
    %cst_27 = arith.constant dense<0.000000e+00> : vector<7x128xf32>
    %44 = tpu.matmul %43, %11, %cst_27 {dimension_numbers = #tpu.dot_dimension_numbers<[1], [0], [0], [1], [0, 0, 1, 1], [], []>} : vector<7x7xf32>, vector<7x128xf32>, vector<7x128xf32> -> vector<7x128xf32>
    %45 = tpu.concatenate %31, %44 in 1 : vector<7x128xf32>, vector<7x128xf32> -> vector<7x256xf32>
    %c0_28 = arith.constant 0 : index
    %c0_29 = arith.constant 0 : index
    %46 = vector.load %arg9[%c0_28, %c0_29] : memref<256x128xf32, #tpu.memory_space<vmem>>, vector<256x128xf32>
    %cst_30 = arith.constant dense<0.000000e+00> : vector<7x128xf32>
    %47 = tpu.matmul %45, %46, %cst_30 {dimension_numbers = #tpu.dot_dimension_numbers<[1], [0], [0], [1], [0, 0, 1, 1], [], []>} : vector<7x256xf32>, vector<256x128xf32>, vector<7x128xf32> -> vector<7x128xf32>
    %c0_31 = arith.constant 0 : index
    %c0_32 = arith.constant 0 : index
    %48 = vector.load %arg10[%c0_31, %c0_32] : memref<1x128xf32, #tpu.memory_space<vmem>>, vector<1x128xf32>
    %49 = vector.broadcast %48 : vector<1x128xf32> to vector<7x128xf32>
    %50 = arith.addf %47, %49 : vector<7x128xf32>
    %51 = arith.addf %50, %11 : vector<7x128xf32>
    %cst_33 = arith.constant 0.000000e+00 : f32
    %52 = vector.broadcast %cst_33 : f32 to vector<7x128xf32>
    %53 = arith.cmpf oge, %51, %52 : vector<7x128xf32>
    %cst_34 = arith.constant 1.000000e-01 : f32
    %54 = vector.broadcast %cst_34 : f32 to vector<7x128xf32>
    %55 = arith.mulf %54, %51 : vector<7x128xf32>
    %56 = arith.select %53, %51, %55 : vector<7x128xi1>, vector<7x128xf32>
    %c0_35 = arith.constant 0 : index
    %c0_36 = arith.constant 0 : index
    %57 = vector.load %arg11[%c0_35, %c0_36] : memref<128x128xf32, #tpu.memory_space<vmem>>, vector<128x128xf32>
    %cst_37 = arith.constant dense<0.000000e+00> : vector<7x128xf32>
    %58 = tpu.matmul %56, %57, %cst_37 {dimension_numbers = #tpu.dot_dimension_numbers<[1], [0], [0], [1], [0, 0, 1, 1], [], []>} : vector<7x128xf32>, vector<128x128xf32>, vector<7x128xf32> -> vector<7x128xf32>
    %c0_38 = arith.constant 0 : index
    %c0_39 = arith.constant 0 : index
    %59 = vector.load %arg12[%c0_38, %c0_39] : memref<1x128xf32, #tpu.memory_space<vmem>>, vector<1x128xf32>
    %60 = vector.broadcast %59 : vector<1x128xf32> to vector<7x128xf32>
    %61 = arith.addf %58, %60 : vector<7x128xf32>
    %62 = arith.addf %61, %11 : vector<7x128xf32>
    %cst_40 = arith.constant 0.000000e+00 : f32
    %63 = vector.broadcast %cst_40 : f32 to vector<7x128xf32>
    %64 = arith.cmpf oge, %62, %63 : vector<7x128xf32>
    %cst_41 = arith.constant 1.000000e-01 : f32
    %65 = vector.broadcast %cst_41 : f32 to vector<7x128xf32>
    %66 = arith.mulf %65, %62 : vector<7x128xf32>
    %67 = arith.select %64, %62, %66 : vector<7x128xi1>, vector<7x128xf32>
    %c0_42 = arith.constant 0 : index
    %c0_43 = arith.constant 0 : index
    %68 = vector.load %arg13[%c0_42, %c0_43] : memref<128x128xf32, #tpu.memory_space<vmem>>, vector<128x128xf32>
    %cst_44 = arith.constant dense<0.000000e+00> : vector<7x128xf32>
    %69 = tpu.matmul %67, %68, %cst_44 {dimension_numbers = #tpu.dot_dimension_numbers<[1], [0], [0], [1], [0, 0, 1, 1], [], []>} : vector<7x128xf32>, vector<128x128xf32>, vector<7x128xf32> -> vector<7x128xf32>
    %c0_45 = arith.constant 0 : index
    %c0_46 = arith.constant 0 : index
    %70 = vector.load %arg14[%c0_45, %c0_46] : memref<1x128xf32, #tpu.memory_space<vmem>>, vector<1x128xf32>
    %71 = vector.broadcast %70 : vector<1x128xf32> to vector<7x128xf32>
    %72 = arith.addf %69, %71 : vector<7x128xf32>
    %73 = arith.addf %72, %67 : vector<7x128xf32>
    %cst_47 = arith.constant 0.000000e+00 : f32
    %74 = vector.broadcast %cst_47 : f32 to vector<7x128xf32>
    %75 = arith.cmpf oge, %73, %74 : vector<7x128xf32>
    %cst_48 = arith.constant 1.000000e-01 : f32
    %76 = vector.broadcast %cst_48 : f32 to vector<7x128xf32>
    %77 = arith.mulf %76, %73 : vector<7x128xf32>
    %78 = arith.select %75, %73, %77 : vector<7x128xi1>, vector<7x128xf32>
    %c0_49 = arith.constant 0 : index
    %c0_50 = arith.constant 0 : index
    %c0_51 = arith.constant 0 : index
    %79 = vector.load %arg15[%c0_49, %c0_50, %c0_51] : memref<1x7x128xf32, #tpu.memory_space<vmem>>, vector<1x7x128xf32>
    %80 = vector.shape_cast %79 : vector<1x7x128xf32> to vector<7x128xf32>
    %81 = vector.shape_cast %78 : vector<7x128xf32> to vector<1x7x128xf32>
    tpu.vector_store %arg15[%c0_49, %c0_50, %c0_51], %81 {strides = array<i32>} : memref<1x7x128xf32, #tpu.memory_space<vmem>>, vector<1x7x128xf32>,
    return
  }
  func.func @transform_0(%arg0: i32) -> (i32, i32, i32) {
    %c0_i32 = arith.constant 0 : i32
    %c0_i32_0 = arith.constant 0 : i32
    %c0_i32_1 = arith.constant 0 : i32
    return %arg0, %c0_i32, %c0_i32_0 : i32, i32, i32
  }
  func.func @transform_1(%arg0: i32) -> (i32, i32) {
    %c0_i32 = arith.constant 0 : i32
    %c0_i32_0 = arith.constant 0 : i32
    %c0_i32_1 = arith.constant 0 : i32
    return %c0_i32, %c0_i32_0 : i32, i32
  }
  func.func @transform_2(%arg0: i32) -> (i32, i32) {
    %c0_i32 = arith.constant 0 : i32
    %c0_i32_0 = arith.constant 0 : i32
    %c0_i32_1 = arith.constant 0 : i32
    return %c0_i32, %c0_i32_0 : i32, i32
  }
  func.func @transform_3(%arg0: i32) -> (i32, i32) {
    %c0_i32 = arith.constant 0 : i32
    %c0_i32_0 = arith.constant 0 : i32
    %c0_i32_1 = arith.constant 0 : i32
    return %c0_i32, %c0_i32_0 : i32, i32
  }
  func.func @transform_4(%arg0: i32) -> (i32, i32) {
    %c0_i32 = arith.constant 0 : i32
    %c0_i32_0 = arith.constant 0 : i32
    %c0_i32_1 = arith.constant 0 : i32
    return %c0_i32, %c0_i32_0 : i32, i32
  }
  func.func @transform_5(%arg0: i32) -> (i32, i32) {
    %c0_i32 = arith.constant 0 : i32
    %c0_i32_0 = arith.constant 0 : i32
    %c0_i32_1 = arith.constant 0 : i32
    return %c0_i32, %c0_i32_0 : i32, i32
  }
  func.func @transform_6(%arg0: i32) -> i32 {
    %c0_i32 = arith.constant 0 : i32
    %c0_i32_0 = arith.constant 0 : i32
    return %c0_i32 : i32
  }
  func.func @transform_7(%arg0: i32) -> (i32, i32, i32) {
    %c0_i32 = arith.constant 0 : i32
    %c0_i32_0 = arith.constant 0 : i32
    %c0_i32_1 = arith.constant 0 : i32
    %c0_i32_2 = arith.constant 0 : i32
    return %c0_i32, %c0_i32_0, %c0_i32_1 : i32, i32, i32
  }
  func.func @transform_8(%arg0: i32) -> (i32, i32) {
    %c0_i32 = arith.constant 0 : i32
    %c0_i32_0 = arith.constant 0 : i32
    %c0_i32_1 = arith.constant 0 : i32
    return %c0_i32, %c0_i32_0 : i32, i32
  }
  func.func @transform_9(%arg0: i32) -> (i32, i32) {
    %c0_i32 = arith.constant 0 : i32
    %c0_i32_0 = arith.constant 0 : i32
    %c0_i32_1 = arith.constant 0 : i32
    return %c0_i32, %c0_i32_0 : i32, i32
  }
  func.func @transform_10(%arg0: i32) -> (i32, i32) {
    %c0_i32 = arith.constant 0 : i32
    %c0_i32_0 = arith.constant 0 : i32
    %c0_i32_1 = arith.constant 0 : i32
    return %c0_i32, %c0_i32_0 : i32, i32
  }
  func.func @transform_11(%arg0: i32) -> (i32, i32) {
    %c0_i32 = arith.constant 0 : i32
    %c0_i32_0 = arith.constant 0 : i32
    %c0_i32_1 = arith.constant 0 : i32
    return %c0_i32, %c0_i32_0 : i32, i32
  }
  func.func @transform_12(%arg0: i32) -> (i32, i32) {
    %c0_i32 = arith.constant 0 : i32
    %c0_i32_0 = arith.constant 0 : i32
    %c0_i32_1 = arith.constant 0 : i32
    return %c0_i32, %c0_i32_0 : i32, i32
  }
  func.func @transform_13(%arg0: i32) -> (i32, i32) {
    %c0_i32 = arith.constant 0 : i32
    %c0_i32_0 = arith.constant 0 : i32
    %c0_i32_1 = arith.constant 0 : i32
    return %c0_i32, %c0_i32_0 : i32, i32
  }
  func.func @transform_14(%arg0: i32) -> (i32, i32, i32) {
    %c0_i32 = arith.constant 0 : i32
    %c0_i32_0 = arith.constant 0 : i32
    %c0_i32_1 = arith.constant 0 : i32
    return %arg0, %c0_i32, %c0_i32_0 : i32, i32, i32
  }
}

module attributes {stable_mosaic.version = 11 : i64} {
  func.func @_fused_block_kernel(%arg0: i32, %arg1: memref<1x7x128xf32, #tpu.memory_space<vmem>>, %arg2: memref<7x128xf32, #tpu.memory_space<vmem>>, %arg3: memref<128x256xf32, #tpu.memory_space<vmem>>, %arg4: memref<1x256xf32, #tpu.memory_space<vmem>>, %arg5: memref<2xf32, #tpu.memory_space<smem>>, %arg6: memref<2x7x7xf32, #tpu.memory_space<vmem>>, %arg7: memref<256x128xf32, #tpu.memory_space<vmem>>, %arg8: memref<1x128xf32, #tpu.memory_space<vmem>>, %arg9: memref<128x128xf32, #tpu.memory_space<vmem>>, %arg10: memref<1x128xf32, #tpu.memory_space<vmem>>, %arg11: memref<128x128xf32, #tpu.memory_space<vmem>>, %arg12: memref<1x128xf32, #tpu.memory_space<vmem>>, %arg13: memref<1x7x128xf32, #tpu.memory_space<vmem>>) attributes {dimension_semantics = [#tpu.dimension_semantics<parallel>], iteration_bounds = array<i64: 2>, scalar_prefetch = 0 : i64, scratch_operands = 0 : i64, tpu.core_type = #tpu.core_type<tc>, window_params = [{transform_indices = @transform_0, window_bounds = array<i64: 1, 7, 128>}, {pipeline_mode = #tpu.pipeline_mode<synchronous>, transform_indices = @transform_1, window_bounds = array<i64: 7, 128>}, {pipeline_mode = #tpu.pipeline_mode<synchronous>, transform_indices = @transform_2, window_bounds = array<i64: 128, 256>}, {pipeline_mode = #tpu.pipeline_mode<synchronous>, transform_indices = @transform_3, window_bounds = array<i64: 1, 256>}, {transform_indices = @transform_4, window_bounds = array<i64: 2>}, {pipeline_mode = #tpu.pipeline_mode<synchronous>, transform_indices = @transform_5, window_bounds = array<i64: 2, 7, 7>}, {pipeline_mode = #tpu.pipeline_mode<synchronous>, transform_indices = @transform_6, window_bounds = array<i64: 256, 128>}, {pipeline_mode = #tpu.pipeline_mode<synchronous>, transform_indices = @transform_7, window_bounds = array<i64: 1, 128>}, {pipeline_mode = #tpu.pipeline_mode<synchronous>, transform_indices = @transform_8, window_bounds = array<i64: 128, 128>}, {pipeline_mode = #tpu.pipeline_mode<synchronous>, transform_indices = @transform_9, window_bounds = array<i64: 1, 128>}, {pipeline_mode = #tpu.pipeline_mode<synchronous>, transform_indices = @transform_10, window_bounds = array<i64: 128, 128>}, {pipeline_mode = #tpu.pipeline_mode<synchronous>, transform_indices = @transform_11, window_bounds = array<i64: 1, 128>}, {transform_indices = @transform_12, window_bounds = array<i64: 1, 7, 128>}]} {
    %c0 = arith.constant 0 : index
    %c0_0 = arith.constant 0 : index
    %c0_1 = arith.constant 0 : index
    %0 = vector.load %arg1[%c0, %c0_0, %c0_1] : memref<1x7x128xf32, #tpu.memory_space<vmem>>, vector<1x7x128xf32>
    %1 = vector.shape_cast %0 : vector<1x7x128xf32> to vector<7x128xf32>
    %c0_2 = arith.constant 0 : index
    %c0_3 = arith.constant 0 : index
    %2 = vector.load %arg2[%c0_2, %c0_3] : memref<7x128xf32, #tpu.memory_space<vmem>>, vector<7x128xf32>
    %3 = arith.addf %1, %2 : vector<7x128xf32>
    %c0_4 = arith.constant 0 : index
    %c0_5 = arith.constant 0 : index
    %4 = vector.load %arg3[%c0_4, %c0_5] : memref<128x256xf32, #tpu.memory_space<vmem>>, vector<128x256xf32>
    %cst = arith.constant dense<0.000000e+00> : vector<7x256xf32>
    %5 = tpu.matmul %3, %4, %cst {dimension_numbers = #tpu.dot_dimension_numbers<[1], [0], [0], [1], [0, 0, 1, 1], [], []>} : vector<7x128xf32>, vector<128x256xf32>, vector<7x256xf32> -> vector<7x256xf32>
    %c0_6 = arith.constant 0 : index
    %c0_7 = arith.constant 0 : index
    %6 = vector.load %arg4[%c0_6, %c0_7] : memref<1x256xf32, #tpu.memory_space<vmem>>, vector<1x256xf32>
    %7 = vector.broadcast %6 : vector<1x256xf32> to vector<7x256xf32>
    %8 = arith.addf %5, %7 : vector<7x256xf32>
    %9 = vector.extract_strided_slice %8 {offsets = [0, 0], sizes = [7, 64], strides = [1, 1]} : vector<7x256xf32> to vector<7x64xf32>
    %10 = vector.extract_strided_slice %8 {offsets = [0, 128], sizes = [7, 64], strides = [1, 1]} : vector<7x256xf32> to vector<7x64xf32>
    %cst_8 = arith.constant dense<0.000000e+00> : vector<7x7xf32>
    %11 = tpu.matmul %10, %9, %cst_8 {dimension_numbers = #tpu.dot_dimension_numbers<[1], [1], [0], [0], [0, 0, 1, 0], [], []>} : vector<7x64xf32>, vector<7x64xf32>, vector<7x7xf32> -> vector<7x7xf32>
    %cst_9 = arith.constant 1.562500e-02 : f32
    %12 = vector.broadcast %cst_9 : f32 to vector<7x7xf32>
    %13 = arith.mulf %11, %12 : vector<7x7xf32>
    %14 = math.tanh %13 : vector<7x7xf32>
    %c0_10 = arith.constant 0 : index
    %15 = memref.load %arg5[%c0_10] : memref<2xf32, #tpu.memory_space<smem>>
    %16 = vector.broadcast %15 : f32 to vector<7x7xf32>
    %17 = arith.mulf %14, %16 : vector<7x7xf32>
    %c0_11 = arith.constant 0 : index
    %c0_12 = arith.constant 0 : index
    %c0_13 = arith.constant 0 : index
    %18 = vector.load %arg6[%c0_11, %c0_12, %c0_13] : memref<2x7x7xf32, #tpu.memory_space<vmem>>, vector<1x7x7xf32>
    %19 = vector.shape_cast %18 : vector<1x7x7xf32> to vector<7x7xf32>
    %20 = arith.addf %17, %19 : vector<7x7xf32>
    %cst_14 = arith.constant dense<0.000000e+00> : vector<7x128xf32>
    %21 = tpu.matmul %20, %1, %cst_14 {dimension_numbers = #tpu.dot_dimension_numbers<[1], [0], [0], [1], [0, 0, 1, 1], [], []>} : vector<7x7xf32>, vector<7x128xf32>, vector<7x128xf32> -> vector<7x128xf32>
    %22 = vector.extract_strided_slice %8 {offsets = [0, 64], sizes = [7, 64], strides = [1, 1]} : vector<7x256xf32> to vector<7x64xf32>
    %23 = vector.extract_strided_slice %8 {offsets = [0, 192], sizes = [7, 64], strides = [1, 1]} : vector<7x256xf32> to vector<7x64xf32>
    %cst_15 = arith.constant dense<0.000000e+00> : vector<7x7xf32>
    %24 = tpu.matmul %23, %22, %cst_15 {dimension_numbers = #tpu.dot_dimension_numbers<[1], [1], [0], [0], [0, 0, 1, 0], [], []>} : vector<7x64xf32>, vector<7x64xf32>, vector<7x7xf32> -> vector<7x7xf32>
    %cst_16 = arith.constant 1.562500e-02 : f32
    %25 = vector.broadcast %cst_16 : f32 to vector<7x7xf32>
    %26 = arith.mulf %24, %25 : vector<7x7xf32>
    %27 = math.tanh %26 : vector<7x7xf32>
    %c1 = arith.constant 1 : index
    %28 = memref.load %arg5[%c1] : memref<2xf32, #tpu.memory_space<smem>>
    %29 = vector.broadcast %28 : f32 to vector<7x7xf32>
    %30 = arith.mulf %27, %29 : vector<7x7xf32>
    %c1_17 = arith.constant 1 : index
    %c0_18 = arith.constant 0 : index
    %c0_19 = arith.constant 0 : index
    %31 = vector.load %arg6[%c1_17, %c0_18, %c0_19] : memref<2x7x7xf32, #tpu.memory_space<vmem>>, vector<1x7x7xf32>
    %32 = vector.shape_cast %31 : vector<1x7x7xf32> to vector<7x7xf32>
    %33 = arith.addf %30, %32 : vector<7x7xf32>
    %cst_20 = arith.constant dense<0.000000e+00> : vector<7x128xf32>
    %34 = tpu.matmul %33, %1, %cst_20 {dimension_numbers = #tpu.dot_dimension_numbers<[1], [0], [0], [1], [0, 0, 1, 1], [], []>} : vector<7x7xf32>, vector<7x128xf32>, vector<7x128xf32> -> vector<7x128xf32>
    %35 = tpu.concatenate %21, %34 in 1 : vector<7x128xf32>, vector<7x128xf32> -> vector<7x256xf32>
    %c0_21 = arith.constant 0 : index
    %c0_22 = arith.constant 0 : index
    %36 = vector.load %arg7[%c0_21, %c0_22] : memref<256x128xf32, #tpu.memory_space<vmem>>, vector<256x128xf32>
    %cst_23 = arith.constant dense<0.000000e+00> : vector<7x128xf32>
    %37 = tpu.matmul %35, %36, %cst_23 {dimension_numbers = #tpu.dot_dimension_numbers<[1], [0], [0], [1], [0, 0, 1, 1], [], []>} : vector<7x256xf32>, vector<256x128xf32>, vector<7x128xf32> -> vector<7x128xf32>
    %c0_24 = arith.constant 0 : index
    %c0_25 = arith.constant 0 : index
    %38 = vector.load %arg8[%c0_24, %c0_25] : memref<1x128xf32, #tpu.memory_space<vmem>>, vector<1x128xf32>
    %39 = vector.broadcast %38 : vector<1x128xf32> to vector<7x128xf32>
    %40 = arith.addf %37, %39 : vector<7x128xf32>
    %41 = arith.addf %40, %1 : vector<7x128xf32>
    %cst_26 = arith.constant 0.000000e+00 : f32
    %42 = vector.broadcast %cst_26 : f32 to vector<7x128xf32>
    %43 = arith.cmpf oge, %41, %42 : vector<7x128xf32>
    %cst_27 = arith.constant 1.000000e-01 : f32
    %44 = vector.broadcast %cst_27 : f32 to vector<7x128xf32>
    %45 = arith.mulf %44, %41 : vector<7x128xf32>
    %46 = arith.select %43, %41, %45 : vector<7x128xi1>, vector<7x128xf32>
    %c0_28 = arith.constant 0 : index
    %c0_29 = arith.constant 0 : index
    %47 = vector.load %arg9[%c0_28, %c0_29] : memref<128x128xf32, #tpu.memory_space<vmem>>, vector<128x128xf32>
    %cst_30 = arith.constant dense<0.000000e+00> : vector<7x128xf32>
    %48 = tpu.matmul %46, %47, %cst_30 {dimension_numbers = #tpu.dot_dimension_numbers<[1], [0], [0], [1], [0, 0, 1, 1], [], []>} : vector<7x128xf32>, vector<128x128xf32>, vector<7x128xf32> -> vector<7x128xf32>
    %c0_31 = arith.constant 0 : index
    %c0_32 = arith.constant 0 : index
    %49 = vector.load %arg10[%c0_31, %c0_32] : memref<1x128xf32, #tpu.memory_space<vmem>>, vector<1x128xf32>
    %50 = vector.broadcast %49 : vector<1x128xf32> to vector<7x128xf32>
    %51 = arith.addf %48, %50 : vector<7x128xf32>
    %52 = arith.addf %51, %1 : vector<7x128xf32>
    %cst_33 = arith.constant 0.000000e+00 : f32
    %53 = vector.broadcast %cst_33 : f32 to vector<7x128xf32>
    %54 = arith.cmpf oge, %52, %53 : vector<7x128xf32>
    %cst_34 = arith.constant 1.000000e-01 : f32
    %55 = vector.broadcast %cst_34 : f32 to vector<7x128xf32>
    %56 = arith.mulf %55, %52 : vector<7x128xf32>
    %57 = arith.select %54, %52, %56 : vector<7x128xi1>, vector<7x128xf32>
    %c0_35 = arith.constant 0 : index
    %c0_36 = arith.constant 0 : index
    %58 = vector.load %arg11[%c0_35, %c0_36] : memref<128x128xf32, #tpu.memory_space<vmem>>, vector<128x128xf32>
    %cst_37 = arith.constant dense<0.000000e+00> : vector<7x128xf32>
    %59 = tpu.matmul %57, %58, %cst_37 {dimension_numbers = #tpu.dot_dimension_numbers<[1], [0], [0], [1], [0, 0, 1, 1], [], []>} : vector<7x128xf32>, vector<128x128xf32>, vector<7x128xf32> -> vector<7x128xf32>
    %c0_38 = arith.constant 0 : index
    %c0_39 = arith.constant 0 : index
    %60 = vector.load %arg12[%c0_38, %c0_39] : memref<1x128xf32, #tpu.memory_space<vmem>>, vector<1x128xf32>
    %61 = vector.broadcast %60 : vector<1x128xf32> to vector<7x128xf32>
    %62 = arith.addf %59, %61 : vector<7x128xf32>
    %63 = arith.addf %62, %57 : vector<7x128xf32>
    %cst_40 = arith.constant 0.000000e+00 : f32
    %64 = vector.broadcast %cst_40 : f32 to vector<7x128xf32>
    %65 = arith.cmpf oge, %63, %64 : vector<7x128xf32>
    %cst_41 = arith.constant 1.000000e-01 : f32
    %66 = vector.broadcast %cst_41 : f32 to vector<7x128xf32>
    %67 = arith.mulf %66, %63 : vector<7x128xf32>
    %68 = arith.select %65, %63, %67 : vector<7x128xi1>, vector<7x128xf32>
    %c0_42 = arith.constant 0 : index
    %c0_43 = arith.constant 0 : index
    %c0_44 = arith.constant 0 : index
    %69 = vector.load %arg13[%c0_42, %c0_43, %c0_44] : memref<1x7x128xf32, #tpu.memory_space<vmem>>, vector<1x7x128xf32>
    %70 = vector.shape_cast %69 : vector<1x7x128xf32> to vector<7x128xf32>
    %71 = vector.shape_cast %68 : vector<7x128xf32> to vector<1x7x128xf32>
    tpu.vector_store %arg13[%c0_42, %c0_43, %c0_44], %71 {strides = array<i32>} : memref<1x7x128xf32, #tpu.memory_space<vmem>>, vector<1x7x128xf32>,
    return
  }
  func.func @transform_0(%arg0: i32) -> (i32, i32, i32) {
    %c0_i32 = arith.constant 0 : i32
    %c0_i32_0 = arith.constant 0 : i32
    %c0_i32_1 = arith.constant 0 : i32
    return %arg0, %c0_i32, %c0_i32_0 : i32, i32, i32
  }
  func.func @transform_1(%arg0: i32) -> (i32, i32) {
    %c0_i32 = arith.constant 0 : i32
    %c0_i32_0 = arith.constant 0 : i32
    %c0_i32_1 = arith.constant 0 : i32
    return %c0_i32, %c0_i32_0 : i32, i32
  }
  func.func @transform_2(%arg0: i32) -> (i32, i32) {
    %c0_i32 = arith.constant 0 : i32
    %c0_i32_0 = arith.constant 0 : i32
    %c0_i32_1 = arith.constant 0 : i32
    return %c0_i32, %c0_i32_0 : i32, i32
  }
  func.func @transform_3(%arg0: i32) -> (i32, i32) {
    %c0_i32 = arith.constant 0 : i32
    %c0_i32_0 = arith.constant 0 : i32
    %c0_i32_1 = arith.constant 0 : i32
    return %c0_i32, %c0_i32_0 : i32, i32
  }
  func.func @transform_4(%arg0: i32) -> i32 {
    %c0_i32 = arith.constant 0 : i32
    %c0_i32_0 = arith.constant 0 : i32
    return %c0_i32 : i32
  }
  func.func @transform_5(%arg0: i32) -> (i32, i32, i32) {
    %c0_i32 = arith.constant 0 : i32
    %c0_i32_0 = arith.constant 0 : i32
    %c0_i32_1 = arith.constant 0 : i32
    %c0_i32_2 = arith.constant 0 : i32
    return %c0_i32, %c0_i32_0, %c0_i32_1 : i32, i32, i32
  }
  func.func @transform_6(%arg0: i32) -> (i32, i32) {
    %c0_i32 = arith.constant 0 : i32
    %c0_i32_0 = arith.constant 0 : i32
    %c0_i32_1 = arith.constant 0 : i32
    return %c0_i32, %c0_i32_0 : i32, i32
  }
  func.func @transform_7(%arg0: i32) -> (i32, i32) {
    %c0_i32 = arith.constant 0 : i32
    %c0_i32_0 = arith.constant 0 : i32
    %c0_i32_1 = arith.constant 0 : i32
    return %c0_i32, %c0_i32_0 : i32, i32
  }
  func.func @transform_8(%arg0: i32) -> (i32, i32) {
    %c0_i32 = arith.constant 0 : i32
    %c0_i32_0 = arith.constant 0 : i32
    %c0_i32_1 = arith.constant 0 : i32
    return %c0_i32, %c0_i32_0 : i32, i32
  }
  func.func @transform_9(%arg0: i32) -> (i32, i32) {
    %c0_i32 = arith.constant 0 : i32
    %c0_i32_0 = arith.constant 0 : i32
    %c0_i32_1 = arith.constant 0 : i32
    return %c0_i32, %c0_i32_0 : i32, i32
  }
  func.func @transform_10(%arg0: i32) -> (i32, i32) {
    %c0_i32 = arith.constant 0 : i32
    %c0_i32_0 = arith.constant 0 : i32
    %c0_i32_1 = arith.constant 0 : i32
    return %c0_i32, %c0_i32_0 : i32, i32
  }
  func.func @transform_11(%arg0: i32) -> (i32, i32) {
    %c0_i32 = arith.constant 0 : i32
    %c0_i32_0 = arith.constant 0 : i32
    %c0_i32_1 = arith.constant 0 : i32
    return %c0_i32, %c0_i32_0 : i32, i32
  }
  func.func @transform_12(%arg0: i32) -> (i32, i32, i32) {
    %c0_i32 = arith.constant 0 : i32
    %c0_i32_0 = arith.constant 0 : i32
    %c0_i32_1 = arith.constant 0 : i32
    return %arg0, %c0_i32, %c0_i32_0 : i32, i32, i32
  }
}

module attributes {stable_mosaic.version = 11 : i64} {
  func.func @_fused_block_kernel(%arg0: i32, %arg1: memref<1x6x16xf32, #tpu.memory_space<vmem>>, %arg2: memref<16x128xf32, #tpu.memory_space<vmem>>, %arg3: memref<1x128xf32, #tpu.memory_space<vmem>>, %arg4: memref<6x128xf32, #tpu.memory_space<vmem>>, %arg5: memref<128x256xf32, #tpu.memory_space<vmem>>, %arg6: memref<1x256xf32, #tpu.memory_space<vmem>>, %arg7: memref<2xf32, #tpu.memory_space<smem>>, %arg8: memref<2x6x6xf32, #tpu.memory_space<vmem>>, %arg9: memref<256x128xf32, #tpu.memory_space<vmem>>, %arg10: memref<1x128xf32, #tpu.memory_space<vmem>>, %arg11: memref<128x128xf32, #tpu.memory_space<vmem>>, %arg12: memref<1x128xf32, #tpu.memory_space<vmem>>, %arg13: memref<128x128xf32, #tpu.memory_space<vmem>>, %arg14: memref<1x128xf32, #tpu.memory_space<vmem>>, %arg15: memref<1x6x128xf32, #tpu.memory_space<vmem>>) attributes {dimension_semantics = [#tpu.dimension_semantics<parallel>], iteration_bounds = array<i64: 2>, scalar_prefetch = 0 : i64, scratch_operands = 0 : i64, tpu.core_type = #tpu.core_type<tc>, window_params = [{transform_indices = @transform_0, window_bounds = array<i64: 1, 6, 16>}, {pipeline_mode = #tpu.pipeline_mode<synchronous>, transform_indices = @transform_1, window_bounds = array<i64: 16, 128>}, {pipeline_mode = #tpu.pipeline_mode<synchronous>, transform_indices = @transform_2, window_bounds = array<i64: 1, 128>}, {pipeline_mode = #tpu.pipeline_mode<synchronous>, transform_indices = @transform_3, window_bounds = array<i64: 6, 128>}, {pipeline_mode = #tpu.pipeline_mode<synchronous>, transform_indices = @transform_4, window_bounds = array<i64: 128, 256>}, {pipeline_mode = #tpu.pipeline_mode<synchronous>, transform_indices = @transform_5, window_bounds = array<i64: 1, 256>}, {transform_indices = @transform_6, window_bounds = array<i64: 2>}, {pipeline_mode = #tpu.pipeline_mode<synchronous>, transform_indices = @transform_7, window_bounds = array<i64: 2, 6, 6>}, {pipeline_mode = #tpu.pipeline_mode<synchronous>, transform_indices = @transform_8, window_bounds = array<i64: 256, 128>}, {pipeline_mode = #tpu.pipeline_mode<synchronous>, transform_indices = @transform_9, window_bounds = array<i64: 1, 128>}, {pipeline_mode = #tpu.pipeline_mode<synchronous>, transform_indices = @transform_10, window_bounds = array<i64: 128, 128>}, {pipeline_mode = #tpu.pipeline_mode<synchronous>, transform_indices = @transform_11, window_bounds = array<i64: 1, 128>}, {pipeline_mode = #tpu.pipeline_mode<synchronous>, transform_indices = @transform_12, window_bounds = array<i64: 128, 128>}, {pipeline_mode = #tpu.pipeline_mode<synchronous>, transform_indices = @transform_13, window_bounds = array<i64: 1, 128>}, {transform_indices = @transform_14, window_bounds = array<i64: 1, 6, 128>}]} {
    %c0 = arith.constant 0 : index
    %c0_0 = arith.constant 0 : index
    %c0_1 = arith.constant 0 : index
    %0 = vector.load %arg1[%c0, %c0_0, %c0_1] : memref<1x6x16xf32, #tpu.memory_space<vmem>>, vector<1x6x16xf32>
    %1 = vector.shape_cast %0 : vector<1x6x16xf32> to vector<6x16xf32>
    %c0_2 = arith.constant 0 : index
    %c0_3 = arith.constant 0 : index
    %2 = vector.load %arg2[%c0_2, %c0_3] : memref<16x128xf32, #tpu.memory_space<vmem>>, vector<16x128xf32>
    %cst = arith.constant dense<0.000000e+00> : vector<6x128xf32>
    %3 = tpu.matmul %1, %2, %cst {dimension_numbers = #tpu.dot_dimension_numbers<[1], [0], [0], [1], [0, 0, 1, 1], [], []>} : vector<6x16xf32>, vector<16x128xf32>, vector<6x128xf32> -> vector<6x128xf32>
    %c0_4 = arith.constant 0 : index
    %c0_5 = arith.constant 0 : index
    %4 = vector.load %arg3[%c0_4, %c0_5] : memref<1x128xf32, #tpu.memory_space<vmem>>, vector<1x128xf32>
    %5 = vector.broadcast %4 : vector<1x128xf32> to vector<6x128xf32>
    %6 = arith.addf %3, %5 : vector<6x128xf32>
    %cst_6 = arith.constant 0.000000e+00 : f32
    %7 = vector.broadcast %cst_6 : f32 to vector<6x128xf32>
    %8 = arith.cmpf oge, %6, %7 : vector<6x128xf32>
    %cst_7 = arith.constant 1.000000e-01 : f32
    %9 = vector.broadcast %cst_7 : f32 to vector<6x128xf32>
    %10 = arith.mulf %9, %6 : vector<6x128xf32>
    %11 = arith.select %8, %6, %10 : vector<6x128xi1>, vector<6x128xf32>
    %c0_8 = arith.constant 0 : index
    %c0_9 = arith.constant 0 : index
    %12 = vector.load %arg4[%c0_8, %c0_9] : memref<6x128xf32, #tpu.memory_space<vmem>>, vector<6x128xf32>
    %13 = arith.addf %11, %12 : vector<6x128xf32>
    %c0_10 = arith.constant 0 : index
    %c0_11 = arith.constant 0 : index
    %14 = vector.load %arg5[%c0_10, %c0_11] : memref<128x256xf32, #tpu.memory_space<vmem>>, vector<128x256xf32>
    %cst_12 = arith.constant dense<0.000000e+00> : vector<6x256xf32>
    %15 = tpu.matmul %13, %14, %cst_12 {dimension_numbers = #tpu.dot_dimension_numbers<[1], [0], [0], [1], [0, 0, 1, 1], [], []>} : vector<6x128xf32>, vector<128x256xf32>, vector<6x256xf32> -> vector<6x256xf32>
    %c0_13 = arith.constant 0 : index
    %c0_14 = arith.constant 0 : index
    %16 = vector.load %arg6[%c0_13, %c0_14] : memref<1x256xf32, #tpu.memory_space<vmem>>, vector<1x256xf32>
    %17 = vector.broadcast %16 : vector<1x256xf32> to vector<6x256xf32>
    %18 = arith.addf %15, %17 : vector<6x256xf32>
    %19 = vector.extract_strided_slice %18 {offsets = [0, 0], sizes = [6, 64], strides = [1, 1]} : vector<6x256xf32> to vector<6x64xf32>
    %20 = vector.extract_strided_slice %18 {offsets = [0, 128], sizes = [6, 64], strides = [1, 1]} : vector<6x256xf32> to vector<6x64xf32>
    %cst_15 = arith.constant dense<0.000000e+00> : vector<6x6xf32>
    %21 = tpu.matmul %20, %19, %cst_15 {dimension_numbers = #tpu.dot_dimension_numbers<[1], [1], [0], [0], [0, 0, 1, 0], [], []>} : vector<6x64xf32>, vector<6x64xf32>, vector<6x6xf32> -> vector<6x6xf32>
    %cst_16 = arith.constant 1.562500e-02 : f32
    %22 = vector.broadcast %cst_16 : f32 to vector<6x6xf32>
    %23 = arith.mulf %21, %22 : vector<6x6xf32>
    %24 = math.tanh %23 : vector<6x6xf32>
    %c0_17 = arith.constant 0 : index
    %25 = memref.load %arg7[%c0_17] : memref<2xf32, #tpu.memory_space<smem>>
    %26 = vector.broadcast %25 : f32 to vector<6x6xf32>
    %27 = arith.mulf %24, %26 : vector<6x6xf32>
    %c0_18 = arith.constant 0 : index
    %c0_19 = arith.constant 0 : index
    %c0_20 = arith.constant 0 : index
    %28 = vector.load %arg8[%c0_18, %c0_19, %c0_20] : memref<2x6x6xf32, #tpu.memory_space<vmem>>, vector<1x6x6xf32>
    %29 = vector.shape_cast %28 : vector<1x6x6xf32> to vector<6x6xf32>
    %30 = arith.addf %27, %29 : vector<6x6xf32>
    %cst_21 = arith.constant dense<0.000000e+00> : vector<6x128xf32>
    %31 = tpu.matmul %30, %11, %cst_21 {dimension_numbers = #tpu.dot_dimension_numbers<[1], [0], [0], [1], [0, 0, 1, 1], [], []>} : vector<6x6xf32>, vector<6x128xf32>, vector<6x128xf32> -> vector<6x128xf32>
    %32 = vector.extract_strided_slice %18 {offsets = [0, 64], sizes = [6, 64], strides = [1, 1]} : vector<6x256xf32> to vector<6x64xf32>
    %33 = vector.extract_strided_slice %18 {offsets = [0, 192], sizes = [6, 64], strides = [1, 1]} : vector<6x256xf32> to vector<6x64xf32>
    %cst_22 = arith.constant dense<0.000000e+00> : vector<6x6xf32>
    %34 = tpu.matmul %33, %32, %cst_22 {dimension_numbers = #tpu.dot_dimension_numbers<[1], [1], [0], [0], [0, 0, 1, 0], [], []>} : vector<6x64xf32>, vector<6x64xf32>, vector<6x6xf32> -> vector<6x6xf32>
    %cst_23 = arith.constant 1.562500e-02 : f32
    %35 = vector.broadcast %cst_23 : f32 to vector<6x6xf32>
    %36 = arith.mulf %34, %35 : vector<6x6xf32>
    %37 = math.tanh %36 : vector<6x6xf32>
    %c1 = arith.constant 1 : index
    %38 = memref.load %arg7[%c1] : memref<2xf32, #tpu.memory_space<smem>>
    %39 = vector.broadcast %38 : f32 to vector<6x6xf32>
    %40 = arith.mulf %37, %39 : vector<6x6xf32>
    %c1_24 = arith.constant 1 : index
    %c0_25 = arith.constant 0 : index
    %c0_26 = arith.constant 0 : index
    %41 = vector.load %arg8[%c1_24, %c0_25, %c0_26] : memref<2x6x6xf32, #tpu.memory_space<vmem>>, vector<1x6x6xf32>
    %42 = vector.shape_cast %41 : vector<1x6x6xf32> to vector<6x6xf32>
    %43 = arith.addf %40, %42 : vector<6x6xf32>
    %cst_27 = arith.constant dense<0.000000e+00> : vector<6x128xf32>
    %44 = tpu.matmul %43, %11, %cst_27 {dimension_numbers = #tpu.dot_dimension_numbers<[1], [0], [0], [1], [0, 0, 1, 1], [], []>} : vector<6x6xf32>, vector<6x128xf32>, vector<6x128xf32> -> vector<6x128xf32>
    %45 = tpu.concatenate %31, %44 in 1 : vector<6x128xf32>, vector<6x128xf32> -> vector<6x256xf32>
    %c0_28 = arith.constant 0 : index
    %c0_29 = arith.constant 0 : index
    %46 = vector.load %arg9[%c0_28, %c0_29] : memref<256x128xf32, #tpu.memory_space<vmem>>, vector<256x128xf32>
    %cst_30 = arith.constant dense<0.000000e+00> : vector<6x128xf32>
    %47 = tpu.matmul %45, %46, %cst_30 {dimension_numbers = #tpu.dot_dimension_numbers<[1], [0], [0], [1], [0, 0, 1, 1], [], []>} : vector<6x256xf32>, vector<256x128xf32>, vector<6x128xf32> -> vector<6x128xf32>
    %c0_31 = arith.constant 0 : index
    %c0_32 = arith.constant 0 : index
    %48 = vector.load %arg10[%c0_31, %c0_32] : memref<1x128xf32, #tpu.memory_space<vmem>>, vector<1x128xf32>
    %49 = vector.broadcast %48 : vector<1x128xf32> to vector<6x128xf32>
    %50 = arith.addf %47, %49 : vector<6x128xf32>
    %51 = arith.addf %50, %11 : vector<6x128xf32>
    %cst_33 = arith.constant 0.000000e+00 : f32
    %52 = vector.broadcast %cst_33 : f32 to vector<6x128xf32>
    %53 = arith.cmpf oge, %51, %52 : vector<6x128xf32>
    %cst_34 = arith.constant 1.000000e-01 : f32
    %54 = vector.broadcast %cst_34 : f32 to vector<6x128xf32>
    %55 = arith.mulf %54, %51 : vector<6x128xf32>
    %56 = arith.select %53, %51, %55 : vector<6x128xi1>, vector<6x128xf32>
    %c0_35 = arith.constant 0 : index
    %c0_36 = arith.constant 0 : index
    %57 = vector.load %arg11[%c0_35, %c0_36] : memref<128x128xf32, #tpu.memory_space<vmem>>, vector<128x128xf32>
    %cst_37 = arith.constant dense<0.000000e+00> : vector<6x128xf32>
    %58 = tpu.matmul %56, %57, %cst_37 {dimension_numbers = #tpu.dot_dimension_numbers<[1], [0], [0], [1], [0, 0, 1, 1], [], []>} : vector<6x128xf32>, vector<128x128xf32>, vector<6x128xf32> -> vector<6x128xf32>
    %c0_38 = arith.constant 0 : index
    %c0_39 = arith.constant 0 : index
    %59 = vector.load %arg12[%c0_38, %c0_39] : memref<1x128xf32, #tpu.memory_space<vmem>>, vector<1x128xf32>
    %60 = vector.broadcast %59 : vector<1x128xf32> to vector<6x128xf32>
    %61 = arith.addf %58, %60 : vector<6x128xf32>
    %62 = arith.addf %61, %11 : vector<6x128xf32>
    %cst_40 = arith.constant 0.000000e+00 : f32
    %63 = vector.broadcast %cst_40 : f32 to vector<6x128xf32>
    %64 = arith.cmpf oge, %62, %63 : vector<6x128xf32>
    %cst_41 = arith.constant 1.000000e-01 : f32
    %65 = vector.broadcast %cst_41 : f32 to vector<6x128xf32>
    %66 = arith.mulf %65, %62 : vector<6x128xf32>
    %67 = arith.select %64, %62, %66 : vector<6x128xi1>, vector<6x128xf32>
    %c0_42 = arith.constant 0 : index
    %c0_43 = arith.constant 0 : index
    %68 = vector.load %arg13[%c0_42, %c0_43] : memref<128x128xf32, #tpu.memory_space<vmem>>, vector<128x128xf32>
    %cst_44 = arith.constant dense<0.000000e+00> : vector<6x128xf32>
    %69 = tpu.matmul %67, %68, %cst_44 {dimension_numbers = #tpu.dot_dimension_numbers<[1], [0], [0], [1], [0, 0, 1, 1], [], []>} : vector<6x128xf32>, vector<128x128xf32>, vector<6x128xf32> -> vector<6x128xf32>
    %c0_45 = arith.constant 0 : index
    %c0_46 = arith.constant 0 : index
    %70 = vector.load %arg14[%c0_45, %c0_46] : memref<1x128xf32, #tpu.memory_space<vmem>>, vector<1x128xf32>
    %71 = vector.broadcast %70 : vector<1x128xf32> to vector<6x128xf32>
    %72 = arith.addf %69, %71 : vector<6x128xf32>
    %73 = arith.addf %72, %67 : vector<6x128xf32>
    %cst_47 = arith.constant 0.000000e+00 : f32
    %74 = vector.broadcast %cst_47 : f32 to vector<6x128xf32>
    %75 = arith.cmpf oge, %73, %74 : vector<6x128xf32>
    %cst_48 = arith.constant 1.000000e-01 : f32
    %76 = vector.broadcast %cst_48 : f32 to vector<6x128xf32>
    %77 = arith.mulf %76, %73 : vector<6x128xf32>
    %78 = arith.select %75, %73, %77 : vector<6x128xi1>, vector<6x128xf32>
    %c0_49 = arith.constant 0 : index
    %c0_50 = arith.constant 0 : index
    %c0_51 = arith.constant 0 : index
    %79 = vector.load %arg15[%c0_49, %c0_50, %c0_51] : memref<1x6x128xf32, #tpu.memory_space<vmem>>, vector<1x6x128xf32>
    %80 = vector.shape_cast %79 : vector<1x6x128xf32> to vector<6x128xf32>
    %81 = vector.shape_cast %78 : vector<6x128xf32> to vector<1x6x128xf32>
    tpu.vector_store %arg15[%c0_49, %c0_50, %c0_51], %81 {strides = array<i32>} : memref<1x6x128xf32, #tpu.memory_space<vmem>>, vector<1x6x128xf32>,
    return
  }
  func.func @transform_0(%arg0: i32) -> (i32, i32, i32) {
    %c0_i32 = arith.constant 0 : i32
    %c0_i32_0 = arith.constant 0 : i32
    %c0_i32_1 = arith.constant 0 : i32
    return %arg0, %c0_i32, %c0_i32_0 : i32, i32, i32
  }
  func.func @transform_1(%arg0: i32) -> (i32, i32) {
    %c0_i32 = arith.constant 0 : i32
    %c0_i32_0 = arith.constant 0 : i32
    %c0_i32_1 = arith.constant 0 : i32
    return %c0_i32, %c0_i32_0 : i32, i32
  }
  func.func @transform_2(%arg0: i32) -> (i32, i32) {
    %c0_i32 = arith.constant 0 : i32
    %c0_i32_0 = arith.constant 0 : i32
    %c0_i32_1 = arith.constant 0 : i32
    return %c0_i32, %c0_i32_0 : i32, i32
  }
  func.func @transform_3(%arg0: i32) -> (i32, i32) {
    %c0_i32 = arith.constant 0 : i32
    %c0_i32_0 = arith.constant 0 : i32
    %c0_i32_1 = arith.constant 0 : i32
    return %c0_i32, %c0_i32_0 : i32, i32
  }
  func.func @transform_4(%arg0: i32) -> (i32, i32) {
    %c0_i32 = arith.constant 0 : i32
    %c0_i32_0 = arith.constant 0 : i32
    %c0_i32_1 = arith.constant 0 : i32
    return %c0_i32, %c0_i32_0 : i32, i32
  }
  func.func @transform_5(%arg0: i32) -> (i32, i32) {
    %c0_i32 = arith.constant 0 : i32
    %c0_i32_0 = arith.constant 0 : i32
    %c0_i32_1 = arith.constant 0 : i32
    return %c0_i32, %c0_i32_0 : i32, i32
  }
  func.func @transform_6(%arg0: i32) -> i32 {
    %c0_i32 = arith.constant 0 : i32
    %c0_i32_0 = arith.constant 0 : i32
    return %c0_i32 : i32
  }
  func.func @transform_7(%arg0: i32) -> (i32, i32, i32) {
    %c0_i32 = arith.constant 0 : i32
    %c0_i32_0 = arith.constant 0 : i32
    %c0_i32_1 = arith.constant 0 : i32
    %c0_i32_2 = arith.constant 0 : i32
    return %c0_i32, %c0_i32_0, %c0_i32_1 : i32, i32, i32
  }
  func.func @transform_8(%arg0: i32) -> (i32, i32) {
    %c0_i32 = arith.constant 0 : i32
    %c0_i32_0 = arith.constant 0 : i32
    %c0_i32_1 = arith.constant 0 : i32
    return %c0_i32, %c0_i32_0 : i32, i32
  }
  func.func @transform_9(%arg0: i32) -> (i32, i32) {
    %c0_i32 = arith.constant 0 : i32
    %c0_i32_0 = arith.constant 0 : i32
    %c0_i32_1 = arith.constant 0 : i32
    return %c0_i32, %c0_i32_0 : i32, i32
  }
  func.func @transform_10(%arg0: i32) -> (i32, i32) {
    %c0_i32 = arith.constant 0 : i32
    %c0_i32_0 = arith.constant 0 : i32
    %c0_i32_1 = arith.constant 0 : i32
    return %c0_i32, %c0_i32_0 : i32, i32
  }
  func.func @transform_11(%arg0: i32) -> (i32, i32) {
    %c0_i32 = arith.constant 0 : i32
    %c0_i32_0 = arith.constant 0 : i32
    %c0_i32_1 = arith.constant 0 : i32
    return %c0_i32, %c0_i32_0 : i32, i32
  }
  func.func @transform_12(%arg0: i32) -> (i32, i32) {
    %c0_i32 = arith.constant 0 : i32
    %c0_i32_0 = arith.constant 0 : i32
    %c0_i32_1 = arith.constant 0 : i32
    return %c0_i32, %c0_i32_0 : i32, i32
  }
  func.func @transform_13(%arg0: i32) -> (i32, i32) {
    %c0_i32 = arith.constant 0 : i32
    %c0_i32_0 = arith.constant 0 : i32
    %c0_i32_1 = arith.constant 0 : i32
    return %c0_i32, %c0_i32_0 : i32, i32
  }
  func.func @transform_14(%arg0: i32) -> (i32, i32, i32) {
    %c0_i32 = arith.constant 0 : i32
    %c0_i32_0 = arith.constant 0 : i32
    %c0_i32_1 = arith.constant 0 : i32
    return %arg0, %c0_i32, %c0_i32_0 : i32, i32, i32
  }
}

module attributes {stable_mosaic.version = 11 : i64} {
  func.func @_fused_block_kernel(%arg0: i32, %arg1: memref<1x6x128xf32, #tpu.memory_space<vmem>>, %arg2: memref<6x128xf32, #tpu.memory_space<vmem>>, %arg3: memref<128x256xf32, #tpu.memory_space<vmem>>, %arg4: memref<1x256xf32, #tpu.memory_space<vmem>>, %arg5: memref<2xf32, #tpu.memory_space<smem>>, %arg6: memref<2x6x6xf32, #tpu.memory_space<vmem>>, %arg7: memref<256x128xf32, #tpu.memory_space<vmem>>, %arg8: memref<1x128xf32, #tpu.memory_space<vmem>>, %arg9: memref<128x128xf32, #tpu.memory_space<vmem>>, %arg10: memref<1x128xf32, #tpu.memory_space<vmem>>, %arg11: memref<128x128xf32, #tpu.memory_space<vmem>>, %arg12: memref<1x128xf32, #tpu.memory_space<vmem>>, %arg13: memref<1x6x128xf32, #tpu.memory_space<vmem>>) attributes {dimension_semantics = [#tpu.dimension_semantics<parallel>], iteration_bounds = array<i64: 2>, scalar_prefetch = 0 : i64, scratch_operands = 0 : i64, tpu.core_type = #tpu.core_type<tc>, window_params = [{transform_indices = @transform_0, window_bounds = array<i64: 1, 6, 128>}, {pipeline_mode = #tpu.pipeline_mode<synchronous>, transform_indices = @transform_1, window_bounds = array<i64: 6, 128>}, {pipeline_mode = #tpu.pipeline_mode<synchronous>, transform_indices = @transform_2, window_bounds = array<i64: 128, 256>}, {pipeline_mode = #tpu.pipeline_mode<synchronous>, transform_indices = @transform_3, window_bounds = array<i64: 1, 256>}, {transform_indices = @transform_4, window_bounds = array<i64: 2>}, {pipeline_mode = #tpu.pipeline_mode<synchronous>, transform_indices = @transform_5, window_bounds = array<i64: 2, 6, 6>}, {pipeline_mode = #tpu.pipeline_mode<synchronous>, transform_indices = @transform_6, window_bounds = array<i64: 256, 128>}, {pipeline_mode = #tpu.pipeline_mode<synchronous>, transform_indices = @transform_7, window_bounds = array<i64: 1, 128>}, {pipeline_mode = #tpu.pipeline_mode<synchronous>, transform_indices = @transform_8, window_bounds = array<i64: 128, 128>}, {pipeline_mode = #tpu.pipeline_mode<synchronous>, transform_indices = @transform_9, window_bounds = array<i64: 1, 128>}, {pipeline_mode = #tpu.pipeline_mode<synchronous>, transform_indices = @transform_10, window_bounds = array<i64: 128, 128>}, {pipeline_mode = #tpu.pipeline_mode<synchronous>, transform_indices = @transform_11, window_bounds = array<i64: 1, 128>}, {transform_indices = @transform_12, window_bounds = array<i64: 1, 6, 128>}]} {
    %c0 = arith.constant 0 : index
    %c0_0 = arith.constant 0 : index
    %c0_1 = arith.constant 0 : index
    %0 = vector.load %arg1[%c0, %c0_0, %c0_1] : memref<1x6x128xf32, #tpu.memory_space<vmem>>, vector<1x6x128xf32>
    %1 = vector.shape_cast %0 : vector<1x6x128xf32> to vector<6x128xf32>
    %c0_2 = arith.constant 0 : index
    %c0_3 = arith.constant 0 : index
    %2 = vector.load %arg2[%c0_2, %c0_3] : memref<6x128xf32, #tpu.memory_space<vmem>>, vector<6x128xf32>
    %3 = arith.addf %1, %2 : vector<6x128xf32>
    %c0_4 = arith.constant 0 : index
    %c0_5 = arith.constant 0 : index
    %4 = vector.load %arg3[%c0_4, %c0_5] : memref<128x256xf32, #tpu.memory_space<vmem>>, vector<128x256xf32>
    %cst = arith.constant dense<0.000000e+00> : vector<6x256xf32>
    %5 = tpu.matmul %3, %4, %cst {dimension_numbers = #tpu.dot_dimension_numbers<[1], [0], [0], [1], [0, 0, 1, 1], [], []>} : vector<6x128xf32>, vector<128x256xf32>, vector<6x256xf32> -> vector<6x256xf32>
    %c0_6 = arith.constant 0 : index
    %c0_7 = arith.constant 0 : index
    %6 = vector.load %arg4[%c0_6, %c0_7] : memref<1x256xf32, #tpu.memory_space<vmem>>, vector<1x256xf32>
    %7 = vector.broadcast %6 : vector<1x256xf32> to vector<6x256xf32>
    %8 = arith.addf %5, %7 : vector<6x256xf32>
    %9 = vector.extract_strided_slice %8 {offsets = [0, 0], sizes = [6, 64], strides = [1, 1]} : vector<6x256xf32> to vector<6x64xf32>
    %10 = vector.extract_strided_slice %8 {offsets = [0, 128], sizes = [6, 64], strides = [1, 1]} : vector<6x256xf32> to vector<6x64xf32>
    %cst_8 = arith.constant dense<0.000000e+00> : vector<6x6xf32>
    %11 = tpu.matmul %10, %9, %cst_8 {dimension_numbers = #tpu.dot_dimension_numbers<[1], [1], [0], [0], [0, 0, 1, 0], [], []>} : vector<6x64xf32>, vector<6x64xf32>, vector<6x6xf32> -> vector<6x6xf32>
    %cst_9 = arith.constant 1.562500e-02 : f32
    %12 = vector.broadcast %cst_9 : f32 to vector<6x6xf32>
    %13 = arith.mulf %11, %12 : vector<6x6xf32>
    %14 = math.tanh %13 : vector<6x6xf32>
    %c0_10 = arith.constant 0 : index
    %15 = memref.load %arg5[%c0_10] : memref<2xf32, #tpu.memory_space<smem>>
    %16 = vector.broadcast %15 : f32 to vector<6x6xf32>
    %17 = arith.mulf %14, %16 : vector<6x6xf32>
    %c0_11 = arith.constant 0 : index
    %c0_12 = arith.constant 0 : index
    %c0_13 = arith.constant 0 : index
    %18 = vector.load %arg6[%c0_11, %c0_12, %c0_13] : memref<2x6x6xf32, #tpu.memory_space<vmem>>, vector<1x6x6xf32>
    %19 = vector.shape_cast %18 : vector<1x6x6xf32> to vector<6x6xf32>
    %20 = arith.addf %17, %19 : vector<6x6xf32>
    %cst_14 = arith.constant dense<0.000000e+00> : vector<6x128xf32>
    %21 = tpu.matmul %20, %1, %cst_14 {dimension_numbers = #tpu.dot_dimension_numbers<[1], [0], [0], [1], [0, 0, 1, 1], [], []>} : vector<6x6xf32>, vector<6x128xf32>, vector<6x128xf32> -> vector<6x128xf32>
    %22 = vector.extract_strided_slice %8 {offsets = [0, 64], sizes = [6, 64], strides = [1, 1]} : vector<6x256xf32> to vector<6x64xf32>
    %23 = vector.extract_strided_slice %8 {offsets = [0, 192], sizes = [6, 64], strides = [1, 1]} : vector<6x256xf32> to vector<6x64xf32>
    %cst_15 = arith.constant dense<0.000000e+00> : vector<6x6xf32>
    %24 = tpu.matmul %23, %22, %cst_15 {dimension_numbers = #tpu.dot_dimension_numbers<[1], [1], [0], [0], [0, 0, 1, 0], [], []>} : vector<6x64xf32>, vector<6x64xf32>, vector<6x6xf32> -> vector<6x6xf32>
    %cst_16 = arith.constant 1.562500e-02 : f32
    %25 = vector.broadcast %cst_16 : f32 to vector<6x6xf32>
    %26 = arith.mulf %24, %25 : vector<6x6xf32>
    %27 = math.tanh %26 : vector<6x6xf32>
    %c1 = arith.constant 1 : index
    %28 = memref.load %arg5[%c1] : memref<2xf32, #tpu.memory_space<smem>>
    %29 = vector.broadcast %28 : f32 to vector<6x6xf32>
    %30 = arith.mulf %27, %29 : vector<6x6xf32>
    %c1_17 = arith.constant 1 : index
    %c0_18 = arith.constant 0 : index
    %c0_19 = arith.constant 0 : index
    %31 = vector.load %arg6[%c1_17, %c0_18, %c0_19] : memref<2x6x6xf32, #tpu.memory_space<vmem>>, vector<1x6x6xf32>
    %32 = vector.shape_cast %31 : vector<1x6x6xf32> to vector<6x6xf32>
    %33 = arith.addf %30, %32 : vector<6x6xf32>
    %cst_20 = arith.constant dense<0.000000e+00> : vector<6x128xf32>
    %34 = tpu.matmul %33, %1, %cst_20 {dimension_numbers = #tpu.dot_dimension_numbers<[1], [0], [0], [1], [0, 0, 1, 1], [], []>} : vector<6x6xf32>, vector<6x128xf32>, vector<6x128xf32> -> vector<6x128xf32>
    %35 = tpu.concatenate %21, %34 in 1 : vector<6x128xf32>, vector<6x128xf32> -> vector<6x256xf32>
    %c0_21 = arith.constant 0 : index
    %c0_22 = arith.constant 0 : index
    %36 = vector.load %arg7[%c0_21, %c0_22] : memref<256x128xf32, #tpu.memory_space<vmem>>, vector<256x128xf32>
    %cst_23 = arith.constant dense<0.000000e+00> : vector<6x128xf32>
    %37 = tpu.matmul %35, %36, %cst_23 {dimension_numbers = #tpu.dot_dimension_numbers<[1], [0], [0], [1], [0, 0, 1, 1], [], []>} : vector<6x256xf32>, vector<256x128xf32>, vector<6x128xf32> -> vector<6x128xf32>
    %c0_24 = arith.constant 0 : index
    %c0_25 = arith.constant 0 : index
    %38 = vector.load %arg8[%c0_24, %c0_25] : memref<1x128xf32, #tpu.memory_space<vmem>>, vector<1x128xf32>
    %39 = vector.broadcast %38 : vector<1x128xf32> to vector<6x128xf32>
    %40 = arith.addf %37, %39 : vector<6x128xf32>
    %41 = arith.addf %40, %1 : vector<6x128xf32>
    %cst_26 = arith.constant 0.000000e+00 : f32
    %42 = vector.broadcast %cst_26 : f32 to vector<6x128xf32>
    %43 = arith.cmpf oge, %41, %42 : vector<6x128xf32>
    %cst_27 = arith.constant 1.000000e-01 : f32
    %44 = vector.broadcast %cst_27 : f32 to vector<6x128xf32>
    %45 = arith.mulf %44, %41 : vector<6x128xf32>
    %46 = arith.select %43, %41, %45 : vector<6x128xi1>, vector<6x128xf32>
    %c0_28 = arith.constant 0 : index
    %c0_29 = arith.constant 0 : index
    %47 = vector.load %arg9[%c0_28, %c0_29] : memref<128x128xf32, #tpu.memory_space<vmem>>, vector<128x128xf32>
    %cst_30 = arith.constant dense<0.000000e+00> : vector<6x128xf32>
    %48 = tpu.matmul %46, %47, %cst_30 {dimension_numbers = #tpu.dot_dimension_numbers<[1], [0], [0], [1], [0, 0, 1, 1], [], []>} : vector<6x128xf32>, vector<128x128xf32>, vector<6x128xf32> -> vector<6x128xf32>
    %c0_31 = arith.constant 0 : index
    %c0_32 = arith.constant 0 : index
    %49 = vector.load %arg10[%c0_31, %c0_32] : memref<1x128xf32, #tpu.memory_space<vmem>>, vector<1x128xf32>
    %50 = vector.broadcast %49 : vector<1x128xf32> to vector<6x128xf32>
    %51 = arith.addf %48, %50 : vector<6x128xf32>
    %52 = arith.addf %51, %1 : vector<6x128xf32>
    %cst_33 = arith.constant 0.000000e+00 : f32
    %53 = vector.broadcast %cst_33 : f32 to vector<6x128xf32>
    %54 = arith.cmpf oge, %52, %53 : vector<6x128xf32>
    %cst_34 = arith.constant 1.000000e-01 : f32
    %55 = vector.broadcast %cst_34 : f32 to vector<6x128xf32>
    %56 = arith.mulf %55, %52 : vector<6x128xf32>
    %57 = arith.select %54, %52, %56 : vector<6x128xi1>, vector<6x128xf32>
    %c0_35 = arith.constant 0 : index
    %c0_36 = arith.constant 0 : index
    %58 = vector.load %arg11[%c0_35, %c0_36] : memref<128x128xf32, #tpu.memory_space<vmem>>, vector<128x128xf32>
    %cst_37 = arith.constant dense<0.000000e+00> : vector<6x128xf32>
    %59 = tpu.matmul %57, %58, %cst_37 {dimension_numbers = #tpu.dot_dimension_numbers<[1], [0], [0], [1], [0, 0, 1, 1], [], []>} : vector<6x128xf32>, vector<128x128xf32>, vector<6x128xf32> -> vector<6x128xf32>
    %c0_38 = arith.constant 0 : index
    %c0_39 = arith.constant 0 : index
    %60 = vector.load %arg12[%c0_38, %c0_39] : memref<1x128xf32, #tpu.memory_space<vmem>>, vector<1x128xf32>
    %61 = vector.broadcast %60 : vector<1x128xf32> to vector<6x128xf32>
    %62 = arith.addf %59, %61 : vector<6x128xf32>
    %63 = arith.addf %62, %57 : vector<6x128xf32>
    %cst_40 = arith.constant 0.000000e+00 : f32
    %64 = vector.broadcast %cst_40 : f32 to vector<6x128xf32>
    %65 = arith.cmpf oge, %63, %64 : vector<6x128xf32>
    %cst_41 = arith.constant 1.000000e-01 : f32
    %66 = vector.broadcast %cst_41 : f32 to vector<6x128xf32>
    %67 = arith.mulf %66, %63 : vector<6x128xf32>
    %68 = arith.select %65, %63, %67 : vector<6x128xi1>, vector<6x128xf32>
    %c0_42 = arith.constant 0 : index
    %c0_43 = arith.constant 0 : index
    %c0_44 = arith.constant 0 : index
    %69 = vector.load %arg13[%c0_42, %c0_43, %c0_44] : memref<1x6x128xf32, #tpu.memory_space<vmem>>, vector<1x6x128xf32>
    %70 = vector.shape_cast %69 : vector<1x6x128xf32> to vector<6x128xf32>
    %71 = vector.shape_cast %68 : vector<6x128xf32> to vector<1x6x128xf32>
    tpu.vector_store %arg13[%c0_42, %c0_43, %c0_44], %71 {strides = array<i32>} : memref<1x6x128xf32, #tpu.memory_space<vmem>>, vector<1x6x128xf32>,
    return
  }
  func.func @transform_0(%arg0: i32) -> (i32, i32, i32) {
    %c0_i32 = arith.constant 0 : i32
    %c0_i32_0 = arith.constant 0 : i32
    %c0_i32_1 = arith.constant 0 : i32
    return %arg0, %c0_i32, %c0_i32_0 : i32, i32, i32
  }
  func.func @transform_1(%arg0: i32) -> (i32, i32) {
    %c0_i32 = arith.constant 0 : i32
    %c0_i32_0 = arith.constant 0 : i32
    %c0_i32_1 = arith.constant 0 : i32
    return %c0_i32, %c0_i32_0 : i32, i32
  }
  func.func @transform_2(%arg0: i32) -> (i32, i32) {
    %c0_i32 = arith.constant 0 : i32
    %c0_i32_0 = arith.constant 0 : i32
    %c0_i32_1 = arith.constant 0 : i32
    return %c0_i32, %c0_i32_0 : i32, i32
  }
  func.func @transform_3(%arg0: i32) -> (i32, i32) {
    %c0_i32 = arith.constant 0 : i32
    %c0_i32_0 = arith.constant 0 : i32
    %c0_i32_1 = arith.constant 0 : i32
    return %c0_i32, %c0_i32_0 : i32, i32
  }
  func.func @transform_4(%arg0: i32) -> i32 {
    %c0_i32 = arith.constant 0 : i32
    %c0_i32_0 = arith.constant 0 : i32
    return %c0_i32 : i32
  }
  func.func @transform_5(%arg0: i32) -> (i32, i32, i32) {
    %c0_i32 = arith.constant 0 : i32
    %c0_i32_0 = arith.constant 0 : i32
    %c0_i32_1 = arith.constant 0 : i32
    %c0_i32_2 = arith.constant 0 : i32
    return %c0_i32, %c0_i32_0, %c0_i32_1 : i32, i32, i32
  }
  func.func @transform_6(%arg0: i32) -> (i32, i32) {
    %c0_i32 = arith.constant 0 : i32
    %c0_i32_0 = arith.constant 0 : i32
    %c0_i32_1 = arith.constant 0 : i32
    return %c0_i32, %c0_i32_0 : i32, i32
  }
  func.func @transform_7(%arg0: i32) -> (i32, i32) {
    %c0_i32 = arith.constant 0 : i32
    %c0_i32_0 = arith.constant 0 : i32
    %c0_i32_1 = arith.constant 0 : i32
    return %c0_i32, %c0_i32_0 : i32, i32
  }
  func.func @transform_8(%arg0: i32) -> (i32, i32) {
    %c0_i32 = arith.constant 0 : i32
    %c0_i32_0 = arith.constant 0 : i32
    %c0_i32_1 = arith.constant 0 : i32
    return %c0_i32, %c0_i32_0 : i32, i32
  }
  func.func @transform_9(%arg0: i32) -> (i32, i32) {
    %c0_i32 = arith.constant 0 : i32
    %c0_i32_0 = arith.constant 0 : i32
    %c0_i32_1 = arith.constant 0 : i32
    return %c0_i32, %c0_i32_0 : i32, i32
  }
  func.func @transform_10(%arg0: i32) -> (i32, i32) {
    %c0_i32 = arith.constant 0 : i32
    %c0_i32_0 = arith.constant 0 : i32
    %c0_i32_1 = arith.constant 0 : i32
    return %c0_i32, %c0_i32_0 : i32, i32
  }
  func.func @transform_11(%arg0: i32) -> (i32, i32) {
    %c0_i32 = arith.constant 0 : i32
    %c0_i32_0 = arith.constant 0 : i32
    %c0_i32_1 = arith.constant 0 : i32
    return %c0_i32, %c0_i32_0 : i32, i32
  }
  func.func @transform_12(%arg0: i32) -> (i32, i32, i32) {
    %c0_i32 = arith.constant 0 : i32
    %c0_i32_0 = arith.constant 0 : i32
    %c0_i32_1 = arith.constant 0 : i32
    return %arg0, %c0_i32, %c0_i32_0 : i32, i32, i32
  }
}

</mosaic_0001>

<bundles_post_ra>
// kernel: _lambda_.15
= control target key start
LH: loop header
LB: loop body
LE: loop exit
PB: predicated region body
PF: predicated region fallthrough
CT: control target
= control target key end

     0   :  { %17 = vsyncpa [#allocation3], 0  ;;  %s1963_s21 = smov 0   ;;  %s2451_s0 = inlined_call_operand.vmem [shape: f32[2,20,128], index: 0, kind: input, shape index: {}]   ;;  %s2452_s1 = inlined_call_operand.vmem [shape: f32[20,128], index: 1, kind: input, shape index: {}]   ;;  %s2453_s2 = inlined_call_operand.vmem [shape: f32[128,256], index: 2, kind: input, shape index: {}]   ;;  %s2454_s3 = inlined_call_operand.vmem [shape: f32[1,256], index: 3, kind: input, shape index: {}]   ;;  %s2455_s4 = inlined_call_operand.vmem [shape: f32[2], index: 4, kind: input, shape index: {}]   ;;  %s2456_s5 = inlined_call_operand.vmem [shape: f32[2,20,20], index: 5, kind: input, shape index: {}]   ;;  %s2457_s6 = inlined_call_operand.vmem [shape: f32[256,128], index: 6, kind: input, shape index: {}]   ;;  %s2458_s7 = inlined_call_operand.vmem [shape: f32[1,128], index: 7, kind: input, shape index: {}]   ;;  %s2459_s8 = inlined_call_operand.vmem [shape: f32[128,128], index: 8, kind: input, shape index: {}]   ;;  %s2460_s9 = inlined_call_operand.vmem [shape: f32[1,128], index: 9, kind: input, shape index: {}]   ;;  %s2461_s10 = inlined_call_operand.vmem [shape: f32[128,128], index: 10, kind: input, shape index: {}]   ;;  %s2462_s11 = inlined_call_operand.vmem [shape: f32[1,128], index: 11, kind: input, shape index: {}]   ;;  %s2463_s12 = inlined_call_operand.vmem [shape: f32[2,20,128], index: 12, kind: output, shape index: {}]  }
   0x1 LB: > { %s1969_s22 = sadd.s32 4294967295, %s1891_s21   ;;  %p1418_p0 = scmp.ge.s32.totalorder %s1891_s21, 1  ;;  %s1891_s21 = sphi %s1963_s21, %s23_s21  }
   0x2   : > { %p311_p1 = scmp.lt.s32.totalorder %s1891_s21, 3  ;;  %s333_s25 = sshll.u32 %s2455_s4, 4  ;;  %s334_s25 = int_to_ptr.vmem [resolvable:$true] %s333_s25 }
   0x3   : > { %p1834_p3 = scmp.eq.s32.totalorder %s1969_s22, 0  ;;  %s1866_s27 = scalar_lea.vmem %s334_s25, 16 }
   0x4   : > { %p1976_p2 = pnand %p1418_p0, %p311_p1  ;;  %p1867_p6 = scmp.ne.s32.totalorder %s334_s25, %s1866_s27 }
   0x5   : > { %p1874_p10 = scmp.lt.s32.totalorder %s334_s25, %s334_s25  ;;  %p1875_p11 = scmp.lt.s32.totalorder %s1866_s27, %s1866_s27 }
   0x6   : > { %p1830_p4 = pneg %p1976_p2 }
   0x7   : > { %p1876_p12 = por %p1875_p11, %p1874_p10 }
   0x8   : > { %p1831_p5 = pnand %p1834_p3, %p1830_p4 }
   0xa   : > { %p1868_p7 = pneg %p1831_p5 }
   0xc   : > { %p1869_p8 = pnand %p1868_p7, %p1867_p6 }
   0xe   : > { %p1870_p9 = pneg %p1869_p8 }
  0x10   : > { %p1877_p13 = pnand %p1876_p12, %p1870_p9 }
  0x12   : > { %1880 = shalt.err (!%p1877_p13)
}
  0x13   : > { %s1893_s28 = smov [#allocation2]   ;;  %375 = sbr.rel (%p1976_p2) target bundleno = 1647 (0x66f), region = 68 }
  0x14   : > { %1833 = dma.vmem_to_smem (!%p1831_p5), %s334_s25, 16, %s1893_s28, [#allocation3]  }
  0x1a   : > { %1886 = dma.done.wait (%p1834_p3), [#allocation3], 16  }
  0x1b   : > { %1888 = vsyncadd (%p1834_p3), [#allocation3], 4294967280 }
  0x1c   : > { %381 = sfence }
  0x1d   : > { %v438_v0 = vld [vmem:[%s2453_s2 + $0x8] sm:$0xff]  ;;  %v440_v1 = vld [vmem:[%s2453_s2 + $0x18] sm:$0xff]  ;;  %v437_v2 = vld [vmem:[%s2453_s2] sm:$0xff]  ;;  %v1894_v7 = vmov 0.0   ;;  %p418_p0 = scmp.lt.s32.totalorder %s1969_s22, 1  ;;  %v1895_v58 = vmov 0.0|0.0   ;;  %v471_v59 = vlaneseq }
  0x1e   : > { %v1699_v3 = vpack.c.bf16 %v440_v1, %v438_v0  ;;  %v439_v4 = vld [vmem:[%s2453_s2 + $0x10] sm:$0xff]  ;;  %v442_v5 = vld [vmem:[%s2453_s2 + $0x28] sm:$0xff]  ;;  %v444_v6 = vld [vmem:[%s2453_s2 + $0x38] sm:$0xff]  ;;  %545 = vmatprep.mubr.f32.mxu0 %v1894_v7  ;;  %1735 = vmatprep.subr.bf16.mxu1 %v1895_v58  ;;  %vm1896_vm0 = vmmov 0   ;;  %vm564_vm1 = vcmask 523264   ;;  %s1897_s26 = smov 64  }
  0x1f   : > { %v1701_v8 = vpack.c.bf16 %v439_v4, %v437_v2  ;;  %v1703_v9 = vpack.c.bf16 %v444_v6, %v442_v5  ;;  %v441_v10 = vld [vmem:[%s2453_s2 + $0x20] sm:$0xff]  ;;  %v443_v11 = vld [vmem:[%s2453_s2 + $0x30] sm:$0xff]  ;;  %v446_v12 = vld [vmem:[%s2453_s2 + $0x48] sm:$0xff]  ;;  %s2468_s22 = smov (!%p418_p0, %s1969_s22), 1  ;;  %1578 = vmatprep.mubr.msk.f32.mxu1 %vm1896_vm0, %v1894_v7  ;;  %v472_v60 = vshrl.u32 %v471_v59, 7  ;;  %vm690_vm3 = vcmask 1043456  }
  0x20   : > { %1700 = vmatprep.subr.bf16.mxu0 %v1699_v3  ;;  %v448_v13 = vld [vmem:[%s2453_s2 + $0x58] sm:$0xff]  ;;  %v1705_v14 = vpack.c.bf16 %v443_v11, %v441_v10  ;;  %v445_v16 = vld [vmem:[%s2453_s2 + $0x40] sm:$0xff]  ;;  %v447_v17 = vld [vmem:[%s2453_s2 + $0x50] sm:$0xff]  ;;  %s1825_s19 = smul.u32 24, %s2468_s22  ;;  %s669_s27 = sld [smem:[#allocation2]]  ;;  %vm680_vm4 = vcmask 162816  }
  0x21   : > { %1702 = vmatpush1.bf16.msra.mxu0 %v1701_v8  ;;  %v1707_v15 = vpack.c.bf16 %v448_v13, %v446_v12  ;;  %v450_v18 = vld [vmem:[%s2453_s2 + $0x68] sm:$0xff]  ;;  %v452_v19 = vld [vmem:[%s2453_s2 + $0x78] sm:$0xff]  ;;  %v1709_v20 = vpack.c.bf16 %v447_v17, %v445_v16  ;;  %v449_v22 = vld [vmem:[%s2453_s2 + $0x60] sm:$0xff]  ;;  %v477_v61 = vsub.s32 1, %v472_v60  ;;  %v473_v63 = vsub.s32 0, %v472_v60  ;;  %s1441_s23 = sld [smem:[#allocation2 + $0x1]] }
  0x22   : > { %1704 = vmatprep.subr.bf16.mxu0 %v1703_v9  ;;  %v1711_v21 = vpack.c.bf16 %v452_v19, %v450_v18  ;;  %v451_v23 = vld [vmem:[%s2453_s2 + $0x70] sm:$0xff]  ;;  %v454_v24 = vld [vmem:[%s2453_s2 + $0x88] sm:$0xff]  ;;  %v456_v25 = vld [vmem:[%s2453_s2 + $0x98] sm:$0xff]  ;;  %s422_s14 = scalar_lea.vmem %s2451_s0, %s1825_s19 }
  0x23   : > { %v1713_v26 = vpack.c.bf16 %v451_v23, %v449_v22  ;;  %v1715_v27 = vpack.c.bf16 %v456_v25, %v454_v24  ;;  %v453_v28 = vld [vmem:[%s2453_s2 + $0x80] sm:$0xff]  ;;  %v455_v29 = vld [vmem:[%s2453_s2 + $0x90] sm:$0xff]  ;;  %v458_v30 = vld [vmem:[%s2453_s2 + $0xa8] sm:$0xff] }
  0x24   : > { %v460_v31 = vld [vmem:[%s2453_s2 + $0xb8] sm:$0xff]  ;;  %v1717_v32 = vpack.c.bf16 %v455_v29, %v453_v28  ;;  %v457_v34 = vld [vmem:[%s2453_s2 + $0xa0] sm:$0xff]  ;;  %v459_v35 = vld [vmem:[%s2453_s2 + $0xb0] sm:$0xff] }
  0x25   : > { %1706 = vmatpush1.bf16.msra.mxu0 %v1705_v14  ;;  %v1719_v33 = vpack.c.bf16 %v460_v31, %v458_v30  ;;  %v462_v36 = vld [vmem:[%s2453_s2 + $0xc8] sm:$0xff]  ;;  %v464_v37 = vld [vmem:[%s2453_s2 + $0xd8] sm:$0xff]  ;;  %v1721_v38 = vpack.c.bf16 %v459_v35, %v457_v34  ;;  %v461_v40 = vld [vmem:[%s2453_s2 + $0xc0] sm:$0xff] }
  0x26   : > { %1708 = vmatprep.subr.bf16.mxu0 %v1707_v15  ;;  %v1723_v39 = vpack.c.bf16 %v464_v37, %v462_v36  ;;  %v463_v41 = vld [vmem:[%s2453_s2 + $0xd0] sm:$0xff]  ;;  %v466_v42 = vld [vmem:[%s2453_s2 + $0xe8] sm:$0xff]  ;;  %v468_v43 = vld [vmem:[%s2453_s2 + $0xf8] sm:$0xff]  ;;  %v670_v29 = vstv %s669_s27  ;;  %s427_s27 = scalar_lea.vmem %s2463_s12, %s1825_s19 }
  0x27   : > { %v1725_v44 = vpack.c.bf16 %v463_v41, %v461_v40  ;;  %v1727_v45 = vpack.c.bf16 %v468_v43, %v466_v42  ;;  %v465_v46 = vld [vmem:[%s2453_s2 + $0xe0] sm:$0xff]  ;;  %v467_v47 = vld [vmem:[%s2453_s2 + $0xf0] sm:$0xff]  ;;  %v2104_v52 = vld [vmem:[%s422_s14 + $0x8] sm:$0xff] }
  0x28   : > { %v1729_v48 = vpack.c.bf16 %v467_v47, %v465_v46  ;;  %v2098_v49 = vld [vmem:[%s422_s14] sm:$0xff]  ;;  %v432_v53 = vld [vmem:[%s2452_s1 + $0x8] sm:$0xff]  ;;  %v2111_v55 = vld [vmem:[%s422_s14 + $0x10] sm:$0xf] }
  0x29   : > { %1710 = vmatpush1.bf16.msra.mxu0 %v1709_v20  ;;  %v431_v50 = vld [vmem:[%s2452_s1] sm:$0xff]  ;;  %v435_v54 = vadd.f32 %v432_v53, %v2104_v52  ;;  %v433_v56 = vld [vmem:[%s2452_s1 + $0x10] sm:$0xf]  ;;  %vm2129_vm2 = vmpackc.low %vm564_vm1, %vm564_vm1  ;;  %v1736_v18 = vpack.c.bf16 %v2104_v52, %v2098_v49 }
  0x2a   : > { %1712 = vmatprep.subr.bf16.mxu0 %v1711_v21  ;;  %v434_v51 = vadd.f32 %v431_v50, %v2098_v49  ;;  %v436_v57 = vadd.f32 %v433_v56, %v2111_v55  ;;  %v469_v62 = vld [vmem:[%s2454_s3] sm:$0x3]  ;;  %v676_v42 = vld [vmem:[%s2456_s5 + $0x10] sm:$0xf]  ;;  %v986_v56 = vld [vmem:[%s2457_s6 + $0x8] sm:$0xff] }
  0x2b   : > { %v478_v0 = vrot.slane %v469_v62, %v477_v61  ;;  %v474_v2 = vrot.slane %v469_v62, %v473_v63  ;;  %1737 = vmatpush3.bf16.msra.mxu1 %v1736_v18  ;;  %v1001_v50 = vld [vmem:[%s2457_s6 + $0x80] sm:$0xff]  ;;  %v1004_v59 = vld [vmem:[%s2457_s6 + $0x98] sm:$0xff]  ;;  %v987_v62 = vld [vmem:[%s2457_s6 + $0x10] sm:$0xff] }
  0x2c   : > { %1576 = vmatprep.subr.mxu1 %v1894_v7  ;;  %v985_v53 = vld [vmem:[%s2457_s6] sm:$0xff]  ;;  %v988_v63 = vld [vmem:[%s2457_s6 + $0x18] sm:$0xff]  ;;  %v991_v11 = vld [vmem:[%s2457_s6 + $0x30] sm:$0xff] }
  0x2d   : > { %1714 = vmatpush1.bf16.msra.mxu0 %v1713_v26  ;;  %v1747_v60 = vpack.c.bf16 %v986_v56, %v985_v53  ;;  %v885_v56 = vstv %s1441_s23 }
  0x2e   : > { %1716 = vmatprep.subr.bf16.mxu0 %v1715_v27 }
  0x2f   : > { %1577 = vmatpush3.msk.msra.mxu1 %vm690_vm3, %v2111_v55 }
  0x30   : > { %1738 = vmatprep.subr.bf16.mxu1 %v1895_v58 }
  0x31   : > { %1718 = vmatpush1.bf16.msra.mxu0 %v1717_v32 }
  0x32   : > { %1720 = vmatprep.subr.bf16.mxu0 %v1719_v33  ;;  %v674_v33 = vld [vmem:[%s2456_s5] sm:$0xff] }
  0x35   : > { %1722 = vmatpush1.bf16.msra.mxu0 %v1721_v38  ;;  %v675_v38 = vld [vmem:[%s2456_s5 + $0x8] sm:$0xff] }
  0x36   : > { %1724 = vmatprep.subr.bf16.mxu0 %v1723_v39 }
  0x39   : > { %1726 = vmatpush1.bf16.msra.mxu0 %v1725_v44 }
  0x3a   : > { %1728 = vmatprep.subr.bf16.mxu0 %v1727_v45 }
  0x3d   : > { %1730 = vmatpush1.bf16.msra.mxu0 %v1729_v48 }
  0x3e   : > { %1731 = vmatprep.subr.bf16.mxu0 %v1895_v58 }
  0x40   : > { %546 = vmatmul.mubr.f32.vlgmr.msra.gmra.mrb[0].mxu0 %v434_v51  ;;  %v1002_v51 = vld [vmem:[%s2457_s6 + $0x88] sm:$0xff] }
  0x41   : > { %551 = vmatprep.mubr.f32.mxu0 %v1894_v7 }
  0x44   : > { %552 = vmatmul.mubr.f32.gmra.mrb[2].mxu0 %v435_v54  ;;  %v1745_v54 = vpack.c.bf16 %v1002_v51, %v1001_v50 }
  0x45   : > { %557 = vmatprep.mubr.f32.mxu0 %v1894_v7 }
  0x48   : > { %558 = vmatmul.mubr.f32.gmra.mrb[4].mxu0 %v436_v57  ;;  %v1003_v57 = vld [vmem:[%s2457_s6 + $0x90] sm:$0xff] }
  0x49   : > { %1563 = vmatprep.mubr.msk.f32.mxu0 %vm1896_vm0, %v1894_v7  ;;  %v1749_v61 = vpack.c.bf16 %v1004_v59, %v1003_v57  ;;  %v1442_v59 = vld [vmem:[%s2456_s5 + $0x18] sm:$0xff] }
 0x113   : > { %v547_v1 = vpop.f32.mrb[0].mxu0 }
 0x114   : > { %v549_v3 = vpop.f32.mrb[1].mxu0  ;;  %v548_v6 = vadd.f32 %v547_v1, %v474_v2  ;;  %v1006_v1 = vld [vmem:[%s2457_s6 + $0xa8] sm:$0xff] }
 0x115   : > { %v550_v4 = vadd.f32 %v549_v3, %v478_v0 }
 0x117   : > { %v553_v5 = vpop.f32.mrb[2].mxu0  ;;  %774 = vrot.lane.b32.xlu1 %v550_v4, %s1897_s26 }
 0x118   : > { %v554_v8 = vadd.f32 %v553_v5, %v474_v2  ;;  %v555_v9 = vpop.f32.mrb[3].mxu0  ;;  %v990_v5 = vld [vmem:[%s2457_s6 + $0x28] sm:$0xff] }
 0x119   : > { %v556_v10 = vadd.f32 %v555_v9, %v478_v0 }
 0x11a   : > { %v1732_v12 = vpack.c.bf16 %v554_v8, %v548_v6  ;;  %v1849_v13 = vpack.i.bf16 %v554_v8, %v548_v6  ;;  %v1007_v6 = vld [vmem:[%s2457_s6 + $0xb0] sm:$0xff]  ;;  %v1008_v8 = vld [vmem:[%s2457_s6 + $0xb8] sm:$0xff] }
 0x11b   : > { %776 = vrot.lane.b32.xlu1 %v556_v10, %s1897_s26  ;;  %v559_v14 = vpop.f32.mrb[4].mxu0 }
 0x11c   : > { %1850 = vrot.lane.b32.xlu0 %v1849_v13, %s1897_s26  ;;  %1734 = vmatpush3.bf16.xpose.msk.msra.mxu0 %vm2129_vm2, %v1732_v12  ;;  %v560_v15 = vadd.f32 %v559_v14, %v474_v2  ;;  %v561_v16 = vpop.f32.mrb[5].mxu0  ;;  %v1751_v2 = vpack.c.bf16 %v988_v63, %v987_v62  ;;  %v992_v12 = vld [vmem:[%s2457_s6 + $0x38] sm:$0xff]  ;;  %v1009_v13 = vld [vmem:[%s2457_s6 + $0xc0] sm:$0xff]  ;;  %v1010_v14 = vld [vmem:[%s2457_s6 + $0xc8] sm:$0xff] }
 0x11d   : > { %1561 = vmatprep.subr.mxu0 %v1894_v7  ;;  %v562_v17 = vadd.f32 %v561_v16, %v478_v0  ;;  %v1005_v0 = vld [vmem:[%s2457_s6 + $0xa0] sm:$0xff]  ;;  %v1761_v16 = vpack.c.bf16 %v1010_v14, %v1009_v13  ;;  %v1121_v14 = vld [vmem:[%s2459_s8 + $0x28] sm:$0xff] }
 0x11e   : > { %v1753_v3 = vpack.c.bf16 %v1006_v1, %v1005_v0  ;;  %v1443_v63 = vld [vmem:[%s2456_s5 + $0x20] sm:$0xff] }
 0x11f   : > { %v1120_v13 = vld [vmem:[%s2459_s8 + $0x20] sm:$0xff] }
 0x120   : > { %784 = vrot.lane.b32.xlu0 %v560_v15, %s1897_s26 }
 0x124   : > { %778 = vrot.lane.b32.xlu0 %v562_v17, %s1897_s26  ;;  %1562 = vmatpush3.xpose.msk.msra.mxu0 %vm564_vm1, %v560_v15  ;;  %v1759_v15 = vpack.c.bf16 %v992_v12, %v991_v11  ;;  %v1119_v11 = vld [vmem:[%s2459_s8 + $0x18] sm:$0xff] }
 0x125   : > { %1742 = vmatprep.subr.bf16.mxu0 %v1895_v58 }
 0x127   : > { %1564 = vmatmul.mubr.msk.f32.vlgmr.msra.gmra.mrb[6].mxu0 %vm564_vm1, %v550_v4  ;;  %v989_v4 = vld [vmem:[%s2457_s6 + $0x20] sm:$0xff] }
 0x128   : > { %1566 = vmatprep.mubr.msk.f32.mxu0 %vm1896_vm0, %v1894_v7  ;;  %1744 = vmatpush3.bf16.msra.mxu0 %v1736_v18  ;;  %v1755_v9 = vpack.c.bf16 %v990_v5, %v989_v4  ;;  %v994_v18 = vld [vmem:[%s2457_s6 + $0x48] sm:$0xff] }
 0x129   : > { %1606 = vmatprep.subr.mxu0 %v1894_v7 }
 0x12b   : > { %1567 = vmatmul.mubr.msk.f32.gmra.mrb[8].mxu0 %vm564_vm1, %v556_v10  ;;  %v1757_v10 = vpack.c.bf16 %v1008_v8, %v1007_v6  ;;  %v1116_v6 = vld [vmem:[%s2459_s8] sm:$0xff]  ;;  %v1117_v8 = vld [vmem:[%s2459_s8 + $0x8] sm:$0xff] }
 0x12c   : > { %1569 = vmatprep.mubr.msk.f32.mxu0 %vm1896_vm0, %v1894_v7  ;;  %1607 = vmatpush3.msk.msra.mxu0 %vm690_vm3, %v2111_v55 }
 0x12d   : > { %1777 = vmatprep.subr.bf16.mxu0 %v1895_v58 }
 0x12f   : > { %1570 = vmatmul.mubr.msk.f32.gmra.mrb[10].mxu0 %vm564_vm1, %v562_v17  ;;  %v993_v17 = vld [vmem:[%s2457_s6 + $0x40] sm:$0xff] }
 0x130   : > { %1608 = vmatprep.mubr.msk.f32.mxu0 %vm1896_vm0, %v1894_v7 }
 0x189   : > { %v775_v46 = vpop.permute.xlu1 %774 }
 0x18d   : > { %v777_v47 = vpop.permute.xlu1 %776 }
 0x18e   : > { %v1851_v28 = vpop.permute.xlu0 %1850 }
 0x18f   : > { %v1853_v31 = vunpack.i.h.bf16 %v1851_v28  ;;  %v1852_v32 = vunpack.i.l.bf16 %v1851_v28 }
 0x191   : > { %v1739_v37 = vpack.c.bf16 %v1853_v31, %v1852_v32  ;;  %v1015_v31 = vld [vmem:[%s2457_s6 + $0xf0] sm:$0xff]  ;;  %v1016_v32 = vld [vmem:[%s2457_s6 + $0xf8] sm:$0xff] }
 0x192   : > { %v785_v45 = vpop.permute.xlu0 %784 }
 0x196   : > { %v779_v48 = vpop.permute.xlu0 %778 }
 0x1fa   : > { %v649_v19 = vpop.f32.mrb[6].mxu0 }
 0x1fb   : > { %v663_v20 = vmul.f32 0.015625, %v649_v19  ;;  %v1565_v21 = vpop.f32.mrb[7].mxu0  ;;  %v1011_v19 = vld [vmem:[%s2457_s6 + $0xd0] sm:$0xff] }
 0x1fc   : > { %v1763_v21 = vpack.c.bf16 %v994_v18, %v993_v17  ;;  %v1123_v17 = vld [vmem:[%s2459_s8 + $0x38] sm:$0xff] }
 0x1fd   : > { %1854 = vtanh.f32 %v663_v20  ;;  %v1012_v20 = vld [vmem:[%s2457_s6 + $0xd8] sm:$0xff] }
 0x1fe   : > { %v654_v22 = vpop.f32.mrb[8].mxu0 }
 0x1ff   : > { %v664_v23 = vmul.f32 0.015625, %v654_v22  ;;  %v1568_v24 = vpop.f32.mrb[9].mxu0  ;;  %v1765_v22 = vpack.c.bf16 %v1012_v20, %v1011_v19  ;;  %v1124_v19 = vld [vmem:[%s2459_s8 + $0x40] sm:$0xff]  ;;  %v1125_v20 = vld [vmem:[%s2459_s8 + $0x48] sm:$0xff] }
 0x200   : > { %v996_v24 = vld [vmem:[%s2457_s6 + $0x58] sm:$0xff] }
 0x201   : > { %1856 = vtanh.f32 %v664_v23  ;;  %v995_v23 = vld [vmem:[%s2457_s6 + $0x50] sm:$0xff] }
 0x202   : > { %v659_v25 = vpop.f32.mrb[10].mxu0 }
 0x203   : > { %v665_v26 = vmul.f32 0.015625, %v659_v25  ;;  %v1571_v27 = vpop.f32.mrb[11].mxu0  ;;  %v1013_v25 = vld [vmem:[%s2457_s6 + $0xe0] sm:$0xff] }
 0x204   : > { %v1767_v27 = vpack.c.bf16 %v996_v24, %v995_v23 }
 0x205   : > { %1858 = vtanh.f32 %v665_v26  ;;  %v1014_v26 = vld [vmem:[%s2457_s6 + $0xe8] sm:$0xff] }
 0x206   : > { %v1769_v28 = vpack.c.bf16 %v1014_v26, %v1013_v25 }
 0x207   : > { %v1855_v30 = vpop.eup %1854 }
 0x208   : > { %v671_v34 = vmul.f32 %v1855_v30, %v670_v29  ;;  %v998_v30 = vld [vmem:[%s2457_s6 + $0x68] sm:$0xff] }
 0x20a   : > { %v677_v35 = vadd.f32 %v674_v33, %v671_v34  ;;  %v1773_v34 = vpack.c.bf16 %v1016_v32, %v1015_v31  ;;  %v1128_v31 = vld [vmem:[%s2459_s8 + $0x60] sm:$0xff]  ;;  %v1129_v32 = vld [vmem:[%s2459_s8 + $0x68] sm:$0xff] }
 0x20b   : > { %v1857_v36 = vpop.eup %1856 }
 0x20c   : > { %1579 = vmatmul.mubr.msk.f32.vlgmr.msra.gmra.mrb[0].mxu1 %vm680_vm4, %v677_v35  ;;  %v672_v39 = vmul.f32 %v1857_v36, %v670_v29  ;;  %v999_v35 = vld [vmem:[%s2457_s6 + $0x70] sm:$0xff]  ;;  %v1000_v36 = vld [vmem:[%s2457_s6 + $0x78] sm:$0xff] }
 0x20d   : > { %1741 = vmatpush3.bf16.xpose.msk.msra.mxu1 %vm2129_vm2, %v1739_v37  ;;  %1581 = vmatprep.mubr.msk.f32.mxu1 %vm1896_vm0, %v1894_v7  ;;  %v1775_v37 = vpack.c.bf16 %v1000_v36, %v999_v35  ;;  %v1131_v35 = vld [vmem:[%s2459_s8 + $0x78] sm:$0xff] }
 0x20e   : > { %v678_v40 = vadd.f32 %v675_v38, %v672_v39  ;;  %1591 = vmatprep.subr.mxu1 %v1894_v7 }
 0x20f   : > { %v1859_v41 = vpop.eup %1858 }
 0x210   : > { %1582 = vmatmul.mubr.msk.f32.gmra.mrb[2].mxu1 %vm680_vm4, %v678_v40  ;;  %v673_v43 = vmul.f32 %v1859_v41, %v670_v29  ;;  %v997_v29 = vld [vmem:[%s2457_s6 + $0x60] sm:$0xff] }
 0x211   : > { %1584 = vmatprep.mubr.msk.f32.mxu1 %vm1896_vm0, %v1894_v7  ;;  %v1771_v33 = vpack.c.bf16 %v998_v30, %v997_v29  ;;  %v1127_v29 = vld [vmem:[%s2459_s8 + $0x58] sm:$0xff] }
 0x212   : > { %v679_v44 = vadd.f32 %v676_v42, %v673_v43 }
 0x214   : > { %1585 = vmatmul.mubr.msk.f32.gmra.mrb[4].mxu1 %vm680_vm4, %v679_v44 }
 0x215   : > { %1592 = vmatpush3.xpose.msk.msra.mxu1 %vm564_vm1, %v785_v45  ;;  %1593 = vmatprep.mubr.msk.f32.mxu1 %vm1896_vm0, %v1894_v7 }
 0x216   : > { %1746 = vmatprep.subr.bf16.mxu1 %v1745_v54 }
 0x218   : > { %1594 = vmatmul.mubr.msk.f32.vlgmr.msra.gmra.mrb[6].mxu1 %vm564_vm1, %v775_v46 }
 0x219   : > { %1596 = vmatprep.mubr.msk.f32.mxu1 %vm1896_vm0, %v1894_v7  ;;  %1748 = vmatpush3.bf16.msra.mxu1 %v1747_v60 }
 0x21a   : > { %1750 = vmatprep.subr.bf16.mxu1 %v1749_v61 }
 0x21c   : > { %1597 = vmatmul.mubr.msk.f32.gmra.mrb[8].mxu1 %vm564_vm1, %v777_v47 }
 0x21d   : > { %1599 = vmatprep.mubr.msk.f32.mxu1 %vm1896_vm0, %v1894_v7  ;;  %1752 = vmatpush3.bf16.msra.mxu1 %v1751_v2 }
 0x21e   : > { %1754 = vmatprep.subr.bf16.mxu1 %v1753_v3  ;;  %v1444_v3 = vld [vmem:[%s2456_s5 + $0x28] sm:$0xf] }
 0x220   : > { %1600 = vmatmul.mubr.msk.f32.gmra.mrb[10].mxu1 %vm564_vm1, %v779_v48 }
 0x221   : > { %1756 = vmatpush3.bf16.msra.mxu1 %v1755_v9  ;;  %v1118_v9 = vld [vmem:[%s2459_s8 + $0x10] sm:$0xff] }
 0x222   : > { %1758 = vmatprep.subr.bf16.mxu1 %v1757_v10  ;;  %v1778_v10 = vpack.c.bf16 %v1117_v8, %v1116_v6  ;;  %v1781_v12 = vpack.c.bf16 %v1119_v11, %v1118_v9 }
 0x225   : > { %1760 = vmatpush3.bf16.msra.mxu1 %v1759_v15  ;;  %v1784_v15 = vpack.c.bf16 %v1121_v14, %v1120_v13 }
 0x226   : > { %1762 = vmatprep.subr.bf16.mxu1 %v1761_v16  ;;  %v1122_v16 = vld [vmem:[%s2459_s8 + $0x30] sm:$0xff] }
 0x227   : > { %v1787_v18 = vpack.c.bf16 %v1123_v17, %v1122_v16 }
 0x229   : > { %1764 = vmatpush3.bf16.msra.mxu1 %v1763_v21  ;;  %v1790_v21 = vpack.c.bf16 %v1125_v20, %v1124_v19  ;;  %v1244_v19 = vld [vmem:[%s2461_s10 + $0x68] sm:$0xff] }
 0x22a   : > { %1766 = vmatprep.subr.bf16.mxu1 %v1765_v22 }
 0x22d   : > { %1768 = vmatpush3.bf16.msra.mxu1 %v1767_v27 }
 0x22e   : > { %1770 = vmatprep.subr.bf16.mxu1 %v1769_v28  ;;  %v1126_v28 = vld [vmem:[%s2459_s8 + $0x50] sm:$0xff] }
 0x22f   : > { %v1793_v30 = vpack.c.bf16 %v1127_v29, %v1126_v28 }
 0x231   : > { %1772 = vmatpush3.bf16.msra.mxu1 %v1771_v33  ;;  %v1796_v33 = vpack.c.bf16 %v1129_v32, %v1128_v31 }
 0x232   : > { %1774 = vmatprep.subr.bf16.mxu1 %v1773_v34  ;;  %v1130_v34 = vld [vmem:[%s2459_s8 + $0x70] sm:$0xff] }
 0x233   : > { %v1799_v36 = vpack.c.bf16 %v1131_v35, %v1130_v34 }
 0x235   : > { %1776 = vmatpush3.bf16.msra.mxu1 %v1775_v37  ;;  %v1231_v37 = vld [vmem:[%s2461_s10] sm:$0xff] }
 0x236   : > { %1801 = vmatprep.subr.bf16.mxu1 %v1895_v58 }
 0x2df   : > { %v2281_v38 = vpop.f32.mrb[0].mxu1 }
 0x2e0   : > { %v1580_v39 = vpop.f32.mrb[1].mxu1 }
 0x2e1   : > { %v1233_v39 = vld [vmem:[%s2461_s10 + $0x10] sm:$0xff] }
 0x2e3   : > { %v2283_v40 = vpop.f32.mrb[2].mxu1 }
 0x2e4   : > { %v1583_v41 = vpop.f32.mrb[3].mxu1 }
 0x2e5   : > { %v1234_v41 = vld [vmem:[%s2461_s10 + $0x18] sm:$0xff] }
 0x2e7   : > { %v2285_v42 = vpop.f32.mrb[4].mxu1 }
 0x2e8   : > { %v1586_v43 = vpop.f32.mrb[5].mxu1 }
 0x2e9   : > { %v1235_v43 = vld [vmem:[%s2461_s10 + $0x20] sm:$0xff] }
 0x2eb   : > { %v864_v44 = vpop.f32.mrb[6].mxu1 }
 0x2ec   : > { %v878_v45 = vmul.f32 0.015625, %v864_v44  ;;  %v1595_v46 = vpop.f32.mrb[7].mxu1  ;;  %v1236_v44 = vld [vmem:[%s2461_s10 + $0x28] sm:$0xff] }
 0x2ed   : > { %v1237_v46 = vld [vmem:[%s2461_s10 + $0x30] sm:$0xff] }
 0x2ee   : > { %1860 = vtanh.f32 %v878_v45  ;;  %v1808_v45 = vpack.c.bf16 %v1236_v44, %v1235_v43 }
 0x2ef   : > { %v869_v47 = vpop.f32.mrb[8].mxu1 }
 0x2f0   : > { %v879_v48 = vmul.f32 0.015625, %v869_v47  ;;  %v1598_v50 = vpop.f32.mrb[9].mxu1  ;;  %v1238_v47 = vld [vmem:[%s2461_s10 + $0x38] sm:$0xff] }
 0x2f1   : > { %v1239_v50 = vld [vmem:[%s2461_s10 + $0x40] sm:$0xff] }
 0x2f2   : > { %1862 = vtanh.f32 %v879_v48  ;;  %v1811_v48 = vpack.c.bf16 %v1238_v47, %v1237_v46 }
 0x2f3   : > { %v874_v51 = vpop.f32.mrb[10].mxu1 }
 0x2f4   : > { %v880_v53 = vmul.f32 0.015625, %v874_v51  ;;  %v1601_v54 = vpop.f32.mrb[11].mxu1  ;;  %v1240_v51 = vld [vmem:[%s2461_s10 + $0x48] sm:$0xff] }
 0x2f5   : > { %v1241_v54 = vld [vmem:[%s2461_s10 + $0x50] sm:$0xff] }
 0x2f6   : > { %1864 = vtanh.f32 %v880_v53  ;;  %v1814_v53 = vpack.c.bf16 %v1240_v51, %v1239_v50 }
 0x2f8   : > { %v1861_v57 = vpop.eup %1860 }
 0x2f9   : > { %v886_v60 = vmul.f32 %v1861_v57, %v885_v56 }
 0x2fb   : > { %v893_v61 = vadd.f32 %v1442_v59, %v886_v60  ;;  %v1449_v60 = vld [vmem:[%s2458_s7] ss:$0 sm:$0xff] }
 0x2fc   : > { %v1863_v62 = vpop.eup %1862 }
 0x2fd   : > { %1609 = vmatmul.mubr.msk.f32.vlgmr.msra.gmra.mrb[12].mxu0 %vm680_vm4, %v893_v61  ;;  %v887_v0 = vmul.f32 %v1863_v62, %v885_v56 }
 0x2fe   : > { %1611 = vmatprep.mubr.msk.f32.mxu0 %vm1896_vm0, %v1894_v7  ;;  %1779 = vmatpush3.bf16.msra.mxu0 %v1778_v10 }
 0x2ff   : > { %v894_v1 = vadd.f32 %v1443_v63, %v887_v0  ;;  %1780 = vmatprep.subr.bf16.mxu0 %v1895_v58 }
 0x300   : > { %v1865_v2 = vpop.eup %1864 }
 0x301   : > { %1612 = vmatmul.mubr.msk.f32.gmra.mrb[14].mxu0 %vm680_vm4, %v894_v1  ;;  %v888_v4 = vmul.f32 %v1865_v2, %v885_v56  ;;  %v1242_v56 = vld [vmem:[%s2461_s10 + $0x58] sm:$0xff] }
 0x302   : > { %1614 = vmatprep.mubr.msk.f32.mxu0 %vm1896_vm0, %v1894_v7  ;;  %1782 = vmatpush3.bf16.msra.mxu0 %v1781_v12  ;;  %v1817_v57 = vpack.c.bf16 %v1242_v56, %v1241_v54 }
 0x303   : > { %v895_v5 = vadd.f32 %v1444_v3, %v888_v4  ;;  %1783 = vmatprep.subr.bf16.mxu0 %v1895_v58 }
 0x305   : > { %1615 = vmatmul.mubr.msk.f32.gmra.mrb[16].mxu0 %vm680_vm4, %v895_v5 }
 0x306   : > { %1649 = vmatprep.mubr.msk.f32.mxu0 %vm1896_vm0, %v1894_v7  ;;  %1785 = vmatpush3.bf16.msra.mxu0 %v1784_v15 }
 0x307   : > { %1786 = vmatprep.subr.bf16.mxu0 %v1895_v58 }
 0x30a   : > { %1788 = vmatpush3.bf16.msra.mxu0 %v1787_v18  ;;  %v1243_v18 = vld [vmem:[%s2461_s10 + $0x60] sm:$0xff] }
 0x30b   : > { %1789 = vmatprep.subr.bf16.mxu0 %v1895_v58  ;;  %v1820_v20 = vpack.c.bf16 %v1244_v19, %v1243_v18 }
 0x30e   : > { %1791 = vmatpush3.bf16.msra.mxu0 %v1790_v21  ;;  %v1245_v21 = vld [vmem:[%s2461_s10 + $0x70] sm:$0xff] }
 0x30f   : > { %1792 = vmatprep.subr.bf16.mxu0 %v1895_v58 }
 0x312   : > { %1794 = vmatpush3.bf16.msra.mxu0 %v1793_v30 }
 0x313   : > { %1795 = vmatprep.subr.bf16.mxu0 %v1895_v58 }
 0x316   : > { %1797 = vmatpush3.bf16.msra.mxu0 %v1796_v33 }
 0x317   : > { %1798 = vmatprep.subr.bf16.mxu0 %v1895_v58 }
 0x31a   : > { %1800 = vmatpush3.bf16.msra.mxu0 %v1799_v36 }
 0x3d0   : > { %v971_v22 = vpop.f32.mrb[12].mxu0 }
 0x3d1   : > { %v1610_v23 = vpop.f32.mrb[13].mxu0  ;;  %1088 = vmatprep.mubr.f32.mxu1 %v971_v22  ;;  %v1246_v22 = vld [vmem:[%s2461_s10 + $0x78] sm:$0xff] }
 0x3d2   : > { %1089 = vmatmul.mubr.f32.vlgmr.msra.gmra.mrb[12].mxu1 %v2281_v38  ;;  %v1232_v38 = vld [vmem:[%s2461_s10 + $0x8] sm:$0xff]  ;;  %v1823_v23 = vpack.c.bf16 %v1246_v22, %v1245_v21 }
 0x3d4   : > { %v976_v24 = vpop.f32.mrb[14].mxu0 }
 0x3d5   : > { %v1613_v25 = vpop.f32.mrb[15].mxu0  ;;  %1093 = vmatprep.mubr.f32.mxu1 %v976_v24  ;;  %v1450_v24 = vld [vmem:[%s2460_s9] ss:$0 sm:$0xff] }
 0x3d6   : > { %1094 = vmatmul.mubr.f32.gmra.mrb[14].mxu1 %v2283_v40  ;;  %v1802_v40 = vpack.c.bf16 %v1232_v38, %v1231_v37 }
 0x3d8   : > { %v981_v26 = vpop.f32.mrb[16].mxu0  ;;  %1803 = vmatpush3.bf16.msra.mxu1 %v1802_v40  ;;  %v1451_v40 = vld [vmem:[%s2462_s11] ss:$0 sm:$0xff] }
 0x3d9   : > { %v1616_v27 = vpop.f32.mrb[17].mxu0  ;;  %1098 = vmatprep.mubr.f32.mxu1 %v981_v26  ;;  %1804 = vmatprep.subr.bf16.mxu1 %v1895_v58 }
 0x3da   : > { %1099 = vmatmul.mubr.f32.gmra.mrb[16].mxu1 %v2285_v42  ;;  %v1805_v42 = vpack.c.bf16 %v1234_v41, %v1233_v39 }
 0x3db   : > { %1690 = vmatprep.mubr.msk.f32.mxu1 %vm1896_vm0, %v1894_v7 }
 0x3dc   : > { %1806 = vmatpush3.bf16.msra.mxu1 %v1805_v42 }
 0x3dd   : > { %1807 = vmatprep.subr.bf16.mxu1 %v1895_v58 }
 0x3e0   : > { %1809 = vmatpush3.bf16.msra.mxu1 %v1808_v45 }
 0x3e1   : > { %1810 = vmatprep.subr.bf16.mxu1 %v1895_v58 }
 0x3e4   : > { %1812 = vmatpush3.bf16.msra.mxu1 %v1811_v48 }
 0x3e5   : > { %1813 = vmatprep.subr.bf16.mxu1 %v1895_v58 }
 0x3e8   : > { %1815 = vmatpush3.bf16.msra.mxu1 %v1814_v53 }
 0x3e9   : > { %1816 = vmatprep.subr.bf16.mxu1 %v1895_v58 }
 0x3ec   : > { %1818 = vmatpush3.bf16.msra.mxu1 %v1817_v57 }
 0x3ed   : > { %1819 = vmatprep.subr.bf16.mxu1 %v1895_v58 }
 0x3f0   : > { %1821 = vmatpush3.bf16.msra.mxu1 %v1820_v20 }
 0x3f1   : > { %1822 = vmatprep.subr.bf16.mxu1 %v1895_v58 }
 0x3f4   : > { %1824 = vmatpush3.bf16.msra.mxu1 %v1823_v23 }
 0x4a5   : > { %v1510_v59 = vpop.f32.mrb[12].mxu1 }
 0x4a6   : > { %v1511_v61 = vpop.f32.mrb[13].mxu1 }
 0x4a7   : > { %v1512_v62 = vadd.f32 %v1511_v61, %v1510_v59 }
 0x4a9   : > { %v1091_v63 = vadd.f32 %v1512_v62, %v1449_v60  ;;  %v1513_v0 = vpop.f32.mrb[14].mxu1 }
 0x4aa   : > { %v1514_v1 = vpop.f32.mrb[15].mxu1 }
 0x4ab   : > { %v1104_v2 = vadd.f32 %v1091_v63, %v2098_v49  ;;  %v1515_v3 = vadd.f32 %v1514_v1, %v1513_v0 }
 0x4ad   : > { %v1110_v4 = vmul.f32 0.1, %v1104_v2  ;;  %v1096_v5 = vadd.f32 %v1515_v3, %v1449_v60  ;;  %v1516_v6 = vpop.f32.mrb[16].mxu1  ;;  %vm1107_vm5 = vcmp.ge.f32.partialorder %v1104_v2, 0.0 }
 0x4ae   : > { %v1517_v8 = vpop.f32.mrb[17].mxu1 }
 0x4af   : > { %v1105_v9 = vadd.f32 %v1096_v5, %v2104_v52  ;;  %v1518_v10 = vadd.f32 %v1517_v8, %v1516_v6  ;;  %v1113_v11 = vsel %vm1107_vm5, %v1104_v2, %v1110_v4 }
 0x4b0   : > { %1650 = vmatmul.mubr.f32.vlgmr.msra.gmra.mrb[18].mxu0 %v1113_v11 }
 0x4b1   : > { %v1101_v12 = vadd.f32 %v1518_v10, %v1449_v60  ;;  %1652 = vmatprep.mubr.msk.f32.mxu0 %vm1896_vm0, %v1894_v7  ;;  %vm1108_vm6 = vcmp.ge.f32.partialorder %v1105_v9, 0.0  ;;  %v1111_v13 = vmul.f32 0.1, %v1105_v9 }
 0x4b3   : > { %v1106_v14 = vadd.f32 %v1101_v12, %v2111_v55  ;;  %v1114_v15 = vsel %vm1108_vm6, %v1105_v9, %v1111_v13 }
 0x4b4   : > { %1653 = vmatmul.mubr.f32.gmra.mrb[20].mxu0 %v1114_v15 }
 0x4b5   : > { %1655 = vmatprep.mubr.msk.f32.mxu0 %vm1896_vm0, %v1894_v7  ;;  %vm1109_vm7 = vcmp.ge.f32.partialorder %v1106_v14, 0.0  ;;  %v1112_v16 = vmul.f32 0.1, %v1106_v14 }
 0x4b7   : > { %v1115_v17 = vsel %vm1109_vm7, %v1106_v14, %v1112_v16 }
 0x4b8   : > { %1656 = vmatmul.mubr.f32.gmra.mrb[22].mxu0 %v1115_v17 }
 0x583   : > { %v1205_v25 = vpop.f32.mrb[18].mxu0 }
 0x584   : > { %v1206_v26 = vadd.f32 %v1450_v24, %v1205_v25  ;;  %v1651_v27 = vpop.f32.mrb[19].mxu0 }
 0x586   : > { %v1219_v28 = vadd.f32 %v1206_v26, %v2098_v49 }
 0x587   : > { %v1210_v58 = vpop.f32.mrb[20].mxu0 }
 0x588   : > { %vm1222_vm8 = vcmp.ge.f32.partialorder %v1219_v28, 0.0  ;;  %v1225_v29 = vmul.f32 0.1, %v1219_v28  ;;  %v1211_v30 = vadd.f32 %v1450_v24, %v1210_v58  ;;  %v1654_v31 = vpop.f32.mrb[21].mxu0 }
 0x58a   : > { %v1220_v32 = vadd.f32 %v1211_v30, %v2104_v52  ;;  %v1228_v33 = vsel %vm1222_vm8, %v1219_v28, %v1225_v29 }
 0x58b   : > { %v1215_v34 = vpop.f32.mrb[22].mxu0  ;;  %1691 = vmatmul.mubr.f32.vlgmr.msra.gmra.mrb[18].mxu1 %v1228_v33 }
 0x58c   : > { %v1216_v35 = vadd.f32 %v1450_v24, %v1215_v34  ;;  %v1657_v36 = vpop.f32.mrb[23].mxu0  ;;  %1693 = vmatprep.mubr.msk.f32.mxu1 %vm1896_vm0, %v1894_v7  ;;  %vm1223_vm9 = vcmp.ge.f32.partialorder %v1220_v32, 0.0  ;;  %v1226_v37 = vmul.f32 0.1, %v1220_v32 }
 0x58e   : > { %v1221_v49 = vadd.f32 %v1216_v35, %v2111_v55  ;;  %v1229_v38 = vsel %vm1223_vm9, %v1220_v32, %v1226_v37 }
 0x58f   : > { %1694 = vmatmul.mubr.f32.gmra.mrb[20].mxu1 %v1229_v38 }
 0x590   : > { %1696 = vmatprep.mubr.msk.f32.mxu1 %vm1896_vm0, %v1894_v7  ;;  %vm1224_vm10 = vcmp.ge.f32.partialorder %v1221_v49, 0.0  ;;  %v1227_v52 = vmul.f32 0.1, %v1221_v49 }
 0x592   : > { %v1230_v39 = vsel %vm1224_vm10, %v1221_v49, %v1227_v52 }
 0x593   : > { %1697 = vmatmul.mubr.f32.gmra.mrb[22].mxu1 %v1230_v39 }
 0x65e   : > { %v1320_v41 = vpop.f32.mrb[18].mxu1 }
 0x65f   : > { %v1321_v42 = vadd.f32 %v1451_v40, %v1320_v41  ;;  %v1692_v43 = vpop.f32.mrb[19].mxu1 }
 0x661   : > { %v1334_v44 = vadd.f32 %v1321_v42, %v1228_v33 }
 0x662   : > { %v1325_v45 = vpop.f32.mrb[20].mxu1 }
 0x663   : > { %vm1337_vm11 = vcmp.ge.f32.partialorder %v1334_v44, 0.0  ;;  %v1340_v7 = vmul.f32 0.1, %v1334_v44  ;;  %v1326_v55 = vadd.f32 %v1451_v40, %v1325_v45  ;;  %v1695_v46 = vpop.f32.mrb[21].mxu1 }
 0x665   : > { %v1343_v47 = vsel %vm1337_vm11, %v1334_v44, %v1340_v7  ;;  %v1335_v48 = vadd.f32 %v1326_v55, %v1229_v38 }
 0x666   : > { %1346 = vst [vmem:[%s427_s27] sm:$0xff] %v1343_v47  ;;  %v1330_v50 = vpop.f32.mrb[22].mxu1 }
 0x667   : > { %vm1338_vm12 = vcmp.ge.f32.partialorder %v1335_v48, 0.0  ;;  %v1341_v51 = vmul.f32 0.1, %v1335_v48  ;;  %v1331_v53 = vadd.f32 %v1451_v40, %v1330_v50  ;;  %v1698_v54 = vpop.f32.mrb[23].mxu1 }
 0x669   : > { %v1344_v56 = vsel %vm1338_vm12, %v1335_v48, %v1341_v51  ;;  %v1336_v57 = vadd.f32 %v1331_v53, %v1230_v39 }
 0x66a   : > { %1347 = vst [vmem:[%s427_s27 + $0x8] sm:$0xff] %v1344_v56 }
 0x66b   : > { %vm1339_vm13 = vcmp.ge.f32.partialorder %v1336_v57, 0.0  ;;  %v1342_v59 = vmul.f32 0.1, %v1336_v57 }
 0x66d   : > { %v1345_v60 = vsel %vm1339_vm13, %v1336_v57, %v1342_v59 }
 0x66e   : > { %1348 = vst [vmem:[%s427_s27 + $0x10] sm:$0xf] %v1345_v60 }
 0x66f PF: > { %s23_s21 = sadd.s32 1, %s1891_s21  }
 0x670   : > { %p20_p1 = scmp.ge.s32.totalorder %s23_s21, 4  }
 0x672   :  { %22 = sbr.rel (!%p20_p1) target bundleno = 1 (0x1), region = 104 }
 0x679   :  { %1370 = vsyncpa [#allocation3], 1 }
 0x67a   :  { %1372 = vsyncpa [#allocation3 + $0x1], 1 }

// kernel: _lambda_.14
= control target key start
LH: loop header
LB: loop body
LE: loop exit
PB: predicated region body
PF: predicated region fallthrough
CT: control target
= control target key end

     0   :  { %s3306_s0 = inlined_call_operand.vmem [shape: f32[2,20,16], index: 0, kind: input, shape index: {}]   ;;  %s3307_s1 = inlined_call_operand.hbm [shape: f32[16,128], index: 1, kind: input, shape index: {}]   ;;  %s3308_s2 = inlined_call_operand.hbm [shape: f32[1,128], index: 2, kind: input, shape index: {}]   ;;  %s3309_s3 = inlined_call_operand.hbm [shape: f32[20,128], index: 3, kind: input, shape index: {}]   ;;  %s3310_s4 = inlined_call_operand.vmem [shape: f32[128,256], index: 4, kind: input, shape index: {}]   ;;  %s3311_s5 = inlined_call_operand.hbm [shape: f32[1,256], index: 5, kind: input, shape index: {}]   ;;  %s3312_s6 = inlined_call_operand.hbm [shape: f32[2], index: 6, kind: input, shape index: {}]   ;;  %s3313_s7 = inlined_call_operand.vmem [shape: f32[2,20,20], index: 7, kind: input, shape index: {}]   ;;  %s3314_s8 = inlined_call_operand.vmem [shape: f32[256,128], index: 8, kind: input, shape index: {}]   ;;  %s3315_s9 = inlined_call_operand.hbm [shape: f32[1,128], index: 9, kind: input, shape index: {}]   ;;  %s3316_s10 = inlined_call_operand.vmem [shape: f32[128,128], index: 10, kind: input, shape index: {}]   ;;  %s3317_s11 = inlined_call_operand.hbm [shape: f32[1,128], index: 11, kind: input, shape index: {}]   ;;  %s3318_s12 = inlined_call_operand.vmem [shape: f32[128,128], index: 12, kind: input, shape index: {}]   ;;  %s3319_s13 = inlined_call_operand.hbm [shape: f32[1,128], index: 13, kind: input, shape index: {}]   ;;  %s3320_s14 = inlined_call_operand.vmem [shape: f32[2,20,128], index: 14, kind: output, shape index: {}]  }
   0x1   :  { %3324 = sst [smem:[#allocation22_spill]] %s3308_s2 }
   0x2   :  { %3325 = sst [smem:[#allocation23_spill]] %s3320_s14 }
   0x3   :  { %19 = vsyncpa [#allocation3], 0 }
   0x4   :  { %20 = vsyncpa [#allocation6], 0 }
   0x5   :  { %21 = vsyncpa [#allocation9], 0 }
   0x6   :  { %22 = vsyncpa [#allocation4], 0 }
   0x7   :  { %23 = vsyncpa [#allocation13], 0  ;;  %s2628_s29 = smov 0  }
   0x8 LB: > { %3326 = sst [smem:[#allocation21_spill]] %s2537_s29  ;;  %s2539_s30 = smov [#allocation5]   ;;  %s2537_s29 = sphi %s2628_s29, %s29_s29  }
   0x9   : > { %s385_s15 = sshll.u32 %s2539_s30, 4  ;;  %s2634_s16 = sadd.s32 4294967295, %s2537_s29   ;;  %s2639_s15 = int_to_ptr.vmem [resolvable:$true] %s385_s15 }
   0xa   : > { %p1739_p0 = scmp.ge.s32.totalorder %s2537_s29, 1  ;;  %p359_p1 = scmp.lt.s32.totalorder %s2537_s29, 3 }
   0xb   : > { %p3322_p2 = scmp.eq.s32.totalorder %s2634_s16, 0  ;;  %s2540_s18 = smov [#allocation8]  }
   0xc   : > { %p2641_p3 = pnand %p1739_p0, %p359_p1  ;;  %s412_s19 = sshll.u32 %s2540_s18, 4  ;;  %s2647_s19 = int_to_ptr.vmem [resolvable:$true] %s412_s19 }
   0xd   : > { %s2541_s20 = smov [#allocation12]   ;;  %s2542_s23 = smov [#allocation2]  }
   0xe   : > { %s3327_s17 = scalar_select %p2641_p3, 1, 0 }
   0xf   : > { %p2218_p4 = pneg %p2641_p3  ;;  %s452_s21 = sshll.u32 %s2541_s20, 4  ;;  %s2655_s21 = int_to_ptr.vmem [resolvable:$true] %s452_s21 }
  0x10   : > { %s371_s24 = sshll.u32 %s2542_s23, 4  ;;  %s3329_s2 = sld [smem:[#allocation22_spill]]  ;;  %s2657_s24 = int_to_ptr.vmem [resolvable:$true] %s371_s24 }
  0x11   : > { %p2651_p5 = pnand %p3322_p2, %p2218_p4 }
  0x13   : > { %p2667_p7 = pneg %p2651_p5 }
  0x16   : > { %s2298_s27 = scalar_lea.hbm %s3329_s2, 16 }
  0x17   : > { %p2299_p6 = scmp.ne.s32.totalorder %s3329_s2, %s2298_s27  ;;  %p2305_p10 = scmp.lt.u32.totalorder %s2298_s27, %s3329_s2 }
  0x19   : > { %p2301_p8 = pnand %p2667_p7, %p2299_p6 }
  0x1b   : > { %p2302_p9 = pneg %p2301_p8 }
  0x1d   : > { %p2307_p11 = pnand %p2305_p10, %p2302_p9 }
  0x1f   : > { %2310 = shalt.err (!%p2307_p11)
}
  0x20   : > { %s2311_s25 = scalar_lea.vmem %s2639_s15, 16  ;;  %s2318_s26 = scalar_lea.vmem %s2639_s15, 32 }
  0x21   : > { %p2312_p12 = scmp.ne.s32.totalorder %s2639_s15, %s2311_s25  ;;  %p2319_p1 = scmp.lt.s32.totalorder %s2639_s15, %s2639_s15 }
  0x22   : > { %p2320_p4 = scmp.lt.s32.totalorder %s2318_s26, %s2311_s25 }
  0x23   : > { %p2314_p13 = pnand %p2312_p12, %p2667_p7 }
  0x24   : > { %p2321_p6 = por %p2320_p4, %p2319_p1 }
  0x25   : > { %p2315_p0 = pneg %p2314_p13 }
  0x27   : > { %p2322_p8 = pnand %p2321_p6, %p2315_p0 }
  0x29   : > { %2325 = shalt.err (!%p2322_p8)
}
  0x2a   : > { %2224 = dma.hbm_to_vmem [thread:$0]  (!%p2651_p5), %s3329_s2, 16, %s2639_s15, [#allocation6]  }
  0x2b   : > { %s2326_s23 = scalar_lea.hbm %s3311_s5, 32 }
  0x2c   : > { %p2327_p9 = scmp.ne.s32.totalorder %s3311_s5, %s2326_s23  ;;  %p2333_p12 = scmp.lt.u32.totalorder %s2326_s23, %s3311_s5 }
  0x2e   : > { %p2329_p10 = pnand %p2327_p9, %p2667_p7 }
  0x30   : > { %p2330_p11 = pneg %p2329_p10 }
  0x32   : > { %p2335_p13 = pnand %p2333_p12, %p2330_p11 }
  0x34   : > { %2338 = shalt.err (!%p2335_p13)
}
  0x35   : > { %s2339_s15 = scalar_lea.vmem %s2647_s19, 32  ;;  %p2347_p6 = scmp.lt.s32.totalorder %s2647_s19, %s2647_s19 }
  0x36   : > { %p2340_p0 = scmp.ne.s32.totalorder %s2647_s19, %s2339_s15  ;;  %p2348_p8 = scmp.lt.s32.totalorder %s2339_s15, %s2339_s15 }
  0x38   : > { %p2342_p1 = pnand %p2340_p0, %p2667_p7  ;;  %p2349_p9 = por %p2348_p8, %p2347_p6 }
  0x3a   : > { %p2343_p4 = pneg %p2342_p1 }
  0x3c   : > { %p2350_p10 = pnand %p2349_p9, %p2343_p4 }
  0x3e   : > { %2353 = shalt.err (!%p2350_p10)
}
  0x3f   : > { %2230 = dma.hbm_to_vmem [thread:$0]  (!%p2651_p5), %s3311_s5, 32, %s2647_s19, [#allocation9]  }
  0x40   : > { %s2354_s30 = scalar_lea.hbm %s3317_s11, 16 }
  0x41   : > { %p2355_p11 = scmp.ne.s32.totalorder %s3317_s11, %s2354_s30  ;;  %p2361_p0 = scmp.lt.u32.totalorder %s2354_s30, %s3317_s11 }
  0x43   : > { %p2357_p12 = pnand %p2355_p11, %p2667_p7 }
  0x45   : > { %p2358_p13 = pneg %p2357_p12 }
  0x47   : > { %p2363_p1 = pnand %p2361_p0, %p2358_p13 }
  0x49   : > { %2366 = shalt.err (!%p2363_p1)
}
  0x4a   : > { %s2367_s19 = scalar_lea.vmem %s2655_s21, 16  ;;  %s2374_s15 = scalar_lea.vmem %s2655_s21, 32 }
  0x4b   : > { %p2368_p4 = scmp.ne.s32.totalorder %s2655_s21, %s2367_s19  ;;  %p2375_p9 = scmp.lt.s32.totalorder %s2655_s21, %s2655_s21 }
  0x4c   : > { %p2376_p10 = scmp.lt.s32.totalorder %s2374_s15, %s2367_s19 }
  0x4d   : > { %p2370_p6 = pnand %p2368_p4, %p2667_p7 }
  0x4e   : > { %p2377_p11 = por %p2376_p10, %p2375_p9 }
  0x4f   : > { %p2371_p8 = pneg %p2370_p6 }
  0x51   : > { %p2378_p12 = pnand %p2377_p11, %p2371_p8 }
  0x53   : > { %2381 = shalt.err (!%p2378_p12)
}
  0x54   : > { %2239 = dma.hbm_to_vmem [thread:$0]  (!%p2651_p5), %s3317_s11, 16, %s2655_s21, [#allocation13]  }
  0x55   : > { %s2382_s30 = scalar_lea.hbm %s3307_s1, 256 }
  0x56   : > { %p2383_p13 = scmp.ne.s32.totalorder %s3307_s1, %s2382_s30  ;;  %p2389_p4 = scmp.lt.u32.totalorder %s2382_s30, %s3307_s1 }
  0x58   : > { %p2385_p0 = pnand %p2383_p13, %p2667_p7 }
  0x5a   : > { %p2386_p1 = pneg %p2385_p0 }
  0x5c   : > { %p2391_p6 = pnand %p2389_p4, %p2386_p1 }
  0x5e   : > { %2394 = shalt.err (!%p2391_p6)
}
  0x5f   : > { %s2395_s21 = scalar_lea.vmem %s2657_s24, 256  ;;  %p2403_p11 = scmp.lt.s32.totalorder %s2657_s24, %s2657_s24 }
  0x60   : > { %p2396_p8 = scmp.ne.s32.totalorder %s2657_s24, %s2395_s21  ;;  %p2404_p12 = scmp.lt.s32.totalorder %s2395_s21, %s2395_s21 }
  0x62   : > { %p2398_p9 = pnand %p2396_p8, %p2667_p7  ;;  %p2405_p13 = por %p2404_p12, %p2403_p11 }
  0x64   : > { %p2399_p10 = pneg %p2398_p9 }
  0x66   : > { %p2406_p0 = pnand %p2405_p13, %p2399_p10 }
  0x68   : > { %2409 = shalt.err (!%p2406_p0)
}
  0x69   : > { %s2543_s19 = smov 128   ;;  %s2544_s15 = smov 8  }
  0x6a   : > { %2221 = dma.hbm_to_vmem [thread:$0]  (!%p2651_p5), %s3307_s1, 256, %s2657_s24, [#allocation3], %s2543_s19, %s2543_s19, %s2544_s15  }
  0x6b   : > { %s2545_s27 = smov [#allocation7]   ;;  %s2410_s23 = scalar_lea.hbm %s3309_s3, 384 }
  0x6c   : > { %s395_s28 = sshll.u32 %s2545_s27, 4  ;;  %p2411_p1 = scmp.ne.s32.totalorder %s3309_s3, %s2410_s23  ;;  %s396_s28 = int_to_ptr.vmem [resolvable:$true] %s395_s28 }
  0x6d   : > { %p2417_p8 = scmp.lt.u32.totalorder %s2410_s23, %s3309_s3 }
  0x6e   : > { %p2413_p4 = pnand %p2411_p1, %p2667_p7 }
  0x70   : > { %p2414_p6 = pneg %p2413_p4 }
  0x72   : > { %p2419_p9 = pnand %p2417_p8, %p2414_p6 }
  0x74   : > { %2422 = shalt.err (!%p2419_p9)
}
  0x75   : > { %s2423_s24 = scalar_lea.vmem %s396_s28, 384  ;;  %p2431_p13 = scmp.lt.s32.totalorder %s396_s28, %s396_s28 }
  0x76   : > { %p2424_p10 = scmp.ne.s32.totalorder %s396_s28, %s2423_s24  ;;  %p2432_p0 = scmp.lt.s32.totalorder %s2423_s24, %s2423_s24 }
  0x78   : > { %p2426_p11 = pnand %p2424_p10, %p2667_p7  ;;  %p2433_p2 = por %p2432_p0, %p2431_p13 }
  0x7a   : > { %p2427_p12 = pneg %p2426_p11 }
  0x7c   : > { %p2434_p3 = pnand %p2433_p2, %p2427_p12 }
  0x7e   : > { %2437 = shalt.err (!%p2434_p3)
}
  0x7f   : > { %2227 = dma.hbm_to_vmem [thread:$0]  (!%p2651_p5), %s3309_s3, 384, %s396_s28, [#allocation6], %s2543_s19, %s2543_s19, %s2544_s15  }
  0x80   : > { %s2438_s30 = scalar_lea.hbm %s3312_s6, 16 }
  0x81   : > { %p2439_p1 = scmp.ne.s32.totalorder %s3312_s6, %s2438_s30  ;;  %p2445_p2 = scmp.lt.u32.totalorder %s2438_s30, %s3312_s6 }
  0x83   : > { %p2441_p4 = pnand %p2439_p1, %p2667_p7 }
  0x85   : > { %p2442_p6 = pneg %p2441_p4 }
  0x87   : > { %p2447_p3 = pnand %p2445_p2, %p2442_p6 }
  0x89   : > { %2450 = shalt.err (!%p2447_p3)
}
  0x8a   : > { %s2546_s21 = smov [#allocation10]   ;;  %s2547_s28 = smov [#allocation11]  }
  0x8b   : > { %2233 = dma.hbm_to_smem (!%p2651_p5), %s3312_s6, 16, %s2546_s21, [#allocation4]  }
  0x8c   : > { %s438_s24 = sshll.u32 %s2547_s28, 4  ;;  %s2548_s14 = smov [#allocation14]   ;;  %s439_s24 = int_to_ptr.vmem [resolvable:$true] %s438_s24 }
  0x8d   : > { %s466_s29 = sshll.u32 %s2548_s14, 4  ;;  %s2451_s20 = scalar_lea.hbm %s3315_s9, 16  ;;  %s467_s29 = int_to_ptr.vmem [resolvable:$true] %s466_s29 }
  0x8e   : > { %p2452_p8 = scmp.ne.s32.totalorder %s3315_s9, %s2451_s20  ;;  %p2458_p11 = scmp.lt.u32.totalorder %s2451_s20, %s3315_s9 }
  0x90   : > { %p2454_p9 = pnand %p2452_p8, %p2667_p7 }
  0x92   : > { %p2455_p10 = pneg %p2454_p9 }
  0x94   : > { %p2460_p12 = pnand %p2458_p11, %p2455_p10 }
  0x96   : > { %2463 = shalt.err (!%p2460_p12)
}
  0x97   : > { %s2464_s21 = scalar_lea.vmem %s439_s24, 16  ;;  %s2471_s19 = scalar_lea.vmem %s439_s24, 32 }
  0x98   : > { %p2465_p13 = scmp.ne.s32.totalorder %s439_s24, %s2464_s21  ;;  %p2472_p4 = scmp.lt.s32.totalorder %s439_s24, %s439_s24 }
  0x99   : > { %p2473_p6 = scmp.lt.s32.totalorder %s2471_s19, %s2464_s21 }
  0x9a   : > { %p2467_p0 = pnand %p2465_p13, %p2667_p7 }
  0x9b   : > { %p2474_p2 = por %p2473_p6, %p2472_p4 }
  0x9c   : > { %p2468_p1 = pneg %p2467_p0 }
  0x9e   : > { %p2475_p3 = pnand %p2474_p2, %p2468_p1 }
  0xa0   : > { %2478 = shalt.err (!%p2475_p3)
}
  0xa1   : > { %2236 = dma.hbm_to_vmem [thread:$0]  (!%p2651_p5), %s3315_s9, 16, %s439_s24, [#allocation9]  }
  0xa2   : > { %s2479_s27 = scalar_lea.hbm %s3319_s13, 16 }
  0xa3   : > { %p2480_p8 = scmp.ne.s32.totalorder %s3319_s13, %s2479_s27  ;;  %p2486_p11 = scmp.lt.u32.totalorder %s2479_s27, %s3319_s13 }
  0xa5   : > { %p2482_p9 = pnand %p2480_p8, %p2667_p7 }
  0xa7   : > { %p2483_p10 = pneg %p2482_p9 }
  0xa9   : > { %p2488_p12 = pnand %p2486_p11, %p2483_p10 }
  0xab   : > { %2491 = shalt.err (!%p2488_p12)
}
  0xac   : > { %s2492_s26 = scalar_lea.vmem %s467_s29, 16  ;;  %s2499_s24 = scalar_lea.vmem %s467_s29, 32 }
  0xad   : > { %p2493_p13 = scmp.ne.s32.totalorder %s467_s29, %s2492_s26  ;;  %p2500_p4 = scmp.lt.s32.totalorder %s467_s29, %s467_s29 }
  0xae   : > { %p2501_p6 = scmp.lt.s32.totalorder %s2499_s24, %s2492_s26 }
  0xaf   : > { %p2495_p0 = pnand %p2493_p13, %p2667_p7 }
  0xb0   : > { %p2502_p2 = por %p2501_p6, %p2500_p4 }
  0xb1   : > { %p2496_p1 = pneg %p2495_p0 }
  0xb3   : > { %p2503_p3 = pnand %p2502_p2, %p2496_p1 }
  0xb5   : > { %2506 = shalt.err (!%p2503_p3)
}
  0xb6   : > { %2242 = dma.hbm_to_vmem [thread:$0]  (!%p2651_p5), %s3319_s13, 16, %s467_s29, [#allocation13]  }
  0xb7   : > { %p3331_p8 = scmp.ne.s32.totalorder %s3327_s17, 0 }
  0xb8   : > { %p3332_p9 = scmp.eq.s32.totalorder (!%p3331_p8), %s2634_s16, 0 }
  0xb9   : > { %487 = sbr.rel (%p3331_p8) target bundleno = 2020 (0x7e4), region = 76 }
  0xc0   : > { %2512 = dma.done.wait (%p3332_p9), [#allocation3], 256   ;;  %p3333_p7 = pmov %p3332_p9 }
  0xc2   : > { %2514 = vsyncadd (%p3333_p7), [#allocation3], 4294967040  ;;  %p3334_p10 = pmov %p3333_p7 }
  0xc3   : > { %p3335_p11 = pmov %p3333_p7 }
  0xc4   : > { %2516 = dma.done.wait (%p3334_p10), [#allocation6], 400  }
  0xc5   : > { %2518 = vsyncadd (%p3335_p11), [#allocation6], 4294966896  ;;  %p3336_p12 = pmov %p3333_p7 }
  0xc6   : > { %p3337_p5 = pmov %p3333_p7 }
  0xc7   : > { %2520 = dma.done.wait (%p3336_p12), [#allocation9], 32  }
  0xc8   : > { %2522 = vsyncadd (%p3337_p5), [#allocation9], 4294967264  ;;  %p3338_p13 = pmov %p3337_p5 }
  0xc9   : > { %p3339_p0 = pmov %p3337_p5 }
  0xca   : > { %2524 = dma.done.wait (%p3338_p13), [#allocation4], 16  }
  0xcb   : > { %2526 = vsyncadd (%p3339_p0), [#allocation4], 4294967280  ;;  %p3340_p1 = pmov %p3339_p0 }
  0xcc   : > { %p3341_p4 = pmov %p3339_p0 }
  0xcd   : > { %2528 = dma.done.wait (%p3340_p1), [#allocation9], 16  }
  0xce   : > { %2530 = vsyncadd (%p3341_p4), [#allocation9], 4294967280  ;;  %p3342_p6 = pmov %p3339_p0 }
  0xcf   : > { %p3343_p2 = pmov %p3339_p0 }
  0xd0   : > { %2532 = dma.done.wait (%p3342_p6), [#allocation13], 32  }
  0xd1   : > { %2534 = vsyncadd (%p3343_p2), [#allocation13], 4294967264 }
  0xd2   : > { %521 = sfence }
  0xd3   : > { %v575_v0 = vld [vmem:[#allocation2] sm:$0xff]  ;;  %v576_v1 = vld [vmem:[#allocation2 + $0x8] sm:$0xff]  ;;  %p562_p3 = scmp.lt.s32.totalorder %s2634_s16, 1  ;;  %v2549_v2 = vmov 0.0|0.0   ;;  %vm2550_vm0 = vmmov 0   ;;  %v2551_v4 = vmov 0.0  }
  0xd4   : > { %2056 = vmatprep.subr.bf16.mxu0 %v2549_v2  ;;  %v2057_v3 = vpack.c.bf16 %v576_v1, %v575_v0  ;;  %1905 = vmatprep.mubr.msk.f32.mxu0 %vm2550_vm0, %v2551_v4  ;;  %v690_v5 = vld [vmem:[%s3310_s4 + $0x8] sm:$0xff]  ;;  %v692_v6 = vld [vmem:[%s3310_s4 + $0x18] sm:$0xff]  ;;  %v689_v7 = vld [vmem:[%s3310_s4] sm:$0xff]  ;;  %vm584_vm1 = vcmask 130048   ;;  %vm942_vm5 = vcmask 1043456   ;;  %vm816_vm6 = vcmask 523264  }
  0xd5   : > { %s3349_s16 = smov (!%p562_p3, %s2634_s16), 1  ;;  %v2059_v8 = vpack.c.bf16 %v692_v6, %v690_v5  ;;  %v691_v9 = vld [vmem:[%s3310_s4 + $0x10] sm:$0xff]  ;;  %v694_v10 = vld [vmem:[%s3310_s4 + $0x28] sm:$0xff]  ;;  %v696_v11 = vld [vmem:[%s3310_s4 + $0x38] sm:$0xff]  ;;  %797 = vmatprep.mubr.f32.mxu1 %v2551_v4  ;;  %s2552_s29 = smov 64   ;;  %vm932_vm8 = vcmask 162816  }
  0xd6   : > { %2058 = vmatpush3.bf16.msra.mxu0 %v2057_v3  ;;  %v2061_v12 = vpack.c.bf16 %v691_v9, %v689_v7  ;;  %v2063_v13 = vpack.c.bf16 %v696_v11, %v694_v10  ;;  %v693_v14 = vld [vmem:[%s3310_s4 + $0x20] sm:$0xff]  ;;  %v695_v15 = vld [vmem:[%s3310_s4 + $0x30] sm:$0xff]  ;;  %v698_v16 = vld [vmem:[%s3310_s4 + $0x48] sm:$0xff]  ;;  %s2185_s22 = smul.u32 24, %s3349_s16  ;;  %s921_s15 = sld [smem:[#allocation10]] }
  0xd7   : > { %2060 = vmatprep.subr.bf16.mxu1 %v2059_v8  ;;  %v700_v17 = vld [vmem:[%s3310_s4 + $0x58] sm:$0xff]  ;;  %2095 = vmatprep.subr.bf16.mxu0 %v2549_v2  ;;  %v2065_v18 = vpack.c.bf16 %v695_v15, %v693_v14  ;;  %v697_v20 = vld [vmem:[%s3310_s4 + $0x40] sm:$0xff]  ;;  %v699_v21 = vld [vmem:[%s3310_s4 + $0x50] sm:$0xff]  ;;  %s1780_s25 = sld [smem:[#allocation10 + $0x1]] }
  0xd8   : > { %2062 = vmatpush1.bf16.msra.mxu1 %v2061_v12  ;;  %s566_s14 = scalar_lea.vmem %s3306_s0, %s2185_s22  ;;  %v2067_v19 = vpack.c.bf16 %v700_v17, %v698_v16  ;;  %v702_v23 = vld [vmem:[%s3310_s4 + $0x68] sm:$0xff]  ;;  %v704_v24 = vld [vmem:[%s3310_s4 + $0x78] sm:$0xff]  ;;  %v2069_v26 = vpack.c.bf16 %v699_v21, %v697_v20  ;;  %v701_v28 = vld [vmem:[%s3310_s4 + $0x60] sm:$0xff]  ;;  %v723_v17 = vlaneseq }
  0xd9   : > { %2064 = vmatprep.subr.bf16.mxu1 %v2063_v13  ;;  %v572_v22 = vld [vmem:[%s566_s14] sm:$0xff]  ;;  %v573_v25 = vld [vmem:[%s566_s14 + $0x8] sm:$0xff]  ;;  %v2071_v27 = vpack.c.bf16 %v704_v24, %v702_v23  ;;  %v703_v29 = vld [vmem:[%s3310_s4 + $0x70] sm:$0xff] }
  0xda   : > { %1906 = vmatmul.mubr.msk.f32.vlgmr.msra.gmra.mrb[0].mxu0 %vm584_vm1, %v572_v22  ;;  %v706_v30 = vld [vmem:[%s3310_s4 + $0x88] sm:$0xff]  ;;  %v708_v31 = vld [vmem:[%s3310_s4 + $0x98] sm:$0xff]  ;;  %v574_v32 = vld [vmem:[%s566_s14 + $0x10] sm:$0xf]  ;;  %v2073_v33 = vpack.c.bf16 %v703_v29, %v701_v28 }
  0xdb   : > { %1908 = vmatprep.mubr.msk.f32.mxu0 %vm2550_vm0, %v2551_v4  ;;  %v2075_v34 = vpack.c.bf16 %v708_v31, %v706_v30  ;;  %v705_v35 = vld [vmem:[%s3310_s4 + $0x80] sm:$0xff]  ;;  %v707_v36 = vld [vmem:[%s3310_s4 + $0x90] sm:$0xff]  ;;  %v710_v37 = vld [vmem:[%s3310_s4 + $0xa8] sm:$0xff] }
  0xdc   : > { %2066 = vmatpush1.bf16.msra.mxu1 %v2065_v18  ;;  %v712_v38 = vld [vmem:[%s3310_s4 + $0xb8] sm:$0xff]  ;;  %v2077_v39 = vpack.c.bf16 %v707_v36, %v705_v35  ;;  %v709_v41 = vld [vmem:[%s3310_s4 + $0xa0] sm:$0xff]  ;;  %v711_v42 = vld [vmem:[%s3310_s4 + $0xb0] sm:$0xff]  ;;  %v724_v18 = vshrl.u32 %v723_v17, 7 }
  0xdd   : > { %2068 = vmatprep.subr.bf16.mxu1 %v2067_v19  ;;  %v2079_v40 = vpack.c.bf16 %v712_v38, %v710_v37  ;;  %v2081_v43 = vpack.c.bf16 %v711_v42, %v709_v41  ;;  %v714_v44 = vld [vmem:[%s3310_s4 + $0xc8] sm:$0xff]  ;;  %v716_v45 = vld [vmem:[%s3310_s4 + $0xd8] sm:$0xff]  ;;  %v713_v47 = vld [vmem:[%s3310_s4 + $0xc0] sm:$0xff] }
  0xde   : > { %1909 = vmatmul.mubr.msk.f32.gmra.mrb[2].mxu0 %vm584_vm1, %v573_v25  ;;  %v2083_v46 = vpack.c.bf16 %v716_v45, %v714_v44  ;;  %v715_v48 = vld [vmem:[%s3310_s4 + $0xd0] sm:$0xff]  ;;  %v718_v50 = vld [vmem:[%s3310_s4 + $0xe8] sm:$0xff]  ;;  %v720_v51 = vld [vmem:[%s3310_s4 + $0xf8] sm:$0xff]  ;;  %v729_v19 = vsub.s32 1, %v724_v18  ;;  %v725_v21 = vsub.s32 0, %v724_v18 }
  0xdf   : > { %1911 = vmatprep.mubr.msk.f32.mxu0 %vm2550_vm0, %v2551_v4  ;;  %v2085_v49 = vpack.c.bf16 %v715_v48, %v713_v47  ;;  %v2087_v52 = vpack.c.bf16 %v720_v51, %v718_v50  ;;  %v717_v53 = vld [vmem:[%s3310_s4 + $0xe0] sm:$0xff]  ;;  %v719_v54 = vld [vmem:[%s3310_s4 + $0xf0] sm:$0xff]  ;;  %v721_v20 = vld [vmem:[#allocation8] sm:$0x3] }
  0xe0   : > { %2070 = vmatpush1.bf16.msra.mxu1 %v2069_v26  ;;  %v2089_v55 = vpack.c.bf16 %v719_v54, %v717_v53  ;;  %v1760_v56 = vld [vmem:[#allocation5] ss:$0 sm:$0xff]  ;;  %v683_v61 = vld [vmem:[#allocation7] sm:$0xff]  ;;  %v684_v6 = vld [vmem:[#allocation7 + $0x8] sm:$0xff]  ;;  %v730_v22 = vrot.slane %v721_v20, %v729_v19  ;;  %v726_v24 = vrot.slane %v721_v20, %v725_v21 }
  0xe1   : > { %2072 = vmatprep.subr.bf16.mxu1 %v2071_v27  ;;  %v685_v14 = vld [vmem:[#allocation7 + $0x10] sm:$0xf]  ;;  %vm2997_vm7 = vmpackc.low %vm816_vm6, %vm816_vm6  ;;  %v1239_v19 = vld [vmem:[%s3314_s8 + $0x10] sm:$0xff] }
  0xe2   : > { %1912 = vmatmul.mubr.msk.f32.gmra.mrb[4].mxu0 %vm584_vm1, %v574_v32  ;;  %v926_v53 = vld [vmem:[%s3313_s7] sm:$0xff]  ;;  %v1240_v20 = vld [vmem:[%s3314_s8 + $0x18] sm:$0xff] }
  0xe3   : > { %1935 = vmatprep.mubr.msk.f32.mxu0 %vm2550_vm0, %v2551_v4  ;;  %v1257_v21 = vld [vmem:[%s3314_s8 + $0xa0] sm:$0xff]  ;;  %v1244_v32 = vld [vmem:[%s3314_s8 + $0x38] sm:$0xff] }
  0xe4   : > { %2074 = vmatpush1.bf16.msra.mxu1 %v2073_v33 }
  0xe5   : > { %2076 = vmatprep.subr.bf16.mxu1 %v2075_v34 }
  0xe8   : > { %2078 = vmatpush1.bf16.msra.mxu1 %v2077_v39 }
  0xe9   : > { %2080 = vmatprep.subr.bf16.mxu1 %v2079_v40 }
  0xec   : > { %2082 = vmatpush1.bf16.msra.mxu1 %v2081_v43 }
  0xed   : > { %2084 = vmatprep.subr.bf16.mxu1 %v2083_v46 }
  0xf0   : > { %2086 = vmatpush1.bf16.msra.mxu1 %v2085_v49  ;;  %v922_v49 = vstv %s921_s15  ;;  %s3346_s15 = sld [smem:[#allocation23_spill]] }
  0xf1   : > { %2088 = vmatprep.subr.bf16.mxu1 %v2087_v52 }
  0xf4   : > { %2090 = vmatpush1.bf16.msra.mxu1 %v2089_v55 }
  0xf5   : > { %2091 = vmatprep.subr.bf16.mxu1 %v2549_v2 }
  0xf6   : > { %s571_s28 = scalar_lea.vmem %s3346_s15, %s2185_s22 }
 0x1ad   : > { %v660_v57 = vpop.f32.mrb[0].mxu0 }
 0x1ae   : > { %v661_v58 = vadd.f32 %v1760_v56, %v660_v57  ;;  %v1907_v59 = vpop.f32.mrb[1].mxu0 }
 0x1b0   : > { %vm674_vm2 = vcmp.ge.f32.partialorder %v661_v58, 0.0  ;;  %v677_v60 = vmul.f32 0.1, %v661_v58 }
 0x1b1   : > { %v665_v62 = vpop.f32.mrb[2].mxu0 }
 0x1b2   : > { %v2976_v63 = vsel %vm674_vm2, %v661_v58, %v677_v60  ;;  %v666_v0 = vadd.f32 %v1760_v56, %v665_v62  ;;  %v1910_v1 = vpop.f32.mrb[3].mxu0  ;;  %v927_v58 = vld [vmem:[%s3313_s7 + $0x8] sm:$0xff]  ;;  %v928_v62 = vld [vmem:[%s3313_s7 + $0x10] sm:$0xf] }
 0x1b3   : > { %v686_v3 = vadd.f32 %v683_v61, %v2976_v63 }
 0x1b4   : > { %vm675_vm3 = vcmp.ge.f32.partialorder %v666_v0, 0.0  ;;  %v678_v5 = vmul.f32 0.1, %v666_v0 }
 0x1b5   : > { %798 = vmatmul.mubr.f32.vlgmr.msra.gmra.mrb[0].mxu1 %v686_v3  ;;  %v670_v7 = vpop.f32.mrb[4].mxu0 }
 0x1b6   : > { %v2979_v8 = vsel %vm675_vm3, %v666_v0, %v678_v5  ;;  %v671_v9 = vadd.f32 %v1760_v56, %v670_v7  ;;  %803 = vmatprep.mubr.f32.mxu1 %v2551_v4  ;;  %v1913_v10 = vpop.f32.mrb[5].mxu0 }
 0x1b7   : > { %v687_v11 = vadd.f32 %v684_v6, %v2979_v8  ;;  %v2096_v12 = vpack.c.bf16 %v2979_v8, %v2976_v63  ;;  %v1254_v10 = vld [vmem:[%s3314_s8 + $0x88] sm:$0xff] }
 0x1b8   : > { %vm676_vm4 = vcmp.ge.f32.partialorder %v671_v9, 0.0  ;;  %v679_v13 = vmul.f32 0.1, %v671_v9 }
 0x1b9   : > { %804 = vmatmul.mubr.f32.gmra.mrb[2].mxu1 %v687_v11  ;;  %2097 = vmatpush3.bf16.msra.mxu0 %v2096_v12  ;;  %v1237_v11 = vld [vmem:[%s3314_s8] sm:$0xff] }
 0x1ba   : > { %v2985_v15 = vsel %vm676_vm4, %v671_v9, %v679_v13  ;;  %809 = vmatprep.mubr.f32.mxu1 %v2551_v4  ;;  %1933 = vmatprep.subr.mxu0 %v2551_v4  ;;  %v1253_v9 = vld [vmem:[%s3314_s8 + $0x80] sm:$0xff]  ;;  %v1238_v13 = vld [vmem:[%s3314_s8 + $0x8] sm:$0xff] }
 0x1bb   : > { %v688_v16 = vadd.f32 %v685_v14, %v2985_v15  ;;  %v1255_v14 = vld [vmem:[%s3314_s8 + $0x90] sm:$0xff]  ;;  %v2107_v17 = vpack.c.bf16 %v1238_v13, %v1237_v11  ;;  %v1137_v13 = vstv %s1780_s25 }
 0x1bd   : > { %810 = vmatmul.mubr.f32.gmra.mrb[4].mxu1 %v688_v16  ;;  %1934 = vmatpush3.msk.msra.mxu0 %vm942_vm5, %v2985_v15  ;;  %v1256_v16 = vld [vmem:[%s3314_s8 + $0x98] sm:$0xff] }
 0x1be   : > { %1920 = vmatprep.mubr.msk.f32.mxu1 %vm2550_vm0, %v2551_v4  ;;  %2098 = vmatprep.subr.bf16.mxu0 %v2549_v2  ;;  %v2109_v18 = vpack.c.bf16 %v1256_v16, %v1255_v14  ;;  %v1781_v16 = vld [vmem:[%s3313_s7 + $0x18] sm:$0xff] }
 0x288   : > { %v799_v23 = vpop.f32.mrb[0].mxu1 }
 0x289   : > { %v801_v25 = vpop.f32.mrb[1].mxu1  ;;  %v800_v28 = vadd.f32 %v799_v23, %v726_v24  ;;  %v2111_v23 = vpack.c.bf16 %v1240_v20, %v1239_v19  ;;  %v1782_v20 = vld [vmem:[%s3313_s7 + $0x20] sm:$0xff] }
 0x28a   : > { %v802_v26 = vadd.f32 %v801_v25, %v730_v22  ;;  %v1241_v25 = vld [vmem:[%s3314_s8 + $0x20] sm:$0xff] }
 0x28c   : > { %1026 = vrot.lane.b32.xlu1 %v802_v26, %s2552_s29  ;;  %v805_v27 = vpop.f32.mrb[2].mxu1 }
 0x28d   : > { %v806_v29 = vadd.f32 %v805_v27, %v726_v24  ;;  %v807_v30 = vpop.f32.mrb[3].mxu1  ;;  %v1259_v27 = vld [vmem:[%s3314_s8 + $0xb0] sm:$0xff] }
 0x28e   : > { %v808_v31 = vadd.f32 %v807_v30, %v730_v22 }
 0x28f   : > { %v2092_v33 = vpack.c.bf16 %v806_v29, %v800_v28  ;;  %v2281_v34 = vpack.i.bf16 %v806_v29, %v800_v28  ;;  %v1260_v28 = vld [vmem:[%s3314_s8 + $0xb8] sm:$0xff] }
 0x290   : > { %1028 = vrot.lane.b32.xlu1 %v808_v31, %s2552_s29  ;;  %v811_v35 = vpop.f32.mrb[4].mxu1  ;;  %v2117_v30 = vpack.c.bf16 %v1260_v28, %v1259_v27  ;;  %v1368_v27 = vld [vmem:[%s3316_s10] sm:$0xff]  ;;  %v1369_v28 = vld [vmem:[%s3316_s10 + $0x8] sm:$0xff] }
 0x291   : > { %2282 = vrot.lane.b32.xlu0 %v2281_v34, %s2552_s29  ;;  %2094 = vmatpush3.bf16.xpose.msk.msra.mxu1 %vm2997_vm7, %v2092_v33  ;;  %v812_v36 = vadd.f32 %v811_v35, %v726_v24  ;;  %v813_v37 = vpop.f32.mrb[5].mxu1  ;;  %v1261_v33 = vld [vmem:[%s3314_s8 + $0xc0] sm:$0xff]  ;;  %v1262_v34 = vld [vmem:[%s3314_s8 + $0xc8] sm:$0xff] }
 0x292   : > { %1918 = vmatprep.subr.mxu1 %v2551_v4  ;;  %v814_v38 = vadd.f32 %v813_v37, %v730_v22  ;;  %v1258_v22 = vld [vmem:[%s3314_s8 + $0xa8] sm:$0xff]  ;;  %v1245_v37 = vld [vmem:[%s3314_s8 + $0x40] sm:$0xff] }
 0x293   : > { %v2113_v24 = vpack.c.bf16 %v1258_v22, %v1257_v21 }
 0x295   : > { %1036 = vrot.lane.b32.xlu0 %v812_v36, %s2552_s29 }
 0x299   : > { %1030 = vrot.lane.b32.xlu0 %v814_v38, %s2552_s29  ;;  %1919 = vmatpush3.xpose.msk.msra.mxu1 %vm816_vm6, %v812_v36  ;;  %v2121_v36 = vpack.c.bf16 %v1262_v34, %v1261_v33  ;;  %v1372_v33 = vld [vmem:[%s3316_s10 + $0x20] sm:$0xff]  ;;  %v1373_v34 = vld [vmem:[%s3316_s10 + $0x28] sm:$0xff] }
 0x29a   : > { %2102 = vmatprep.subr.bf16.mxu1 %v2549_v2 }
 0x29c   : > { %1921 = vmatmul.mubr.msk.f32.vlgmr.msra.gmra.mrb[6].mxu1 %vm816_vm6, %v802_v26  ;;  %v1242_v26 = vld [vmem:[%s3314_s8 + $0x28] sm:$0xff] }
 0x29d   : > { %2104 = vmatpush3.bf16.msra.mxu1 %v2096_v12  ;;  %1923 = vmatprep.mubr.msk.f32.mxu1 %vm2550_vm0, %v2551_v4  ;;  %v2105_v12 = vpack.c.bf16 %v1254_v10, %v1253_v9  ;;  %v2115_v29 = vpack.c.bf16 %v1242_v26, %v1241_v25 }
 0x29e   : > { %1963 = vmatprep.subr.mxu1 %v2551_v4 }
 0x2a0   : > { %1924 = vmatmul.mubr.msk.f32.gmra.mrb[8].mxu1 %vm816_vm6, %v808_v31  ;;  %v1243_v31 = vld [vmem:[%s3314_s8 + $0x30] sm:$0xff] }
 0x2a1   : > { %1964 = vmatpush3.msk.msra.mxu1 %vm942_vm5, %v2985_v15  ;;  %1926 = vmatprep.mubr.msk.f32.mxu1 %vm2550_vm0, %v2551_v4  ;;  %v2119_v35 = vpack.c.bf16 %v1244_v32, %v1243_v31  ;;  %v1371_v31 = vld [vmem:[%s3316_s10 + $0x18] sm:$0xff] }
 0x2a2   : > { %2137 = vmatprep.subr.bf16.mxu1 %v2549_v2 }
 0x2a4   : > { %1927 = vmatmul.mubr.msk.f32.gmra.mrb[10].mxu1 %vm816_vm6, %v814_v38  ;;  %v1246_v38 = vld [vmem:[%s3314_s8 + $0x48] sm:$0xff] }
 0x2a5   : > { %1965 = vmatprep.mubr.msk.f32.mxu1 %vm2550_vm0, %v2551_v4 }
 0x2fe   : > { %v1027_v5 = vpop.permute.xlu1 %1026 }
 0x302   : > { %v1029_v6 = vpop.permute.xlu1 %1028 }
 0x303   : > { %v2283_v48 = vpop.permute.xlu0 %2282 }
 0x304   : > { %v2285_v51 = vunpack.i.h.bf16 %v2283_v48  ;;  %v2284_v52 = vunpack.i.l.bf16 %v2283_v48 }
 0x306   : > { %v2099_v57 = vpack.c.bf16 %v2285_v51, %v2284_v52  ;;  %v1267_v51 = vld [vmem:[%s3314_s8 + $0xf0] sm:$0xff]  ;;  %v1268_v52 = vld [vmem:[%s3314_s8 + $0xf8] sm:$0xff] }
 0x307   : > { %v1037_v3 = vpop.permute.xlu0 %1036 }
 0x30b   : > { %v1031_v7 = vpop.permute.xlu0 %1030 }
 0x36f   : > { %v901_v39 = vpop.f32.mrb[6].mxu1 }
 0x370   : > { %v915_v40 = vmul.f32 0.015625, %v901_v39  ;;  %v1922_v41 = vpop.f32.mrb[7].mxu1  ;;  %v1263_v39 = vld [vmem:[%s3314_s8 + $0xd0] sm:$0xff] }
 0x371   : > { %v2123_v41 = vpack.c.bf16 %v1246_v38, %v1245_v37  ;;  %v1375_v37 = vld [vmem:[%s3316_s10 + $0x38] sm:$0xff] }
 0x372   : > { %2286 = vtanh.f32 %v915_v40  ;;  %v1264_v40 = vld [vmem:[%s3314_s8 + $0xd8] sm:$0xff] }
 0x373   : > { %v906_v42 = vpop.f32.mrb[8].mxu1 }
 0x374   : > { %v916_v43 = vmul.f32 0.015625, %v906_v42  ;;  %v1925_v44 = vpop.f32.mrb[9].mxu1  ;;  %v2125_v42 = vpack.c.bf16 %v1264_v40, %v1263_v39  ;;  %v1376_v39 = vld [vmem:[%s3316_s10 + $0x40] sm:$0xff]  ;;  %v1377_v40 = vld [vmem:[%s3316_s10 + $0x48] sm:$0xff] }
 0x375   : > { %v1248_v44 = vld [vmem:[%s3314_s8 + $0x58] sm:$0xff] }
 0x376   : > { %2288 = vtanh.f32 %v916_v43  ;;  %v1247_v43 = vld [vmem:[%s3314_s8 + $0x50] sm:$0xff] }
 0x377   : > { %v911_v45 = vpop.f32.mrb[10].mxu1 }
 0x378   : > { %v917_v46 = vmul.f32 0.015625, %v911_v45  ;;  %v1928_v47 = vpop.f32.mrb[11].mxu1  ;;  %v1265_v45 = vld [vmem:[%s3314_s8 + $0xe0] sm:$0xff] }
 0x379   : > { %v2127_v47 = vpack.c.bf16 %v1248_v44, %v1247_v43 }
 0x37a   : > { %2290 = vtanh.f32 %v917_v46  ;;  %v1266_v46 = vld [vmem:[%s3314_s8 + $0xe8] sm:$0xff] }
 0x37b   : > { %v2129_v48 = vpack.c.bf16 %v1266_v46, %v1265_v45 }
 0x37c   : > { %v2287_v50 = vpop.eup %2286 }
 0x37d   : > { %v923_v54 = vmul.f32 %v2287_v50, %v922_v49  ;;  %v1250_v50 = vld [vmem:[%s3314_s8 + $0x68] sm:$0xff] }
 0x37f   : > { %v929_v55 = vadd.f32 %v926_v53, %v923_v54  ;;  %v2133_v54 = vpack.c.bf16 %v1268_v52, %v1267_v51  ;;  %v1380_v51 = vld [vmem:[%s3316_s10 + $0x60] sm:$0xff]  ;;  %v1381_v52 = vld [vmem:[%s3316_s10 + $0x68] sm:$0xff] }
 0x380   : > { %v2289_v56 = vpop.eup %2288 }
 0x381   : > { %1936 = vmatmul.mubr.msk.f32.vlgmr.msra.gmra.mrb[6].mxu0 %vm932_vm8, %v929_v55  ;;  %v924_v59 = vmul.f32 %v2289_v56, %v922_v49  ;;  %v1251_v55 = vld [vmem:[%s3314_s8 + $0x70] sm:$0xff]  ;;  %v1252_v56 = vld [vmem:[%s3314_s8 + $0x78] sm:$0xff] }
 0x382   : > { %2101 = vmatpush3.bf16.xpose.msk.msra.mxu0 %vm2997_vm7, %v2099_v57  ;;  %1938 = vmatprep.mubr.msk.f32.mxu0 %vm2550_vm0, %v2551_v4  ;;  %v2135_v57 = vpack.c.bf16 %v1252_v56, %v1251_v55  ;;  %v1383_v55 = vld [vmem:[%s3316_s10 + $0x78] sm:$0xff] }
 0x383   : > { %v930_v60 = vadd.f32 %v927_v58, %v924_v59  ;;  %1948 = vmatprep.subr.mxu0 %v2551_v4 }
 0x384   : > { %v2291_v61 = vpop.eup %2290 }
 0x385   : > { %1939 = vmatmul.mubr.msk.f32.gmra.mrb[8].mxu0 %vm932_vm8, %v930_v60  ;;  %v925_v0 = vmul.f32 %v2291_v61, %v922_v49  ;;  %v1249_v49 = vld [vmem:[%s3314_s8 + $0x60] sm:$0xff] }
 0x386   : > { %1941 = vmatprep.mubr.msk.f32.mxu0 %vm2550_vm0, %v2551_v4  ;;  %v2131_v53 = vpack.c.bf16 %v1250_v50, %v1249_v49  ;;  %v1379_v49 = vld [vmem:[%s3316_s10 + $0x58] sm:$0xff] }
 0x387   : > { %v931_v1 = vadd.f32 %v928_v62, %v925_v0 }
 0x389   : > { %1942 = vmatmul.mubr.msk.f32.gmra.mrb[10].mxu0 %vm932_vm8, %v931_v1 }
 0x38a   : > { %1949 = vmatpush3.xpose.msk.msra.mxu0 %vm816_vm6, %v1037_v3  ;;  %1950 = vmatprep.mubr.msk.f32.mxu0 %vm2550_vm0, %v2551_v4 }
 0x38b   : > { %2106 = vmatprep.subr.bf16.mxu0 %v2105_v12 }
 0x38d   : > { %1951 = vmatmul.mubr.msk.f32.vlgmr.msra.gmra.mrb[12].mxu0 %vm816_vm6, %v1027_v5 }
 0x38e   : > { %1953 = vmatprep.mubr.msk.f32.mxu0 %vm2550_vm0, %v2551_v4  ;;  %2108 = vmatpush3.bf16.msra.mxu0 %v2107_v17 }
 0x38f   : > { %2110 = vmatprep.subr.bf16.mxu0 %v2109_v18 }
 0x391   : > { %1954 = vmatmul.mubr.msk.f32.gmra.mrb[14].mxu0 %vm816_vm6, %v1029_v6 }
 0x392   : > { %1956 = vmatprep.mubr.msk.f32.mxu0 %vm2550_vm0, %v2551_v4  ;;  %2112 = vmatpush3.bf16.msra.mxu0 %v2111_v23 }
 0x393   : > { %2114 = vmatprep.subr.bf16.mxu0 %v2113_v24  ;;  %v1783_v24 = vld [vmem:[%s3313_s7 + $0x28] sm:$0xf] }
 0x395   : > { %1957 = vmatmul.mubr.msk.f32.gmra.mrb[16].mxu0 %vm816_vm6, %v1031_v7 }
 0x396   : > { %2116 = vmatpush3.bf16.msra.mxu0 %v2115_v29  ;;  %v1370_v29 = vld [vmem:[%s3316_s10 + $0x10] sm:$0xff] }
 0x397   : > { %2118 = vmatprep.subr.bf16.mxu0 %v2117_v30  ;;  %v2138_v30 = vpack.c.bf16 %v1369_v28, %v1368_v27  ;;  %v2141_v32 = vpack.c.bf16 %v1371_v31, %v1370_v29 }
 0x39a   : > { %2120 = vmatpush3.bf16.msra.mxu0 %v2119_v35  ;;  %v2144_v35 = vpack.c.bf16 %v1373_v34, %v1372_v33 }
 0x39b   : > { %2122 = vmatprep.subr.bf16.mxu0 %v2121_v36  ;;  %v1374_v36 = vld [vmem:[%s3316_s10 + $0x30] sm:$0xff] }
 0x39c   : > { %v2147_v38 = vpack.c.bf16 %v1375_v37, %v1374_v36 }
 0x39e   : > { %2124 = vmatpush3.bf16.msra.mxu0 %v2123_v41  ;;  %v2150_v41 = vpack.c.bf16 %v1377_v40, %v1376_v39  ;;  %v1496_v39 = vld [vmem:[%s3318_s12 + $0x68] sm:$0xff] }
 0x39f   : > { %2126 = vmatprep.subr.bf16.mxu0 %v2125_v42 }
 0x3a2   : > { %2128 = vmatpush3.bf16.msra.mxu0 %v2127_v47 }
 0x3a3   : > { %2130 = vmatprep.subr.bf16.mxu0 %v2129_v48  ;;  %v1378_v48 = vld [vmem:[%s3316_s10 + $0x50] sm:$0xff] }
 0x3a4   : > { %v2153_v50 = vpack.c.bf16 %v1379_v49, %v1378_v48 }
 0x3a6   : > { %2132 = vmatpush3.bf16.msra.mxu0 %v2131_v53  ;;  %v2156_v53 = vpack.c.bf16 %v1381_v52, %v1380_v51 }
 0x3a7   : > { %2134 = vmatprep.subr.bf16.mxu0 %v2133_v54  ;;  %v1382_v54 = vld [vmem:[%s3316_s10 + $0x70] sm:$0xff] }
 0x3a8   : > { %v2159_v56 = vpack.c.bf16 %v1383_v55, %v1382_v54 }
 0x3aa   : > { %2136 = vmatpush3.bf16.msra.mxu0 %v2135_v57  ;;  %v1483_v57 = vld [vmem:[%s3318_s12] sm:$0xff] }
 0x3ab   : > { %2161 = vmatprep.subr.bf16.mxu0 %v2549_v2 }
 0x454   : > { %v3145_v58 = vpop.f32.mrb[6].mxu0 }
 0x455   : > { %v1937_v59 = vpop.f32.mrb[7].mxu0 }
 0x456   : > { %v1485_v59 = vld [vmem:[%s3318_s12 + $0x10] sm:$0xff] }
 0x458   : > { %v3147_v60 = vpop.f32.mrb[8].mxu0 }
 0x459   : > { %v1940_v61 = vpop.f32.mrb[9].mxu0 }
 0x45a   : > { %v1486_v61 = vld [vmem:[%s3318_s12 + $0x18] sm:$0xff] }
 0x45c   : > { %v3149_v62 = vpop.f32.mrb[10].mxu0 }
 0x45d   : > { %v1943_v0 = vpop.f32.mrb[11].mxu0 }
 0x45e   : > { %v1487_v0 = vld [vmem:[%s3318_s12 + $0x20] sm:$0xff] }
 0x460   : > { %v1116_v1 = vpop.f32.mrb[12].mxu0 }
 0x461   : > { %v1130_v3 = vmul.f32 0.015625, %v1116_v1  ;;  %v1952_v5 = vpop.f32.mrb[13].mxu0  ;;  %v1488_v1 = vld [vmem:[%s3318_s12 + $0x28] sm:$0xff] }
 0x462   : > { %v1489_v5 = vld [vmem:[%s3318_s12 + $0x30] sm:$0xff] }
 0x463   : > { %2292 = vtanh.f32 %v1130_v3  ;;  %v2168_v3 = vpack.c.bf16 %v1488_v1, %v1487_v0 }
 0x464   : > { %v1121_v6 = vpop.f32.mrb[14].mxu0 }
 0x465   : > { %v1131_v7 = vmul.f32 0.015625, %v1121_v6  ;;  %v1955_v9 = vpop.f32.mrb[15].mxu0  ;;  %v1490_v6 = vld [vmem:[%s3318_s12 + $0x38] sm:$0xff] }
 0x466   : > { %v1491_v9 = vld [vmem:[%s3318_s12 + $0x40] sm:$0xff] }
 0x467   : > { %2294 = vtanh.f32 %v1131_v7  ;;  %v2171_v7 = vpack.c.bf16 %v1490_v6, %v1489_v5 }
 0x468   : > { %v1126_v10 = vpop.f32.mrb[16].mxu0 }
 0x469   : > { %v1132_v11 = vmul.f32 0.015625, %v1126_v10  ;;  %v1958_v12 = vpop.f32.mrb[17].mxu0  ;;  %v1492_v10 = vld [vmem:[%s3318_s12 + $0x48] sm:$0xff] }
 0x46a   : > { %v1493_v12 = vld [vmem:[%s3318_s12 + $0x50] sm:$0xff] }
 0x46b   : > { %2296 = vtanh.f32 %v1132_v11  ;;  %v2174_v11 = vpack.c.bf16 %v1492_v10, %v1491_v9 }
 0x46d   : > { %v2293_v14 = vpop.eup %2292 }
 0x46e   : > { %v1138_v17 = vmul.f32 %v2293_v14, %v1137_v13 }
 0x470   : > { %v1145_v18 = vadd.f32 %v1781_v16, %v1138_v17  ;;  %v1788_v17 = vld [vmem:[#allocation11] ss:$0 sm:$0xff] }
 0x471   : > { %v2295_v19 = vpop.eup %2294 }
 0x472   : > { %1966 = vmatmul.mubr.msk.f32.vlgmr.msra.gmra.mrb[12].mxu1 %vm932_vm8, %v1145_v18  ;;  %v1139_v21 = vmul.f32 %v2295_v19, %v1137_v13 }
 0x473   : > { %1968 = vmatprep.mubr.msk.f32.mxu1 %vm2550_vm0, %v2551_v4  ;;  %2139 = vmatpush3.bf16.msra.mxu1 %v2138_v30 }
 0x474   : > { %v1146_v22 = vadd.f32 %v1782_v20, %v1139_v21  ;;  %2140 = vmatprep.subr.bf16.mxu1 %v2549_v2 }
 0x475   : > { %v2297_v23 = vpop.eup %2296 }
 0x476   : > { %1969 = vmatmul.mubr.msk.f32.gmra.mrb[14].mxu1 %vm932_vm8, %v1146_v22  ;;  %v1140_v25 = vmul.f32 %v2297_v23, %v1137_v13  ;;  %v1494_v13 = vld [vmem:[%s3318_s12 + $0x58] sm:$0xff] }
 0x477   : > { %1971 = vmatprep.mubr.msk.f32.mxu1 %vm2550_vm0, %v2551_v4  ;;  %2142 = vmatpush3.bf16.msra.mxu1 %v2141_v32  ;;  %v2177_v14 = vpack.c.bf16 %v1494_v13, %v1493_v12 }
 0x478   : > { %v1147_v26 = vadd.f32 %v1783_v24, %v1140_v25  ;;  %2143 = vmatprep.subr.bf16.mxu1 %v2549_v2 }
 0x47a   : > { %1972 = vmatmul.mubr.msk.f32.gmra.mrb[16].mxu1 %vm932_vm8, %v1147_v26 }
 0x47b   : > { %2006 = vmatprep.mubr.msk.f32.mxu1 %vm2550_vm0, %v2551_v4  ;;  %2145 = vmatpush3.bf16.msra.mxu1 %v2144_v35 }
 0x47c   : > { %2146 = vmatprep.subr.bf16.mxu1 %v2549_v2 }
 0x47f   : > { %2148 = vmatpush3.bf16.msra.mxu1 %v2147_v38  ;;  %v1495_v38 = vld [vmem:[%s3318_s12 + $0x60] sm:$0xff] }
 0x480   : > { %2149 = vmatprep.subr.bf16.mxu1 %v2549_v2  ;;  %v2180_v40 = vpack.c.bf16 %v1496_v39, %v1495_v38 }
 0x483   : > { %2151 = vmatpush3.bf16.msra.mxu1 %v2150_v41  ;;  %v1497_v41 = vld [vmem:[%s3318_s12 + $0x70] sm:$0xff] }
 0x484   : > { %2152 = vmatprep.subr.bf16.mxu1 %v2549_v2 }
 0x487   : > { %2154 = vmatpush3.bf16.msra.mxu1 %v2153_v50 }
 0x488   : > { %2155 = vmatprep.subr.bf16.mxu1 %v2549_v2 }
 0x48b   : > { %2157 = vmatpush3.bf16.msra.mxu1 %v2156_v53 }
 0x48c   : > { %2158 = vmatprep.subr.bf16.mxu1 %v2549_v2 }
 0x48f   : > { %2160 = vmatpush3.bf16.msra.mxu1 %v2159_v56 }
 0x545   : > { %v1223_v42 = vpop.f32.mrb[12].mxu1 }
 0x546   : > { %v1967_v43 = vpop.f32.mrb[13].mxu1  ;;  %1340 = vmatprep.mubr.f32.mxu0 %v1223_v42  ;;  %v1498_v42 = vld [vmem:[%s3318_s12 + $0x78] sm:$0xff] }
 0x547   : > { %1341 = vmatmul.mubr.f32.vlgmr.msra.gmra.mrb[18].mxu0 %v3145_v58  ;;  %v1484_v58 = vld [vmem:[%s3318_s12 + $0x8] sm:$0xff]  ;;  %v2183_v43 = vpack.c.bf16 %v1498_v42, %v1497_v41 }
 0x549   : > { %v1228_v44 = vpop.f32.mrb[14].mxu1 }
 0x54a   : > { %v1970_v45 = vpop.f32.mrb[15].mxu1  ;;  %1345 = vmatprep.mubr.f32.mxu0 %v1228_v44  ;;  %v1789_v44 = vld [vmem:[#allocation12] ss:$0 sm:$0xff] }
 0x54b   : > { %1346 = vmatmul.mubr.f32.gmra.mrb[20].mxu0 %v3147_v60  ;;  %v2162_v60 = vpack.c.bf16 %v1484_v58, %v1483_v57 }
 0x54d   : > { %v1233_v46 = vpop.f32.mrb[16].mxu1  ;;  %2163 = vmatpush3.bf16.msra.mxu0 %v2162_v60  ;;  %v1790_v60 = vld [vmem:[#allocation14] ss:$0 sm:$0xff] }
 0x54e   : > { %v1973_v47 = vpop.f32.mrb[17].mxu1  ;;  %1350 = vmatprep.mubr.f32.mxu0 %v1233_v46  ;;  %2164 = vmatprep.subr.bf16.mxu0 %v2549_v2 }
 0x54f   : > { %1351 = vmatmul.mubr.f32.gmra.mrb[22].mxu0 %v3149_v62  ;;  %v2165_v62 = vpack.c.bf16 %v1486_v61, %v1485_v59 }
 0x550   : > { %2047 = vmatprep.mubr.msk.f32.mxu0 %vm2550_vm0, %v2551_v4 }
 0x551   : > { %2166 = vmatpush3.bf16.msra.mxu0 %v2165_v62 }
 0x552   : > { %2167 = vmatprep.subr.bf16.mxu0 %v2549_v2 }
 0x555   : > { %2169 = vmatpush3.bf16.msra.mxu0 %v2168_v3 }
 0x556   : > { %2170 = vmatprep.subr.bf16.mxu0 %v2549_v2 }
 0x559   : > { %2172 = vmatpush3.bf16.msra.mxu0 %v2171_v7 }
 0x55a   : > { %2173 = vmatprep.subr.bf16.mxu0 %v2549_v2 }
 0x55d   : > { %2175 = vmatpush3.bf16.msra.mxu0 %v2174_v11 }
 0x55e   : > { %2176 = vmatprep.subr.bf16.mxu0 %v2549_v2 }
 0x561   : > { %2178 = vmatpush3.bf16.msra.mxu0 %v2177_v14 }
 0x562   : > { %2179 = vmatprep.subr.bf16.mxu0 %v2549_v2 }
 0x565   : > { %2181 = vmatpush3.bf16.msra.mxu0 %v2180_v40 }
 0x566   : > { %2182 = vmatprep.subr.bf16.mxu0 %v2549_v2 }
 0x569   : > { %2184 = vmatpush3.bf16.msra.mxu0 %v2183_v43 }
 0x61a   : > { %v1854_v16 = vpop.f32.mrb[18].mxu0 }
 0x61b   : > { %v1855_v18 = vpop.f32.mrb[19].mxu0 }
 0x61c   : > { %v1856_v19 = vadd.f32 %v1855_v18, %v1854_v16 }
 0x61e   : > { %v1343_v20 = vadd.f32 %v1856_v19, %v1788_v17  ;;  %v1857_v21 = vpop.f32.mrb[20].mxu0 }
 0x61f   : > { %v1858_v22 = vpop.f32.mrb[21].mxu0 }
 0x620   : > { %v1356_v23 = vadd.f32 %v1343_v20, %v2976_v63  ;;  %v1859_v24 = vadd.f32 %v1858_v22, %v1857_v21 }
 0x622   : > { %v1362_v25 = vmul.f32 0.1, %v1356_v23  ;;  %v1348_v26 = vadd.f32 %v1859_v24, %v1788_v17  ;;  %v1860_v27 = vpop.f32.mrb[22].mxu0  ;;  %vm1359_vm9 = vcmp.ge.f32.partialorder %v1356_v23, 0.0 }
 0x623   : > { %v1861_v28 = vpop.f32.mrb[23].mxu0 }
 0x624   : > { %v1357_v29 = vadd.f32 %v1348_v26, %v2979_v8  ;;  %v1862_v30 = vadd.f32 %v1861_v28, %v1860_v27  ;;  %v1365_v31 = vsel %vm1359_vm9, %v1356_v23, %v1362_v25 }
 0x625   : > { %2007 = vmatmul.mubr.f32.vlgmr.msra.gmra.mrb[18].mxu1 %v1365_v31 }
 0x626   : > { %v1353_v32 = vadd.f32 %v1862_v30, %v1788_v17  ;;  %2009 = vmatprep.mubr.msk.f32.mxu1 %vm2550_vm0, %v2551_v4  ;;  %vm1360_vm10 = vcmp.ge.f32.partialorder %v1357_v29, 0.0  ;;  %v1363_v33 = vmul.f32 0.1, %v1357_v29 }
 0x628   : > { %v1358_v34 = vadd.f32 %v1353_v32, %v2985_v15  ;;  %v1366_v35 = vsel %vm1360_vm10, %v1357_v29, %v1363_v33 }
 0x629   : > { %2010 = vmatmul.mubr.f32.gmra.mrb[20].mxu1 %v1366_v35 }
 0x62a   : > { %2012 = vmatprep.mubr.msk.f32.mxu1 %vm2550_vm0, %v2551_v4  ;;  %vm1361_vm11 = vcmp.ge.f32.partialorder %v1358_v34, 0.0  ;;  %v1364_v36 = vmul.f32 0.1, %v1358_v34 }
 0x62c   : > { %v1367_v37 = vsel %vm1361_vm11, %v1358_v34, %v1364_v36 }
 0x62d   : > { %2013 = vmatmul.mubr.f32.gmra.mrb[22].mxu1 %v1367_v37 }
 0x6f8   : > { %v1457_v45 = vpop.f32.mrb[18].mxu1 }
 0x6f9   : > { %v1458_v46 = vadd.f32 %v1789_v44, %v1457_v45  ;;  %v2008_v47 = vpop.f32.mrb[19].mxu1 }
 0x6fb   : > { %v1471_v48 = vadd.f32 %v1458_v46, %v2976_v63 }
 0x6fc   : > { %v1462_v49 = vpop.f32.mrb[20].mxu1 }
 0x6fd   : > { %vm1474_vm12 = vcmp.ge.f32.partialorder %v1471_v48, 0.0  ;;  %v1477_v50 = vmul.f32 0.1, %v1471_v48  ;;  %v1463_v2 = vadd.f32 %v1789_v44, %v1462_v49  ;;  %v2011_v51 = vpop.f32.mrb[21].mxu1 }
 0x6ff   : > { %v1472_v52 = vadd.f32 %v1463_v2, %v2979_v8  ;;  %v1480_v53 = vsel %vm1474_vm12, %v1471_v48, %v1477_v50 }
 0x700   : > { %v1467_v54 = vpop.f32.mrb[22].mxu1  ;;  %2048 = vmatmul.mubr.f32.vlgmr.msra.gmra.mrb[24].mxu0 %v1480_v53 }
 0x701   : > { %v1468_v55 = vadd.f32 %v1789_v44, %v1467_v54  ;;  %v2014_v56 = vpop.f32.mrb[23].mxu1  ;;  %2050 = vmatprep.mubr.msk.f32.mxu0 %vm2550_vm0, %v2551_v4  ;;  %vm1475_vm13 = vcmp.ge.f32.partialorder %v1472_v52, 0.0  ;;  %v1478_v57 = vmul.f32 0.1, %v1472_v52 }
 0x703   : > { %v1473_v63 = vadd.f32 %v1468_v55, %v2985_v15  ;;  %v1481_v58 = vsel %vm1475_vm13, %v1472_v52, %v1478_v57 }
 0x704   : > { %2051 = vmatmul.mubr.f32.gmra.mrb[26].mxu0 %v1481_v58 }
 0x705   : > { %2053 = vmatprep.mubr.msk.f32.mxu0 %vm2550_vm0, %v2551_v4  ;;  %vm1476_vm14 = vcmp.ge.f32.partialorder %v1473_v63, 0.0  ;;  %v1479_v8 = vmul.f32 0.1, %v1473_v63 }
 0x707   : > { %v1482_v59 = vsel %vm1476_vm14, %v1473_v63, %v1479_v8 }
 0x708   : > { %2054 = vmatmul.mubr.f32.gmra.mrb[28].mxu0 %v1482_v59 }
 0x7d3   : > { %v1572_v61 = vpop.f32.mrb[24].mxu0 }
 0x7d4   : > { %v1573_v62 = vadd.f32 %v1790_v60, %v1572_v61  ;;  %v2049_v0 = vpop.f32.mrb[25].mxu0 }
 0x7d6   : > { %v1586_v1 = vadd.f32 %v1573_v62, %v1480_v53 }
 0x7d7   : > { %v1577_v3 = vpop.f32.mrb[26].mxu0 }
 0x7d8   : > { %vm1589_vm15 = vcmp.ge.f32.partialorder %v1586_v1, 0.0  ;;  %v1592_v15 = vmul.f32 0.1, %v1586_v1  ;;  %v1578_v5 = vadd.f32 %v1790_v60, %v1577_v3  ;;  %v2052_v6 = vpop.f32.mrb[27].mxu0 }
 0x7da   : > { %v1595_v4 = vsel %vm1589_vm15, %v1586_v1, %v1592_v15  ;;  %v1587_v7 = vadd.f32 %v1578_v5, %v1481_v58 }
 0x7db   : > { %1598 = vst [vmem:[%s571_s28] sm:$0xff] %v1595_v4  ;;  %v1582_v9 = vpop.f32.mrb[28].mxu0 }
 0x7dc   : > { %vm1590_vm0 = vcmp.ge.f32.partialorder %v1587_v7, 0.0  ;;  %v1593_v10 = vmul.f32 0.1, %v1587_v7  ;;  %v1583_v11 = vadd.f32 %v1790_v60, %v1582_v9  ;;  %v2055_v12 = vpop.f32.mrb[29].mxu0 }
 0x7de   : > { %v1596_v13 = vsel %vm1590_vm0, %v1587_v7, %v1593_v10  ;;  %v1588_v14 = vadd.f32 %v1583_v11, %v1482_v59 }
 0x7df   : > { %1599 = vst [vmem:[%s571_s28 + $0x8] sm:$0xff] %v1596_v13 }
 0x7e0   : > { %vm1591_vm1 = vcmp.ge.f32.partialorder %v1588_v14, 0.0  ;;  %v1594_v16 = vmul.f32 0.1, %v1588_v14 }
 0x7e2   : > { %v1597_v17 = vsel %vm1591_vm1, %v1588_v14, %v1594_v16 }
 0x7e3   : > { %1600 = vst [vmem:[%s571_s28 + $0x10] sm:$0xf] %v1597_v17 }
 0x7e4 PF: > { %s3347_s16 = sld [smem:[#allocation21_spill]] }
 0x7ea   : > { %s29_s29 = sadd.s32 1, %s3347_s16  }
 0x7eb   : > { %p26_p8 = scmp.ge.s32.totalorder %s29_s29, 4  }
 0x7ed   :  { %28 = sbr.rel (!%p26_p8) target bundleno = 8 (0x8), region = 141 }
 0x7f4   :  { %1622 = vsyncpa [#allocation3], 1 }
 0x7f5   :  { %1624 = vsyncpa [#allocation3 + $0x1], 1 }
 0x7f6   :  { %1625 = vsyncpa [#allocation6], 1 }
 0x7f7   :  { %1626 = vsyncpa [#allocation9], 1 }
 0x7f8   :  { %1627 = vsyncpa [#allocation13], 1 }
 0x7f9   :  { %1628 = vsyncpa [#allocation4], 1 }
 0x7fa   :  { %1630 = vsyncpa [#allocation4 + $0x1], 1 }

// kernel: _lambda_.8
= control target key start
LH: loop header
LB: loop body
LE: loop exit
PB: predicated region body
PF: predicated region fallthrough
CT: control target
= control target key end

     0   :  { %19 = vsyncpa [#allocation3], 0  ;;  %s1827_s29 = smov 0   ;;  %s2245_s0 = inlined_call_operand.vmem [shape: f32[2,7,16], index: 0, kind: input, shape index: {}]   ;;  %s2246_s1 = inlined_call_operand.vmem [shape: f32[16,128], index: 1, kind: input, shape index: {}]   ;;  %s2247_s2 = inlined_call_operand.vmem [shape: f32[1,128], index: 2, kind: input, shape index: {}]   ;;  %s2248_s3 = inlined_call_operand.vmem [shape: f32[7,128], index: 3, kind: input, shape index: {}]   ;;  %s2249_s4 = inlined_call_operand.vmem [shape: f32[128,256], index: 4, kind: input, shape index: {}]   ;;  %s2250_s5 = inlined_call_operand.vmem [shape: f32[1,256], index: 5, kind: input, shape index: {}]   ;;  %s2251_s6 = inlined_call_operand.vmem [shape: f32[2], index: 6, kind: input, shape index: {}]   ;;  %s2252_s7 = inlined_call_operand.vmem [shape: f32[2,7,7], index: 7, kind: input, shape index: {}]   ;;  %s2253_s8 = inlined_call_operand.vmem [shape: f32[256,128], index: 8, kind: input, shape index: {}]   ;;  %s2254_s9 = inlined_call_operand.vmem [shape: f32[1,128], index: 9, kind: input, shape index: {}]   ;;  %s2255_s10 = inlined_call_operand.vmem [shape: f32[128,128], index: 10, kind: input, shape index: {}]   ;;  %s2256_s11 = inlined_call_operand.vmem [shape: f32[1,128], index: 11, kind: input, shape index: {}]   ;;  %s2257_s12 = inlined_call_operand.vmem [shape: f32[128,128], index: 12, kind: input, shape index: {}]   ;;  %s2258_s13 = inlined_call_operand.vmem [shape: f32[1,128], index: 13, kind: input, shape index: {}]   ;;  %s2259_s14 = inlined_call_operand.vmem [shape: f32[2,7,128], index: 14, kind: output, shape index: {}]  }
   0x1 LB: > { %s1833_s30 = sadd.s32 4294967295, %s1745_s29   ;;  %p1377_p0 = scmp.ge.s32.totalorder %s1745_s29, 1  ;;  %s1745_s29 = sphi %s1827_s29, %s25_s29  }
   0x2   : > { %p355_p1 = scmp.lt.s32.totalorder %s1745_s29, 3  ;;  %s383_s17 = sshll.u32 %s2251_s6, 4  ;;  %s384_s17 = int_to_ptr.vmem [resolvable:$true] %s383_s17 }
   0x3   : > { %p1701_p3 = scmp.eq.s32.totalorder %s1833_s30, 0  ;;  %s1720_s19 = scalar_lea.vmem %s384_s17, 16 }
   0x4   : > { %p1840_p2 = pnand %p1377_p0, %p355_p1  ;;  %p1721_p6 = scmp.ne.s32.totalorder %s384_s17, %s1720_s19 }
   0x5   : > { %p1728_p10 = scmp.lt.s32.totalorder %s384_s17, %s384_s17  ;;  %p1729_p11 = scmp.lt.s32.totalorder %s1720_s19, %s1720_s19 }
   0x6   : > { %p1697_p4 = pneg %p1840_p2 }
   0x7   : > { %p1730_p12 = por %p1729_p11, %p1728_p10 }
   0x8   : > { %p1698_p5 = pnand %p1701_p3, %p1697_p4 }
   0xa   : > { %p1722_p7 = pneg %p1698_p5 }
   0xc   : > { %p1723_p8 = pnand %p1722_p7, %p1721_p6 }
   0xe   : > { %p1724_p9 = pneg %p1723_p8 }
  0x10   : > { %p1731_p13 = pnand %p1730_p12, %p1724_p9 }
  0x12   : > { %1734 = shalt.err (!%p1731_p13)
}
  0x13   : > { %s1747_s20 = smov [#allocation2]   ;;  %424 = sbr.rel (%p1840_p2) target bundleno = 1807 (0x70f), region = 76 }
  0x14   : > { %1700 = dma.vmem_to_smem (!%p1698_p5), %s384_s17, 16, %s1747_s20, [#allocation3]  }
  0x1a   : > { %1740 = dma.done.wait (%p1701_p3), [#allocation3], 16  }
  0x1b   : > { %1742 = vsyncadd (%p1701_p3), [#allocation3], 4294967280 }
  0x1c   : > { %430 = sfence }
  0x1d   : > { %v478_v0 = vld [vmem:[%s2246_s1] sm:$0xff]  ;;  %v479_v1 = vld [vmem:[%s2246_s1 + $0x8] sm:$0xff]  ;;  %p469_p0 = scmp.lt.s32.totalorder %s1833_s30, 1  ;;  %v1748_v2 = vmov 0.0|0.0   ;;  %vm1749_vm0 = vmmov 0   ;;  %v1750_v4 = vmov 0.0   ;;  %v600_v62 = vlaneseq }
  0x1e   : > { %1578 = vmatprep.subr.bf16.mxu1 %v1748_v2  ;;  %v1579_v3 = vpack.c.bf16 %v479_v1, %v478_v0  ;;  %1485 = vmatprep.mubr.msk.f32.mxu1 %vm1749_vm0, %v1750_v4  ;;  %v567_v5 = vld [vmem:[%s2249_s4 + $0x8] sm:$0xff]  ;;  %v569_v6 = vld [vmem:[%s2249_s4 + $0x18] sm:$0xff]  ;;  %v566_v7 = vld [vmem:[%s2249_s4] sm:$0xff]  ;;  %vm487_vm1 = vcmask 130048   ;;  %vm769_vm3 = vcmask 1046528   ;;  %vm681_vm4 = vcmask 523264  }
  0x1f   : > { %s2262_s30 = smov (!%p469_p0, %s1833_s30), 1  ;;  %v1581_v8 = vpack.c.bf16 %v569_v6, %v567_v5  ;;  %v568_v9 = vld [vmem:[%s2249_s4 + $0x10] sm:$0xff]  ;;  %v571_v10 = vld [vmem:[%s2249_s4 + $0x28] sm:$0xff]  ;;  %v573_v11 = vld [vmem:[%s2249_s4 + $0x38] sm:$0xff]  ;;  %1493 = vmatprep.subr.mxu0 %v1750_v4  ;;  %1495 = vmatprep.mubr.msk.f32.mxu0 %vm1749_vm0, %v1750_v4  ;;  %v601_v63 = vshrl.u32 %v600_v62, 7  ;;  %s1751_s19 = smov 64  }
  0x20   : > { %1580 = vmatpush3.bf16.msra.mxu1 %v1579_v3  ;;  %s1382_s23 = sshll.u32 %s2262_s30, 3  ;;  %v1583_v12 = vpack.c.bf16 %v568_v9, %v566_v7  ;;  %v1585_v13 = vpack.c.bf16 %v573_v11, %v571_v10  ;;  %v570_v14 = vld [vmem:[%s2249_s4 + $0x20] sm:$0xff]  ;;  %v572_v15 = vld [vmem:[%s2249_s4 + $0x30] sm:$0xff]  ;;  %v575_v17 = vld [vmem:[%s2249_s4 + $0x48] sm:$0xff]  ;;  %s760_s20 = sld [smem:[#allocation2]]  ;;  %vm765_vm5 = vcmask 56320  }
  0x21   : > { %1582 = vmatprep.subr.bf16.mxu1 %v1581_v8  ;;  %s472_s26 = scalar_lea.vmem %s2245_s0, %s1382_s23  ;;  %v577_v18 = vld [vmem:[%s2249_s4 + $0x58] sm:$0xff]  ;;  %v1587_v19 = vpack.c.bf16 %v572_v15, %v570_v14  ;;  %v574_v21 = vld [vmem:[%s2249_s4 + $0x40] sm:$0xff]  ;;  %v576_v22 = vld [vmem:[%s2249_s4 + $0x50] sm:$0xff]  ;;  %v602_v0 = vsub.s32 0, %v601_v63  ;;  %v606_v3 = vsub.s32 1, %v601_v63  ;;  %s1392_s28 = sld [smem:[#allocation2 + $0x1]] }
  0x22   : > { %v477_v16 = vld [vmem:[%s472_s26] sm:$0x7f]  ;;  %v1589_v20 = vpack.c.bf16 %v577_v18, %v575_v17  ;;  %v579_v23 = vld [vmem:[%s2249_s4 + $0x68] sm:$0xff]  ;;  %v581_v24 = vld [vmem:[%s2249_s4 + $0x78] sm:$0xff]  ;;  %v1591_v25 = vpack.c.bf16 %v576_v22, %v574_v21 }
  0x23   : > { %1486 = vmatmul.mubr.msk.f32.vlgmr.msra.gmra.mrb[0].mxu1 %vm487_vm1, %v477_v16  ;;  %v1593_v26 = vpack.c.bf16 %v581_v24, %v579_v23  ;;  %v578_v27 = vld [vmem:[%s2249_s4 + $0x60] sm:$0xff]  ;;  %v580_v28 = vld [vmem:[%s2249_s4 + $0x70] sm:$0xff]  ;;  %v583_v29 = vld [vmem:[%s2249_s4 + $0x88] sm:$0xff] }
  0x24   : > { %1584 = vmatpush1.bf16.msra.mxu1 %v1583_v12  ;;  %674 = vmatprep.mubr.f32.mxu1 %v1750_v4  ;;  %v585_v30 = vld [vmem:[%s2249_s4 + $0x98] sm:$0xff]  ;;  %v1595_v31 = vpack.c.bf16 %v580_v28, %v578_v27  ;;  %v582_v33 = vld [vmem:[%s2249_s4 + $0x80] sm:$0xff]  ;;  %v584_v34 = vld [vmem:[%s2249_s4 + $0x90] sm:$0xff] }
  0x25   : > { %1586 = vmatprep.subr.bf16.mxu1 %v1585_v13  ;;  %v1597_v32 = vpack.c.bf16 %v585_v30, %v583_v29  ;;  %v587_v35 = vld [vmem:[%s2249_s4 + $0xa8] sm:$0xff]  ;;  %v589_v36 = vld [vmem:[%s2249_s4 + $0xb8] sm:$0xff]  ;;  %v1599_v37 = vpack.c.bf16 %v584_v34, %v582_v33  ;;  %v586_v39 = vld [vmem:[%s2249_s4 + $0xa0] sm:$0xff] }
  0x26   : > { %v1601_v38 = vpack.c.bf16 %v589_v36, %v587_v35  ;;  %v588_v40 = vld [vmem:[%s2249_s4 + $0xb0] sm:$0xff]  ;;  %v591_v42 = vld [vmem:[%s2249_s4 + $0xc8] sm:$0xff]  ;;  %v593_v43 = vld [vmem:[%s2249_s4 + $0xd8] sm:$0xff]  ;;  %v761_v14 = vstv %s760_s20 }
  0x27   : > { %v1603_v41 = vpack.c.bf16 %v588_v40, %v586_v39  ;;  %v1605_v44 = vpack.c.bf16 %v593_v43, %v591_v42  ;;  %v590_v45 = vld [vmem:[%s2249_s4 + $0xc0] sm:$0xff]  ;;  %v592_v46 = vld [vmem:[%s2249_s4 + $0xd0] sm:$0xff]  ;;  %v595_v48 = vld [vmem:[%s2249_s4 + $0xe8] sm:$0xff]  ;;  %v924_v29 = vstv %s1392_s28 }
  0x28   : > { %1588 = vmatpush1.bf16.msra.mxu1 %v1587_v19  ;;  %v1607_v47 = vpack.c.bf16 %v592_v46, %v590_v45  ;;  %v597_v49 = vld [vmem:[%s2249_s4 + $0xf8] sm:$0xff]  ;;  %v594_v51 = vld [vmem:[%s2249_s4 + $0xe0] sm:$0xff]  ;;  %v596_v52 = vld [vmem:[%s2249_s4 + $0xf0] sm:$0xff] }
  0x29   : > { %1590 = vmatprep.subr.bf16.mxu1 %v1589_v20  ;;  %v1609_v50 = vpack.c.bf16 %v597_v49, %v595_v48  ;;  %v1611_v53 = vpack.c.bf16 %v596_v52, %v594_v51  ;;  %v1384_v54 = vld [vmem:[%s2247_s2] ss:$0 sm:$0xff]  ;;  %v1019_v22 = vld [vmem:[%s2253_s8 + $0x88] sm:$0xff]  ;;  %v1020_v34 = vld [vmem:[%s2253_s8 + $0x90] sm:$0xff] }
  0x2a   : > { %v564_v59 = vld [vmem:[%s2248_s3] sm:$0x7f]  ;;  %v1393_v33 = vld [vmem:[%s2252_s7 + $0x8] sm:$0x7f]  ;;  %v1021_v35 = vld [vmem:[%s2253_s8 + $0x98] sm:$0xff] }
  0x2b   : > { %v598_v1 = vld [vmem:[%s2250_s5] sm:$0x3]  ;;  %v1617_v39 = vpack.c.bf16 %v1021_v35, %v1020_v34  ;;  %v1004_v40 = vld [vmem:[%s2253_s8 + $0x10] sm:$0xff]  ;;  %v1023_v43 = vld [vmem:[%s2253_s8 + $0xa8] sm:$0xff] }
  0x2c   : > { %1592 = vmatpush1.bf16.msra.mxu1 %v1591_v25  ;;  %v603_v5 = vrot.slane %v598_v1, %v602_v0  ;;  %v607_v7 = vrot.slane %v598_v1, %v606_v3  ;;  %v763_v16 = vld [vmem:[%s2252_s7] sm:$0x7f]  ;;  %v1024_v48 = vld [vmem:[%s2253_s8 + $0xb0] sm:$0xff]  ;;  %v1025_v49 = vld [vmem:[%s2253_s8 + $0xb8] sm:$0xff] }
  0x2d   : > { %1594 = vmatprep.subr.bf16.mxu1 %v1593_v26  ;;  %v1018_v21 = vld [vmem:[%s2253_s8 + $0x80] sm:$0xff]  ;;  %v1625_v51 = vpack.c.bf16 %v1025_v49, %v1024_v48  ;;  %v1008_v52 = vld [vmem:[%s2253_s8 + $0x30] sm:$0xff]  ;;  %v1029_v62 = vld [vmem:[%s2253_s8 + $0xd8] sm:$0xff] }
  0x2e   : > { %v1613_v23 = vpack.c.bf16 %v1019_v22, %v1018_v21  ;;  %v1002_v30 = vld [vmem:[%s2253_s8] sm:$0xff]  ;;  %v1012_v1 = vld [vmem:[%s2253_s8 + $0x50] sm:$0xff]  ;;  %v1013_v3 = vld [vmem:[%s2253_s8 + $0x58] sm:$0xff] }
  0x2f   : > { %v1022_v42 = vld [vmem:[%s2253_s8 + $0xa0] sm:$0xff]  ;;  %v1118_v22 = vld [vmem:[%s2255_s10 + $0x18] sm:$0xff] }
  0x30   : > { %1596 = vmatpush1.bf16.msra.mxu1 %v1595_v31  ;;  %v1003_v31 = vld [vmem:[%s2253_s8 + $0x8] sm:$0xff]  ;;  %v1621_v45 = vpack.c.bf16 %v1023_v43, %v1022_v42  ;;  %v1006_v46 = vld [vmem:[%s2253_s8 + $0x20] sm:$0xff] }
  0x31   : > { %1598 = vmatprep.subr.bf16.mxu1 %v1597_v32  ;;  %v1212_v43 = vld [vmem:[%s2257_s12] sm:$0xff] }
  0x32   : > { %v1216_v49 = vld [vmem:[%s2257_s12 + $0x20] sm:$0xff] }
  0x34   : > { %1600 = vmatpush1.bf16.msra.mxu1 %v1599_v37  ;;  %v1615_v37 = vpack.c.bf16 %v1003_v31, %v1002_v30  ;;  %v1123_v31 = vld [vmem:[%s2255_s10 + $0x40] sm:$0xff] }
  0x35   : > { %1602 = vmatprep.subr.bf16.mxu1 %v1601_v38 }
  0x38   : > { %1604 = vmatpush1.bf16.msra.mxu1 %v1603_v41  ;;  %v1005_v41 = vld [vmem:[%s2253_s8 + $0x18] sm:$0xff] }
  0x39   : > { %1606 = vmatprep.subr.bf16.mxu1 %v1605_v44  ;;  %v1619_v44 = vpack.c.bf16 %v1005_v41, %v1004_v40  ;;  %v1129_v40 = vld [vmem:[%s2255_s10 + $0x70] sm:$0xff]  ;;  %v1130_v41 = vld [vmem:[%s2255_s10 + $0x78] sm:$0xff] }
  0x3a   : > { %v1667_v42 = vpack.c.bf16 %v1130_v41, %v1129_v40 }
  0x3c   : > { %1608 = vmatpush1.bf16.msra.mxu1 %v1607_v47  ;;  %v1007_v47 = vld [vmem:[%s2253_s8 + $0x28] sm:$0xff] }
  0x3d   : > { %1610 = vmatprep.subr.bf16.mxu1 %v1609_v50  ;;  %v1623_v50 = vpack.c.bf16 %v1007_v47, %v1006_v46  ;;  %v1215_v47 = vld [vmem:[%s2257_s12 + $0x18] sm:$0xff] }
  0x40   : > { %1612 = vmatpush1.bf16.msra.mxu1 %v1611_v53  ;;  %v1009_v53 = vld [vmem:[%s2253_s8 + $0x38] sm:$0xff] }
  0x41   : > { %1488 = vmatprep.subr.mxu1 %v1750_v4 }
  0xf6   : > { %v557_v55 = vpop.f32.mrb[0].mxu1 }
  0xf7   : > { %v558_v56 = vadd.f32 %v1384_v54, %v557_v55  ;;  %v1487_v57 = vpop.f32.mrb[1].mxu1  ;;  %v1026_v54 = vld [vmem:[%s2253_s8 + $0xc0] sm:$0xff]  ;;  %v1027_v55 = vld [vmem:[%s2253_s8 + $0xc8] sm:$0xff] }
  0xf8   : > { %v1629_v57 = vpack.c.bf16 %v1027_v55, %v1026_v54  ;;  %v1220_v55 = vld [vmem:[%s2257_s12 + $0x40] sm:$0xff] }
  0xf9   : > { %vm561_vm2 = vcmp.ge.f32.partialorder %v558_v56, 0.0  ;;  %v562_v58 = vmul.f32 0.1, %v558_v56 }
  0xfb   : > { %v1981_v60 = vsel %vm561_vm2, %v558_v56, %v562_v58  ;;  %v1627_v56 = vpack.c.bf16 %v1009_v53, %v1008_v52  ;;  %v1010_v58 = vld [vmem:[%s2253_s8 + $0x40] sm:$0xff]  ;;  %v1218_v52 = vld [vmem:[%s2257_s12 + $0x30] sm:$0xff]  ;;  %v1219_v53 = vld [vmem:[%s2257_s12 + $0x38] sm:$0xff] }
  0xfc   : > { %1494 = vmatpush3.msk.msra.mxu0 %vm769_vm3, %v1981_v60  ;;  %v565_v61 = vadd.f32 %v564_v59, %v1981_v60  ;;  %v1011_v59 = vld [vmem:[%s2253_s8 + $0x48] sm:$0xff]  ;;  %v1679_v54 = vpack.c.bf16 %v1219_v53, %v1218_v52 }
  0xfd   : > { %1498 = vmatprep.subr.mxu0 %v1750_v4  ;;  %v1631_v63 = vpack.c.bf16 %v1011_v59, %v1010_v58  ;;  %v1222_v58 = vld [vmem:[%s2257_s12 + $0x50] sm:$0xff]  ;;  %v1223_v59 = vld [vmem:[%s2257_s12 + $0x58] sm:$0xff] }
  0xfe   : > { %675 = vmatmul.mubr.f32.vlgmr.msra.gmra.mrb[2].mxu1 %v565_v61  ;;  %v1028_v61 = vld [vmem:[%s2253_s8 + $0xd0] sm:$0xff] }
  0xff   : > { %1490 = vmatprep.mubr.msk.f32.mxu1 %vm1749_vm0, %v1750_v4  ;;  %v1633_v0 = vpack.c.bf16 %v1029_v62, %v1028_v61  ;;  %v1685_v61 = vpack.c.bf16 %v1223_v59, %v1222_v58 }
 0x1d1   : > { %v676_v6 = vpop.f32.mrb[2].mxu1 }
 0x1d2   : > { %v677_v8 = vadd.f32 %v676_v6, %v603_v5  ;;  %v678_v9 = vpop.f32.mrb[3].mxu1  ;;  %v1030_v5 = vld [vmem:[%s2253_s8 + $0xe0] sm:$0xff]  ;;  %v1031_v6 = vld [vmem:[%s2253_s8 + $0xe8] sm:$0xff] }
 0x1d3   : > { %v679_v10 = vadd.f32 %v678_v9, %v607_v7  ;;  %v1635_v7 = vpack.c.bf16 %v1013_v3, %v1012_v1  ;;  %v1014_v9 = vld [vmem:[%s2253_s8 + $0x60] sm:$0xff] }
 0x1d4   : > { %845 = vrot.lane.b32.xlu0 %v677_v8, %s1751_s19  ;;  %1489 = vmatpush3.xpose.msk.msra.mxu1 %vm681_vm4, %v677_v8  ;;  %v1637_v8 = vpack.c.bf16 %v1031_v6, %v1030_v5 }
 0x1d5   : > { %1645 = vmatprep.subr.bf16.mxu1 %v1748_v2 }
 0x1d7   : > { %1491 = vmatmul.mubr.msk.f32.vlgmr.msra.gmra.mrb[4].mxu1 %vm681_vm4, %v679_v10 }
 0x1d8   : > { %843 = vrot.lane.b32.xlu0 %v679_v10, %s1751_s19  ;;  %1540 = vmatprep.mubr.msk.f32.mxu1 %vm1749_vm0, %v1750_v4  ;;  %v1015_v10 = vld [vmem:[%s2253_s8 + $0x68] sm:$0xff]  ;;  %s476_s19 = scalar_lea.vmem %s2259_s14, %s1382_s23 }
 0x246   : > { %v846_v18 = vpop.permute.xlu0 %845 }
 0x24a   : > { %v844_v20 = vpop.permute.xlu0 %843 }
 0x2aa   : > { %v754_v11 = vpop.f32.mrb[4].mxu1 }
 0x2ab   : > { %v758_v12 = vmul.f32 0.015625, %v754_v11  ;;  %v1492_v13 = vpop.f32.mrb[5].mxu1  ;;  %v1032_v11 = vld [vmem:[%s2253_s8 + $0xf0] sm:$0xff] }
 0x2ac   : > { %v1639_v13 = vpack.c.bf16 %v1015_v10, %v1014_v9  ;;  %v1225_v9 = vld [vmem:[%s2257_s12 + $0x68] sm:$0xff] }
 0x2ad   : > { %1716 = vtanh.f32 %v758_v12  ;;  %v1033_v12 = vld [vmem:[%s2253_s8 + $0xf8] sm:$0xff] }
 0x2b7   : > { %v1717_v15 = vpop.eup %1716 }
 0x2b8   : > { %v762_v17 = vmul.f32 %v1717_v15, %v761_v14  ;;  %v1641_v14 = vpack.c.bf16 %v1033_v12, %v1032_v11  ;;  %v1016_v15 = vld [vmem:[%s2253_s8 + $0x70] sm:$0xff]  ;;  %v1227_v12 = vld [vmem:[%s2257_s12 + $0x78] sm:$0xff] }
 0x2b9   : > { %v1226_v11 = vld [vmem:[%s2257_s12 + $0x70] sm:$0xff] }
 0x2ba   : > { %v764_v19 = vadd.f32 %v763_v16, %v762_v17  ;;  %v1017_v16 = vld [vmem:[%s2253_s8 + $0x78] sm:$0xff] }
 0x2bb   : > { %v1643_v17 = vpack.c.bf16 %v1017_v16, %v1016_v15 }
 0x2bc   : > { %1496 = vmatmul.mubr.msk.f32.vlgmr.msra.gmra.mrb[0].mxu0 %vm765_vm5, %v764_v19  ;;  %v1116_v19 = vld [vmem:[%s2255_s10 + $0x8] sm:$0xff] }
 0x2bd   : > { %1499 = vmatpush3.xpose.msk.msra.mxu0 %vm681_vm4, %v846_v18  ;;  %1500 = vmatprep.mubr.msk.f32.mxu0 %vm1749_vm0, %v1750_v4  ;;  %v1115_v18 = vld [vmem:[%s2255_s10] sm:$0xff] }
 0x2be   : > { %1503 = vmatprep.subr.mxu0 %v1750_v4  ;;  %v1646_v21 = vpack.c.bf16 %v1116_v19, %v1115_v18 }
 0x2c0   : > { %1501 = vmatmul.mubr.msk.f32.vlgmr.msra.gmra.mrb[2].mxu0 %vm681_vm4, %v844_v20  ;;  %v1117_v20 = vld [vmem:[%s2255_s10 + $0x10] sm:$0xff]  ;;  %1647 = vmatpush3.bf16.msra.mxu1 %v1646_v21 }
 0x2c1   : > { %1504 = vmatpush3.msk.msra.mxu0 %vm769_vm3, %v1981_v60  ;;  %1505 = vmatprep.mubr.msk.f32.mxu0 %vm1749_vm0, %v1750_v4 }
 0x2c2   : > { %1614 = vmatprep.subr.bf16.mxu0 %v1613_v23  ;;  %v1649_v23 = vpack.c.bf16 %v1118_v22, %v1117_v20  ;;  %1648 = vmatprep.subr.bf16.mxu1 %v1748_v2  ;;  %v1398_v20 = vld [vmem:[%s2258_s13] ss:$0 sm:$0xff] }
 0x2c4   : > { %1650 = vmatpush3.bf16.msra.mxu1 %v1649_v23 }
 0x2c5   : > { %1651 = vmatprep.subr.bf16.mxu1 %v1748_v2 }
 0x38f   : > { %v2016_v24 = vpop.f32.mrb[0].mxu0 }
 0x390   : > { %v1497_v25 = vpop.f32.mrb[1].mxu0 }
 0x391   : > { %v1119_v25 = vld [vmem:[%s2255_s10 + $0x20] sm:$0xff] }
 0x393   : > { %v917_v26 = vpop.f32.mrb[2].mxu0 }
 0x394   : > { %v921_v27 = vmul.f32 0.015625, %v917_v26  ;;  %v1502_v28 = vpop.f32.mrb[3].mxu0  ;;  %v1120_v26 = vld [vmem:[%s2255_s10 + $0x28] sm:$0xff] }
 0x395   : > { %v1121_v28 = vld [vmem:[%s2255_s10 + $0x30] sm:$0xff] }
 0x396   : > { %1718 = vtanh.f32 %v921_v27  ;;  %v1652_v27 = vpack.c.bf16 %v1120_v26, %v1119_v25 }
 0x398   : > { %1653 = vmatpush3.bf16.msra.mxu1 %v1652_v27 }
 0x399   : > { %1654 = vmatprep.subr.bf16.mxu1 %v1748_v2 }
 0x3a0   : > { %v1719_v32 = vpop.eup %1718 }
 0x3a1   : > { %v925_v36 = vmul.f32 %v1719_v32, %v924_v29  ;;  %v1122_v29 = vld [vmem:[%s2255_s10 + $0x38] sm:$0xff]  ;;  %v1124_v32 = vld [vmem:[%s2255_s10 + $0x48] sm:$0xff] }
 0x3a2   : > { %v1655_v30 = vpack.c.bf16 %v1122_v29, %v1121_v28 }
 0x3a3   : > { %v928_v38 = vadd.f32 %v1393_v33, %v925_v36  ;;  %v1658_v33 = vpack.c.bf16 %v1124_v32, %v1123_v31  ;;  %v1125_v36 = vld [vmem:[%s2255_s10 + $0x50] sm:$0xff] }
 0x3a4   : > { %1656 = vmatpush3.bf16.msra.mxu1 %v1655_v30 }
 0x3a5   : > { %1506 = vmatmul.mubr.msk.f32.vlgmr.msra.gmra.mrb[4].mxu0 %vm765_vm5, %v928_v38  ;;  %1657 = vmatprep.subr.bf16.mxu1 %v1748_v2 }
 0x3a6   : > { %1616 = vmatpush3.bf16.msra.mxu0 %v1615_v37  ;;  %v1126_v37 = vld [vmem:[%s2255_s10 + $0x58] sm:$0xff] }
 0x3a7   : > { %1618 = vmatprep.subr.bf16.mxu0 %v1617_v39  ;;  %v1661_v38 = vpack.c.bf16 %v1126_v37, %v1125_v36  ;;  %v1127_v39 = vld [vmem:[%s2255_s10 + $0x60] sm:$0xff] }
 0x3a8   : > { %1659 = vmatpush3.bf16.msra.mxu1 %v1658_v33 }
 0x3a9   : > { %1660 = vmatprep.subr.bf16.mxu1 %v1748_v2 }
 0x3aa   : > { %1620 = vmatpush3.bf16.msra.mxu0 %v1619_v44  ;;  %v1213_v44 = vld [vmem:[%s2257_s12 + $0x8] sm:$0xff] }
 0x3ab   : > { %1622 = vmatprep.subr.bf16.mxu0 %v1621_v45  ;;  %v1214_v45 = vld [vmem:[%s2257_s12 + $0x10] sm:$0xff]  ;;  %v1670_v46 = vpack.c.bf16 %v1213_v44, %v1212_v43 }
 0x3ac   : > { %1662 = vmatpush3.bf16.msra.mxu1 %v1661_v38  ;;  %v1673_v48 = vpack.c.bf16 %v1215_v47, %v1214_v45 }
 0x3ad   : > { %1663 = vmatprep.subr.bf16.mxu1 %v1748_v2 }
 0x3ae   : > { %1624 = vmatpush3.bf16.msra.mxu0 %v1623_v50  ;;  %v1217_v50 = vld [vmem:[%s2257_s12 + $0x28] sm:$0xff] }
 0x3af   : > { %1626 = vmatprep.subr.bf16.mxu0 %v1625_v51  ;;  %v1676_v51 = vpack.c.bf16 %v1217_v50, %v1216_v49 }
 0x3b2   : > { %1628 = vmatpush3.bf16.msra.mxu0 %v1627_v56  ;;  %v1221_v56 = vld [vmem:[%s2257_s12 + $0x48] sm:$0xff] }
 0x3b3   : > { %1630 = vmatprep.subr.bf16.mxu0 %v1629_v57  ;;  %v1682_v57 = vpack.c.bf16 %v1221_v56, %v1220_v55 }
 0x3b6   : > { %1632 = vmatpush3.bf16.msra.mxu0 %v1631_v63  ;;  %v1396_v63 = vld [vmem:[%s2254_s9] ss:$0 sm:$0xff] }
 0x3b7   : > { %1634 = vmatprep.subr.bf16.mxu0 %v1633_v0 }
 0x3ba   : > { %1636 = vmatpush3.bf16.msra.mxu0 %v1635_v7 }
 0x3bb   : > { %1638 = vmatprep.subr.bf16.mxu0 %v1637_v8  ;;  %v1224_v8 = vld [vmem:[%s2257_s12 + $0x60] sm:$0xff] }
 0x3bc   : > { %v1688_v10 = vpack.c.bf16 %v1225_v9, %v1224_v8 }
 0x3be   : > { %1640 = vmatpush3.bf16.msra.mxu0 %v1639_v13  ;;  %v1691_v13 = vpack.c.bf16 %v1227_v12, %v1226_v11 }
 0x3bf   : > { %1642 = vmatprep.subr.bf16.mxu0 %v1641_v14  ;;  %v1397_v14 = vld [vmem:[%s2256_s11] ss:$0 sm:$0xff] }
 0x3c2   : > { %1644 = vmatpush3.bf16.msra.mxu0 %v1643_v17 }
 0x3c3   : > { %1669 = vmatprep.subr.bf16.mxu0 %v1748_v2 }
 0x478   : > { %v998_v34 = vpop.f32.mrb[4].mxu0 }
 0x479   : > { %v1507_v35 = vpop.f32.mrb[5].mxu0  ;;  %1105 = vmatprep.mubr.f32.mxu0 %v998_v34 }
 0x47a   : > { %1106 = vmatmul.mubr.f32.vlgmr.msra.gmra.mrb[6].mxu0 %v2016_v24 }
 0x47b   : > { %1575 = vmatprep.mubr.msk.f32.mxu0 %vm1749_vm0, %v1750_v4  ;;  %v1128_v4 = vld [vmem:[%s2255_s10 + $0x68] sm:$0xff]  ;;  %1671 = vmatpush3.bf16.msra.mxu0 %v1670_v46 }
 0x47c   : > { %v1664_v24 = vpack.c.bf16 %v1128_v4, %v1127_v39  ;;  %1672 = vmatprep.subr.bf16.mxu0 %v1748_v2 }
 0x47e   : > { %1665 = vmatpush3.bf16.msra.mxu1 %v1664_v24 }
 0x47f   : > { %1666 = vmatprep.subr.bf16.mxu1 %v1748_v2  ;;  %1674 = vmatpush3.bf16.msra.mxu0 %v1673_v48 }
 0x480   : > { %1675 = vmatprep.subr.bf16.mxu0 %v1748_v2 }
 0x482   : > { %1668 = vmatpush3.bf16.msra.mxu1 %v1667_v42 }
 0x483   : > { %1677 = vmatpush3.bf16.msra.mxu0 %v1676_v51 }
 0x484   : > { %1678 = vmatprep.subr.bf16.mxu0 %v1748_v2 }
 0x487   : > { %1680 = vmatpush3.bf16.msra.mxu0 %v1679_v54 }
 0x488   : > { %1681 = vmatprep.subr.bf16.mxu0 %v1748_v2 }
 0x48b   : > { %1683 = vmatpush3.bf16.msra.mxu0 %v1682_v57 }
 0x48c   : > { %1684 = vmatprep.subr.bf16.mxu0 %v1748_v2 }
 0x48f   : > { %1686 = vmatpush3.bf16.msra.mxu0 %v1685_v61 }
 0x490   : > { %1687 = vmatprep.subr.bf16.mxu0 %v1748_v2 }
 0x493   : > { %1689 = vmatpush3.bf16.msra.mxu0 %v1688_v10 }
 0x494   : > { %1690 = vmatprep.subr.bf16.mxu0 %v1748_v2 }
 0x497   : > { %1692 = vmatpush3.bf16.msra.mxu0 %v1691_v13 }
 0x54d   : > { %v1444_v62 = vpop.f32.mrb[6].mxu0 }
 0x54e   : > { %v1445_v0 = vpop.f32.mrb[7].mxu0 }
 0x54f   : > { %v1446_v1 = vadd.f32 %v1445_v0, %v1444_v62 }
 0x551   : > { %v1108_v3 = vadd.f32 %v1446_v1, %v1396_v63 }
 0x553   : > { %v1111_v5 = vadd.f32 %v1108_v3, %v1981_v60 }
 0x555   : > { %vm1112_vm6 = vcmp.ge.f32.partialorder %v1111_v5, 0.0  ;;  %v1113_v6 = vmul.f32 0.1, %v1111_v5 }
 0x557   : > { %v1114_v7 = vsel %vm1112_vm6, %v1111_v5, %v1113_v6 }
 0x558   : > { %1541 = vmatmul.mubr.f32.vlgmr.msra.gmra.mrb[6].mxu1 %v1114_v7 }
 0x62b   : > { %v1204_v15 = vpop.f32.mrb[6].mxu1 }
 0x62c   : > { %v1205_v16 = vadd.f32 %v1397_v14, %v1204_v15  ;;  %v1542_v17 = vpop.f32.mrb[7].mxu1 }
 0x62e   : > { %v1208_v2 = vadd.f32 %v1205_v16, %v1981_v60 }
 0x630   : > { %v1210_v18 = vmul.f32 0.1, %v1208_v2  ;;  %vm1209_vm7 = vcmp.ge.f32.partialorder %v1208_v2, 0.0 }
 0x632   : > { %v1211_v19 = vsel %vm1209_vm7, %v1208_v2, %v1210_v18 }
 0x633   : > { %1576 = vmatmul.mubr.f32.vlgmr.msra.gmra.mrb[8].mxu0 %v1211_v19 }
 0x706   : > { %v1301_v21 = vpop.f32.mrb[8].mxu0 }
 0x707   : > { %v1302_v22 = vadd.f32 %v1398_v20, %v1301_v21  ;;  %v1577_v23 = vpop.f32.mrb[9].mxu0 }
 0x709   : > { %v1305_v25 = vadd.f32 %v1302_v22, %v1211_v19 }
 0x70b   : > { %vm1306_vm8 = vcmp.ge.f32.partialorder %v1305_v25, 0.0  ;;  %v1307_v26 = vmul.f32 0.1, %v1305_v25 }
 0x70d   : > { %v1308_v60 = vsel %vm1306_vm8, %v1305_v25, %v1307_v26 }
 0x70e   : > { %1309 = vst [vmem:[%s476_s19] sm:$0x7f] %v1308_v60 }
 0x70f PF: > { %s25_s29 = sadd.s32 1, %s1745_s29  }
 0x710   : > { %p22_p1 = scmp.ge.s32.totalorder %s25_s29, 4  }
 0x712   :  { %24 = sbr.rel (!%p22_p1) target bundleno = 1 (0x1), region = 112 }
 0x719   :  { %1329 = vsyncpa [#allocation3], 1 }
 0x71a   :  { %1331 = vsyncpa [#allocation3 + $0x1], 1 }

// kernel: _lambda_.9
= control target key start
LH: loop header
LB: loop body
LE: loop exit
PB: predicated region body
PF: predicated region fallthrough
CT: control target
= control target key end

     0   :  { %17 = vsyncpa [#allocation3], 0  ;;  %s1662_s21 = smov 0   ;;  %s2063_s0 = inlined_call_operand.vmem [shape: f32[2,7,128], index: 0, kind: input, shape index: {}]   ;;  %s2064_s1 = inlined_call_operand.vmem [shape: f32[7,128], index: 1, kind: input, shape index: {}]   ;;  %s2065_s2 = inlined_call_operand.vmem [shape: f32[128,256], index: 2, kind: input, shape index: {}]   ;;  %s2066_s3 = inlined_call_operand.vmem [shape: f32[1,256], index: 3, kind: input, shape index: {}]   ;;  %s2067_s4 = inlined_call_operand.vmem [shape: f32[2], index: 4, kind: input, shape index: {}]   ;;  %s2068_s5 = inlined_call_operand.vmem [shape: f32[2,7,7], index: 5, kind: input, shape index: {}]   ;;  %s2069_s6 = inlined_call_operand.vmem [shape: f32[256,128], index: 6, kind: input, shape index: {}]   ;;  %s2070_s7 = inlined_call_operand.vmem [shape: f32[1,128], index: 7, kind: input, shape index: {}]   ;;  %s2071_s8 = inlined_call_operand.vmem [shape: f32[128,128], index: 8, kind: input, shape index: {}]   ;;  %s2072_s9 = inlined_call_operand.vmem [shape: f32[1,128], index: 9, kind: input, shape index: {}]   ;;  %s2073_s10 = inlined_call_operand.vmem [shape: f32[128,128], index: 10, kind: input, shape index: {}]   ;;  %s2074_s11 = inlined_call_operand.vmem [shape: f32[1,128], index: 11, kind: input, shape index: {}]   ;;  %s2075_s12 = inlined_call_operand.vmem [shape: f32[2,7,128], index: 12, kind: output, shape index: {}]  }
   0x1 LB: > { %s1668_s22 = sadd.s32 4294967295, %s1590_s21   ;;  %p1237_p0 = scmp.ge.s32.totalorder %s1590_s21, 1  ;;  %s1590_s21 = sphi %s1662_s21, %s23_s21  }
   0x2   : > { %p311_p1 = scmp.lt.s32.totalorder %s1590_s21, 3  ;;  %s333_s25 = sshll.u32 %s2067_s4, 4  ;;  %s334_s25 = int_to_ptr.vmem [resolvable:$true] %s333_s25 }
   0x3   : > { %p1546_p3 = scmp.eq.s32.totalorder %s1668_s22, 0  ;;  %s1565_s27 = scalar_lea.vmem %s334_s25, 16 }
   0x4   : > { %p1675_p2 = pnand %p1237_p0, %p311_p1  ;;  %p1566_p6 = scmp.ne.s32.totalorder %s334_s25, %s1565_s27 }
   0x5   : > { %p1573_p10 = scmp.lt.s32.totalorder %s334_s25, %s334_s25  ;;  %p1574_p11 = scmp.lt.s32.totalorder %s1565_s27, %s1565_s27 }
   0x6   : > { %p1542_p4 = pneg %p1675_p2 }
   0x7   : > { %p1575_p12 = por %p1574_p11, %p1573_p10 }
   0x8   : > { %p1543_p5 = pnand %p1546_p3, %p1542_p4 }
   0xa   : > { %p1567_p7 = pneg %p1543_p5 }
   0xc   : > { %p1568_p8 = pnand %p1567_p7, %p1566_p6 }
   0xe   : > { %p1569_p9 = pneg %p1568_p8 }
  0x10   : > { %p1576_p13 = pnand %p1575_p12, %p1569_p9 }
  0x12   : > { %1579 = shalt.err (!%p1576_p13)
}
  0x13   : > { %s1592_s28 = smov [#allocation2]   ;;  %374 = sbr.rel (%p1675_p2) target bundleno = 1500 (0x5dc), region = 68 }
  0x14   : > { %1545 = dma.vmem_to_smem (!%p1543_p5), %s334_s25, 16, %s1592_s28, [#allocation3]  }
  0x1a   : > { %1585 = dma.done.wait (%p1546_p3), [#allocation3], 16  }
  0x1b   : > { %1587 = vsyncadd (%p1546_p3), [#allocation3], 4294967280 }
  0x1c   : > { %380 = sfence }
  0x1d   : > { %v427_v0 = vld [vmem:[%s2065_s2 + $0x8] sm:$0xff]  ;;  %v429_v1 = vld [vmem:[%s2065_s2 + $0x18] sm:$0xff]  ;;  %v426_v2 = vld [vmem:[%s2065_s2] sm:$0xff]  ;;  %v1593_v7 = vmov 0.0   ;;  %p415_p0 = scmp.lt.s32.totalorder %s1668_s22, 1  ;;  %vm1594_vm0 = vmmov 0   ;;  %v460_v52 = vlaneseq }
  0x1e   : > { %v1426_v3 = vpack.c.bf16 %v429_v1, %v427_v0  ;;  %v428_v4 = vld [vmem:[%s2065_s2 + $0x10] sm:$0xff]  ;;  %v431_v5 = vld [vmem:[%s2065_s2 + $0x28] sm:$0xff]  ;;  %v433_v6 = vld [vmem:[%s2065_s2 + $0x38] sm:$0xff]  ;;  %534 = vmatprep.mubr.f32.mxu0 %v1593_v7  ;;  %1346 = vmatprep.subr.mxu1 %v1593_v7  ;;  %vm541_vm1 = vcmask 523264   ;;  %s1595_s19 = smov 64   ;;  %vm629_vm2 = vcmask 1046528  }
  0x1f   : > { %v1428_v8 = vpack.c.bf16 %v428_v4, %v426_v2  ;;  %v1430_v9 = vpack.c.bf16 %v433_v6, %v431_v5  ;;  %v430_v10 = vld [vmem:[%s2065_s2 + $0x20] sm:$0xff]  ;;  %v432_v11 = vld [vmem:[%s2065_s2 + $0x30] sm:$0xff]  ;;  %v435_v12 = vld [vmem:[%s2065_s2 + $0x48] sm:$0xff]  ;;  %s2078_s22 = smov (!%p415_p0, %s1668_s22), 1  ;;  %1348 = vmatprep.mubr.msk.f32.mxu1 %vm1594_vm0, %v1593_v7  ;;  %v461_v53 = vshrl.u32 %v460_v52, 7  ;;  %s620_s20 = sld [smem:[#allocation2]] }
  0x20   : > { %1427 = vmatprep.subr.bf16.mxu0 %v1426_v3  ;;  %v437_v13 = vld [vmem:[%s2065_s2 + $0x58] sm:$0xff]  ;;  %v1432_v14 = vpack.c.bf16 %v432_v11, %v430_v10  ;;  %v434_v16 = vld [vmem:[%s2065_s2 + $0x40] sm:$0xff]  ;;  %v436_v17 = vld [vmem:[%s2065_s2 + $0x50] sm:$0xff]  ;;  %s1242_s25 = sshll.u32 %s2078_s22, 3  ;;  %vm625_vm3 = vcmask 56320   ;;  %s1250_s30 = sld [smem:[#allocation2 + $0x1]] }
  0x21   : > { %1429 = vmatpush1.bf16.msra.mxu0 %v1428_v8  ;;  %v1434_v15 = vpack.c.bf16 %v437_v13, %v435_v12  ;;  %v439_v18 = vld [vmem:[%s2065_s2 + $0x68] sm:$0xff]  ;;  %v441_v19 = vld [vmem:[%s2065_s2 + $0x78] sm:$0xff]  ;;  %v1436_v20 = vpack.c.bf16 %v436_v17, %v434_v16  ;;  %v438_v22 = vld [vmem:[%s2065_s2 + $0x60] sm:$0xff]  ;;  %s418_s14 = scalar_lea.vmem %s2063_s0, %s1242_s25  ;;  %v462_v54 = vsub.s32 0, %v461_v53  ;;  %v466_v56 = vsub.s32 1, %v461_v53 }
  0x22   : > { %1431 = vmatprep.subr.bf16.mxu0 %v1430_v9  ;;  %v1438_v21 = vpack.c.bf16 %v441_v19, %v439_v18  ;;  %v440_v23 = vld [vmem:[%s2065_s2 + $0x70] sm:$0xff]  ;;  %v443_v24 = vld [vmem:[%s2065_s2 + $0x88] sm:$0xff]  ;;  %v445_v25 = vld [vmem:[%s2065_s2 + $0x98] sm:$0xff] }
  0x23   : > { %v1440_v26 = vpack.c.bf16 %v440_v23, %v438_v22  ;;  %v1442_v27 = vpack.c.bf16 %v445_v25, %v443_v24  ;;  %v442_v28 = vld [vmem:[%s2065_s2 + $0x80] sm:$0xff]  ;;  %v444_v29 = vld [vmem:[%s2065_s2 + $0x90] sm:$0xff]  ;;  %v447_v30 = vld [vmem:[%s2065_s2 + $0xa8] sm:$0xff] }
  0x24   : > { %v449_v31 = vld [vmem:[%s2065_s2 + $0xb8] sm:$0xff]  ;;  %v1444_v32 = vpack.c.bf16 %v444_v29, %v442_v28  ;;  %v446_v34 = vld [vmem:[%s2065_s2 + $0xa0] sm:$0xff]  ;;  %v448_v35 = vld [vmem:[%s2065_s2 + $0xb0] sm:$0xff] }
  0x25   : > { %1433 = vmatpush1.bf16.msra.mxu0 %v1432_v14  ;;  %v1446_v33 = vpack.c.bf16 %v449_v31, %v447_v30  ;;  %v451_v36 = vld [vmem:[%s2065_s2 + $0xc8] sm:$0xff]  ;;  %v453_v37 = vld [vmem:[%s2065_s2 + $0xd8] sm:$0xff]  ;;  %v1448_v38 = vpack.c.bf16 %v448_v35, %v446_v34  ;;  %v450_v40 = vld [vmem:[%s2065_s2 + $0xc0] sm:$0xff]  ;;  %v621_v4 = vstv %s620_s20 }
  0x26   : > { %1435 = vmatprep.subr.bf16.mxu0 %v1434_v15  ;;  %v1450_v39 = vpack.c.bf16 %v453_v37, %v451_v36  ;;  %v452_v41 = vld [vmem:[%s2065_s2 + $0xd0] sm:$0xff]  ;;  %v455_v42 = vld [vmem:[%s2065_s2 + $0xe8] sm:$0xff]  ;;  %v457_v43 = vld [vmem:[%s2065_s2 + $0xf8] sm:$0xff]  ;;  %v784_v16 = vstv %s1250_s30  ;;  %s422_s30 = scalar_lea.vmem %s2075_s12, %s1242_s25 }
  0x27   : > { %v1452_v44 = vpack.c.bf16 %v452_v41, %v450_v40  ;;  %v1454_v45 = vpack.c.bf16 %v457_v43, %v455_v42  ;;  %v454_v46 = vld [vmem:[%s2065_s2 + $0xe0] sm:$0xff]  ;;  %v456_v47 = vld [vmem:[%s2065_s2 + $0xf0] sm:$0xff]  ;;  %v879_v11 = vld [vmem:[%s2069_s6 + $0x88] sm:$0xff] }
  0x28   : > { %v1456_v48 = vpack.c.bf16 %v456_v47, %v454_v46  ;;  %v1798_v49 = vld [vmem:[%s418_s14] sm:$0x7f]  ;;  %v863_v18 = vld [vmem:[%s2069_s6 + $0x8] sm:$0xff]  ;;  %v881_v22 = vld [vmem:[%s2069_s6 + $0x98] sm:$0xff] }
  0x29   : > { %1437 = vmatpush1.bf16.msra.mxu0 %v1436_v20  ;;  %v424_v50 = vld [vmem:[%s2064_s1] sm:$0x7f]  ;;  %v1251_v20 = vld [vmem:[%s2068_s5 + $0x8] sm:$0x7f]  ;;  %v865_v28 = vld [vmem:[%s2069_s6 + $0x18] sm:$0xff] }
  0x2a   : > { %1439 = vmatprep.subr.bf16.mxu0 %v1438_v21  ;;  %v425_v51 = vadd.f32 %v424_v50, %v1798_v49  ;;  %v458_v55 = vld [vmem:[%s2066_s3] sm:$0x3]  ;;  %v880_v21 = vld [vmem:[%s2069_s6 + $0x90] sm:$0xff]  ;;  %v883_v30 = vld [vmem:[%s2069_s6 + $0xa8] sm:$0xff] }
  0x2b   : > { %v463_v57 = vrot.slane %v458_v55, %v462_v54  ;;  %v467_v59 = vrot.slane %v458_v55, %v466_v56  ;;  %v623_v6 = vld [vmem:[%s2068_s5] sm:$0x7f]  ;;  %v867_v34 = vld [vmem:[%s2069_s6 + $0x28] sm:$0xff]  ;;  %v884_v35 = vld [vmem:[%s2069_s6 + $0xb0] sm:$0xff] }
  0x2c   : > { %v878_v10 = vld [vmem:[%s2069_s6 + $0x80] sm:$0xff]  ;;  %v885_v36 = vld [vmem:[%s2069_s6 + $0xb8] sm:$0xff]  ;;  %v887_v42 = vld [vmem:[%s2069_s6 + $0xc8] sm:$0xff] }
  0x2d   : > { %1441 = vmatpush1.bf16.msra.mxu0 %v1440_v26  ;;  %v1458_v12 = vpack.c.bf16 %v879_v11, %v878_v10  ;;  %v862_v17 = vld [vmem:[%s2069_s6] sm:$0xff]  ;;  %v1462_v26 = vpack.c.bf16 %v881_v22, %v880_v21  ;;  %v869_v40 = vld [vmem:[%s2069_s6 + $0x38] sm:$0xff]  ;;  %v871_v46 = vld [vmem:[%s2069_s6 + $0x48] sm:$0xff] }
  0x2e   : > { %1443 = vmatprep.subr.bf16.mxu0 %v1442_v27  ;;  %v1460_v24 = vpack.c.bf16 %v863_v18, %v862_v17  ;;  %v864_v27 = vld [vmem:[%s2069_s6 + $0x10] sm:$0xff]  ;;  %v882_v29 = vld [vmem:[%s2069_s6 + $0xa0] sm:$0xff]  ;;  %v873_v53 = vld [vmem:[%s2069_s6 + $0x58] sm:$0xff] }
  0x2f   : > { %v1464_v31 = vpack.c.bf16 %v865_v28, %v864_v27  ;;  %v886_v41 = vld [vmem:[%s2069_s6 + $0xc0] sm:$0xff]  ;;  %v888_v47 = vld [vmem:[%s2069_s6 + $0xd0] sm:$0xff]  ;;  %v891_v55 = vld [vmem:[%s2069_s6 + $0xe8] sm:$0xff] }
  0x30   : > { %v872_v52 = vld [vmem:[%s2069_s6 + $0x50] sm:$0xff]  ;;  %v890_v54 = vld [vmem:[%s2069_s6 + $0xe0] sm:$0xff] }
  0x31   : > { %1445 = vmatpush1.bf16.msra.mxu0 %v1444_v32  ;;  %v1466_v32 = vpack.c.bf16 %v883_v30, %v882_v29  ;;  %v1480_v56 = vpack.c.bf16 %v873_v53, %v872_v52  ;;  %v979_v11 = vld [vmem:[%s2071_s8 + $0x20] sm:$0xff]  ;;  %v989_v29 = vld [vmem:[%s2071_s8 + $0x70] sm:$0xff]  ;;  %v990_v30 = vld [vmem:[%s2071_s8 + $0x78] sm:$0xff] }
  0x32   : > { %1447 = vmatprep.subr.bf16.mxu0 %v1446_v33  ;;  %v866_v33 = vld [vmem:[%s2069_s6 + $0x20] sm:$0xff] }
  0x33   : > { %v1468_v37 = vpack.c.bf16 %v867_v34, %v866_v33  ;;  %v987_v27 = vld [vmem:[%s2071_s8 + $0x60] sm:$0xff]  ;;  %v1073_v33 = vld [vmem:[%s2073_s10 + $0x8] sm:$0xff]  ;;  %v1074_v34 = vld [vmem:[%s2073_s10 + $0x10] sm:$0xff] }
  0x34   : > { %v1254_v52 = vld [vmem:[%s2070_s7] ss:$0 sm:$0xff] }
  0x35   : > { %1449 = vmatpush1.bf16.msra.mxu0 %v1448_v38  ;;  %v1470_v38 = vpack.c.bf16 %v885_v36, %v884_v35  ;;  %v1075_v36 = vld [vmem:[%s2073_s10 + $0x18] sm:$0xff] }
  0x36   : > { %1451 = vmatprep.subr.bf16.mxu0 %v1450_v39  ;;  %v868_v39 = vld [vmem:[%s2069_s6 + $0x30] sm:$0xff] }
  0x37   : > { %v1472_v43 = vpack.c.bf16 %v869_v40, %v868_v39  ;;  %v1077_v39 = vld [vmem:[%s2073_s10 + $0x28] sm:$0xff] }
  0x39   : > { %1453 = vmatpush1.bf16.msra.mxu0 %v1452_v44  ;;  %v1474_v44 = vpack.c.bf16 %v887_v42, %v886_v41  ;;  %v1078_v41 = vld [vmem:[%s2073_s10 + $0x30] sm:$0xff]  ;;  %v1079_v42 = vld [vmem:[%s2073_s10 + $0x38] sm:$0xff] }
  0x3a   : > { %1455 = vmatprep.subr.bf16.mxu0 %v1454_v45  ;;  %v870_v45 = vld [vmem:[%s2069_s6 + $0x40] sm:$0xff] }
  0x3b   : > { %v1476_v50 = vpack.c.bf16 %v871_v46, %v870_v45  ;;  %v1081_v45 = vld [vmem:[%s2073_s10 + $0x48] sm:$0xff] }
  0x3d   : > { %1457 = vmatpush1.bf16.msra.mxu0 %v1456_v48  ;;  %v889_v48 = vld [vmem:[%s2069_s6 + $0xd8] sm:$0xff] }
  0x3e   : > { %1336 = vmatprep.subr.mxu0 %v1593_v7 }
  0x40   : > { %535 = vmatmul.mubr.f32.vlgmr.msra.gmra.mrb[0].mxu0 %v425_v51  ;;  %v1478_v51 = vpack.c.bf16 %v889_v48, %v888_v47  ;;  %v1082_v47 = vld [vmem:[%s2073_s10 + $0x50] sm:$0xff]  ;;  %v1083_v48 = vld [vmem:[%s2073_s10 + $0x58] sm:$0xff] }
  0x41   : > { %1338 = vmatprep.mubr.msk.f32.mxu0 %vm1594_vm0, %v1593_v7 }
 0x113   : > { %v536_v58 = vpop.f32.mrb[0].mxu0 }
 0x114   : > { %v537_v60 = vadd.f32 %v536_v58, %v463_v57  ;;  %v538_v61 = vpop.f32.mrb[1].mxu0  ;;  %v1482_v57 = vpack.c.bf16 %v891_v55, %v890_v54  ;;  %v874_v58 = vld [vmem:[%s2069_s6 + $0x60] sm:$0xff] }
 0x115   : > { %v539_v62 = vadd.f32 %v538_v61, %v467_v59  ;;  %v875_v59 = vld [vmem:[%s2069_s6 + $0x68] sm:$0xff]  ;;  %v893_v61 = vld [vmem:[%s2069_s6 + $0xf8] sm:$0xff] }
 0x116   : > { %705 = vrot.lane.b32.xlu0 %v537_v60, %s1595_s19  ;;  %1337 = vmatpush3.xpose.msk.msra.mxu0 %vm541_vm1, %v537_v60  ;;  %v892_v60 = vld [vmem:[%s2069_s6 + $0xf0] sm:$0xff] }
 0x117   : > { %1341 = vmatprep.subr.mxu0 %v1593_v7 }
 0x119   : > { %1339 = vmatmul.mubr.msk.f32.vlgmr.msra.gmra.mrb[2].mxu0 %vm541_vm1, %v539_v62 }
 0x11a   : > { %703 = vrot.lane.b32.xlu0 %v539_v62, %s1595_s19  ;;  %1343 = vmatprep.mubr.msk.f32.mxu0 %vm1594_vm0, %v1593_v7  ;;  %v1484_v62 = vpack.c.bf16 %v875_v59, %v874_v58  ;;  %v1084_v59 = vld [vmem:[%s2073_s10 + $0x60] sm:$0xff] }
 0x11b   : > { %1342 = vmatpush3.msk.msra.mxu0 %vm629_vm2, %v1798_v49 }
 0x188   : > { %v706_v63 = vpop.permute.xlu0 %705 }
 0x189   : > { %1347 = vmatpush3.xpose.msk.msra.mxu1 %vm541_vm1, %v706_v63  ;;  %v1486_v63 = vpack.c.bf16 %v893_v61, %v892_v60  ;;  %v1085_v60 = vld [vmem:[%s2073_s10 + $0x68] sm:$0xff] }
 0x18a   : > { %1351 = vmatprep.subr.mxu1 %v1593_v7  ;;  %v1533_v61 = vpack.c.bf16 %v1085_v60, %v1084_v59 }
 0x18c   : > { %v704_v0 = vpop.permute.xlu0 %703 }
 0x18d   : > { %1349 = vmatmul.mubr.msk.f32.vlgmr.msra.gmra.mrb[0].mxu1 %vm541_vm1, %v704_v0  ;;  %v876_v0 = vld [vmem:[%s2069_s6 + $0x70] sm:$0xff] }
 0x18e   : > { %1352 = vmatpush3.msk.msra.mxu1 %vm629_vm2, %v1798_v49  ;;  %1353 = vmatprep.mubr.msk.f32.mxu1 %vm1594_vm0, %v1593_v7 }
 0x18f   : > { %1459 = vmatprep.subr.bf16.mxu1 %v1458_v12  ;;  %v980_v12 = vld [vmem:[%s2071_s8 + $0x28] sm:$0xff] }
 0x1ec   : > { %v614_v1 = vpop.f32.mrb[2].mxu0 }
 0x1ed   : > { %v618_v2 = vmul.f32 0.015625, %v614_v1  ;;  %v1340_v3 = vpop.f32.mrb[3].mxu0  ;;  %v877_v1 = vld [vmem:[%s2069_s6 + $0x78] sm:$0xff] }
 0x1ee   : > { %v975_v3 = vld [vmem:[%s2071_s8] sm:$0xff] }
 0x1ef   : > { %1561 = vtanh.f32 %v618_v2  ;;  %v1488_v2 = vpack.c.bf16 %v877_v1, %v876_v0  ;;  %v1255_v1 = vld [vmem:[%s2072_s9] ss:$0 sm:$0xff] }
 0x1f9   : > { %v1562_v5 = vpop.eup %1561 }
 0x1fa   : > { %v622_v8 = vmul.f32 %v1562_v5, %v621_v4  ;;  %v976_v4 = vld [vmem:[%s2071_s8 + $0x8] sm:$0xff]  ;;  %v977_v5 = vld [vmem:[%s2071_s8 + $0x10] sm:$0xff] }
 0x1fc   : > { %v624_v9 = vadd.f32 %v623_v6, %v622_v8  ;;  %v1596_v6 = vmov 0.0|0.0   ;;  %v1491_v8 = vpack.c.bf16 %v976_v4, %v975_v3 }
 0x1fd   : > { %1490 = vmatprep.subr.bf16.mxu0 %v1596_v6 }
 0x1fe   : > { %1344 = vmatmul.mubr.msk.f32.vlgmr.msra.gmra.mrb[4].mxu0 %vm625_vm3, %v624_v9  ;;  %v978_v9 = vld [vmem:[%s2071_s8 + $0x18] sm:$0xff] }
 0x1ff   : > { %1388 = vmatprep.mubr.msk.f32.mxu0 %vm1594_vm0, %v1593_v7  ;;  %1492 = vmatpush3.bf16.msra.mxu0 %v1491_v8  ;;  %v1494_v10 = vpack.c.bf16 %v978_v9, %v977_v5  ;;  %v1256_v9 = vld [vmem:[%s2074_s11] ss:$0 sm:$0xff] }
 0x200   : > { %1493 = vmatprep.subr.bf16.mxu0 %v1596_v6 }
 0x203   : > { %1495 = vmatpush3.bf16.msra.mxu0 %v1494_v10 }
 0x204   : > { %1496 = vmatprep.subr.bf16.mxu0 %v1596_v6 }
 0x260   : > { %v777_v13 = vpop.f32.mrb[0].mxu1 }
 0x261   : > { %v781_v14 = vmul.f32 0.015625, %v777_v13  ;;  %v1350_v15 = vpop.f32.mrb[1].mxu1  ;;  %v1497_v13 = vpack.c.bf16 %v980_v12, %v979_v11 }
 0x262   : > { %v982_v15 = vld [vmem:[%s2071_s8 + $0x38] sm:$0xff] }
 0x263   : > { %1563 = vtanh.f32 %v781_v14  ;;  %v981_v14 = vld [vmem:[%s2071_s8 + $0x30] sm:$0xff]  ;;  %1498 = vmatpush3.bf16.msra.mxu0 %v1497_v13 }
 0x264   : > { %v1500_v18 = vpack.c.bf16 %v982_v15, %v981_v14  ;;  %1499 = vmatprep.subr.bf16.mxu0 %v1596_v6 }
 0x267   : > { %1501 = vmatpush3.bf16.msra.mxu0 %v1500_v18 }
 0x268   : > { %1502 = vmatprep.subr.bf16.mxu0 %v1596_v6 }
 0x26d   : > { %v1564_v19 = vpop.eup %1563 }
 0x26e   : > { %v785_v23 = vmul.f32 %v1564_v19, %v784_v16  ;;  %v983_v19 = vld [vmem:[%s2071_s8 + $0x40] sm:$0xff] }
 0x270   : > { %v788_v25 = vadd.f32 %v1251_v20, %v785_v23  ;;  %v984_v20 = vld [vmem:[%s2071_s8 + $0x48] sm:$0xff] }
 0x271   : > { %v1503_v21 = vpack.c.bf16 %v984_v20, %v983_v19 }
 0x272   : > { %1354 = vmatmul.mubr.msk.f32.vlgmr.msra.gmra.mrb[2].mxu1 %vm625_vm3, %v788_v25  ;;  %v986_v25 = vld [vmem:[%s2071_s8 + $0x58] sm:$0xff] }
 0x273   : > { %1461 = vmatpush3.bf16.msra.mxu1 %v1460_v24  ;;  %1504 = vmatpush3.bf16.msra.mxu0 %v1503_v21  ;;  %v985_v24 = vld [vmem:[%s2071_s8 + $0x50] sm:$0xff] }
 0x274   : > { %1463 = vmatprep.subr.bf16.mxu1 %v1462_v26  ;;  %1505 = vmatprep.subr.bf16.mxu0 %v1596_v6  ;;  %v1506_v26 = vpack.c.bf16 %v986_v25, %v985_v24 }
 0x277   : > { %1465 = vmatpush3.bf16.msra.mxu1 %v1464_v31  ;;  %1507 = vmatpush3.bf16.msra.mxu0 %v1506_v26  ;;  %v1512_v31 = vpack.c.bf16 %v990_v30, %v989_v29 }
 0x278   : > { %1467 = vmatprep.subr.bf16.mxu1 %v1466_v32  ;;  %1508 = vmatprep.subr.bf16.mxu0 %v1596_v6  ;;  %v1072_v32 = vld [vmem:[%s2073_s10] sm:$0xff] }
 0x279   : > { %v1515_v35 = vpack.c.bf16 %v1073_v33, %v1072_v32 }
 0x27b   : > { %1469 = vmatpush3.bf16.msra.mxu1 %v1468_v37  ;;  %v1518_v37 = vpack.c.bf16 %v1075_v36, %v1074_v34 }
 0x27c   : > { %1471 = vmatprep.subr.bf16.mxu1 %v1470_v38  ;;  %v1076_v38 = vld [vmem:[%s2073_s10 + $0x20] sm:$0xff] }
 0x27d   : > { %v1521_v40 = vpack.c.bf16 %v1077_v39, %v1076_v38 }
 0x27f   : > { %1473 = vmatpush3.bf16.msra.mxu1 %v1472_v43  ;;  %v1524_v43 = vpack.c.bf16 %v1079_v42, %v1078_v41 }
 0x280   : > { %1475 = vmatprep.subr.bf16.mxu1 %v1474_v44  ;;  %v1080_v44 = vld [vmem:[%s2073_s10 + $0x40] sm:$0xff] }
 0x281   : > { %v1527_v46 = vpack.c.bf16 %v1081_v45, %v1080_v44 }
 0x283   : > { %1477 = vmatpush3.bf16.msra.mxu1 %v1476_v50  ;;  %v1530_v50 = vpack.c.bf16 %v1083_v48, %v1082_v47 }
 0x284   : > { %1479 = vmatprep.subr.bf16.mxu1 %v1478_v51 }
 0x287   : > { %1481 = vmatpush3.bf16.msra.mxu1 %v1480_v56 }
 0x288   : > { %1483 = vmatprep.subr.bf16.mxu1 %v1482_v57 }
 0x28b   : > { %1485 = vmatpush3.bf16.msra.mxu1 %v1484_v62  ;;  %v1086_v62 = vld [vmem:[%s2073_s10 + $0x70] sm:$0xff] }
 0x28c   : > { %1487 = vmatprep.subr.bf16.mxu1 %v1486_v63  ;;  %v1087_v63 = vld [vmem:[%s2073_s10 + $0x78] sm:$0xff] }
 0x28d   : > { %v1536_v0 = vpack.c.bf16 %v1087_v63, %v1086_v62 }
 0x28f   : > { %1489 = vmatpush3.bf16.msra.mxu1 %v1488_v2 }
 0x290   : > { %1514 = vmatprep.subr.bf16.mxu1 %v1596_v6 }
 0x2d1   : > { %v699_v16 = vpop.f32.mrb[4].mxu0 }
 0x2d2   : > { %v1345_v17 = vpop.f32.mrb[5].mxu0 }
 0x345   : > { %v858_v22 = vpop.f32.mrb[2].mxu1 }
 0x346   : > { %v1355_v23 = vpop.f32.mrb[3].mxu1  ;;  %965 = vmatprep.mubr.f32.mxu1 %v858_v22 }
 0x347   : > { %966 = vmatmul.mubr.f32.vlgmr.msra.gmra.mrb[4].mxu1 %v699_v16 }
 0x348   : > { %1423 = vmatprep.mubr.msk.f32.mxu1 %vm1594_vm0, %v1593_v7  ;;  %v988_v7 = vld [vmem:[%s2071_s8 + $0x68] sm:$0xff]  ;;  %1516 = vmatpush3.bf16.msra.mxu1 %v1515_v35 }
 0x349   : > { %v1509_v28 = vpack.c.bf16 %v988_v7, %v987_v27  ;;  %1517 = vmatprep.subr.bf16.mxu1 %v1596_v6 }
 0x34b   : > { %1510 = vmatpush3.bf16.msra.mxu0 %v1509_v28 }
 0x34c   : > { %1511 = vmatprep.subr.bf16.mxu0 %v1596_v6  ;;  %1519 = vmatpush3.bf16.msra.mxu1 %v1518_v37 }
 0x34d   : > { %1520 = vmatprep.subr.bf16.mxu1 %v1596_v6 }
 0x34f   : > { %1513 = vmatpush3.bf16.msra.mxu0 %v1512_v31 }
 0x350   : > { %1522 = vmatpush3.bf16.msra.mxu1 %v1521_v40 }
 0x351   : > { %1523 = vmatprep.subr.bf16.mxu1 %v1596_v6 }
 0x354   : > { %1525 = vmatpush3.bf16.msra.mxu1 %v1524_v43 }
 0x355   : > { %1526 = vmatprep.subr.bf16.mxu1 %v1596_v6 }
 0x358   : > { %1528 = vmatpush3.bf16.msra.mxu1 %v1527_v46 }
 0x359   : > { %1529 = vmatprep.subr.bf16.mxu1 %v1596_v6 }
 0x35c   : > { %1531 = vmatpush3.bf16.msra.mxu1 %v1530_v50 }
 0x35d   : > { %1532 = vmatprep.subr.bf16.mxu1 %v1596_v6 }
 0x360   : > { %1534 = vmatpush3.bf16.msra.mxu1 %v1533_v61 }
 0x361   : > { %1535 = vmatprep.subr.bf16.mxu1 %v1596_v6 }
 0x364   : > { %1537 = vmatpush3.bf16.msra.mxu1 %v1536_v0 }
 0x41a   : > { %v1299_v51 = vpop.f32.mrb[4].mxu1 }
 0x41b   : > { %v1300_v53 = vpop.f32.mrb[5].mxu1 }
 0x41c   : > { %v1301_v54 = vadd.f32 %v1300_v53, %v1299_v51 }
 0x41e   : > { %v968_v55 = vadd.f32 %v1301_v54, %v1254_v52 }
 0x420   : > { %v971_v56 = vadd.f32 %v968_v55, %v1798_v49 }
 0x422   : > { %vm972_vm4 = vcmp.ge.f32.partialorder %v971_v56, 0.0  ;;  %v973_v57 = vmul.f32 0.1, %v971_v56 }
 0x424   : > { %v974_v58 = vsel %vm972_vm4, %v971_v56, %v973_v57 }
 0x425   : > { %1389 = vmatmul.mubr.f32.vlgmr.msra.gmra.mrb[6].mxu0 %v974_v58 }
 0x4f8   : > { %v1064_v2 = vpop.f32.mrb[6].mxu0 }
 0x4f9   : > { %v1065_v3 = vadd.f32 %v1255_v1, %v1064_v2  ;;  %v1390_v4 = vpop.f32.mrb[7].mxu0 }
 0x4fb   : > { %v1068_v5 = vadd.f32 %v1065_v3, %v1798_v49 }
 0x4fd   : > { %v1070_v6 = vmul.f32 0.1, %v1068_v5  ;;  %vm1069_vm5 = vcmp.ge.f32.partialorder %v1068_v5, 0.0 }
 0x4ff   : > { %v1071_v8 = vsel %vm1069_vm5, %v1068_v5, %v1070_v6 }
 0x500   : > { %1424 = vmatmul.mubr.f32.vlgmr.msra.gmra.mrb[6].mxu1 %v1071_v8 }
 0x5d3   : > { %v1161_v10 = vpop.f32.mrb[6].mxu1 }
 0x5d4   : > { %v1162_v11 = vadd.f32 %v1256_v9, %v1161_v10  ;;  %v1425_v12 = vpop.f32.mrb[7].mxu1 }
 0x5d6   : > { %v1165_v13 = vadd.f32 %v1162_v11, %v1071_v8 }
 0x5d8   : > { %vm1166_vm6 = vcmp.ge.f32.partialorder %v1165_v13, 0.0  ;;  %v1167_v14 = vmul.f32 0.1, %v1165_v13 }
 0x5da   : > { %v1168_v49 = vsel %vm1166_vm6, %v1165_v13, %v1167_v14 }
 0x5db   : > { %1169 = vst [vmem:[%s422_s30] sm:$0x7f] %v1168_v49 }
 0x5dc PF: > { %s23_s21 = sadd.s32 1, %s1590_s21  }
 0x5dd   : > { %p20_p1 = scmp.ge.s32.totalorder %s23_s21, 4  }
 0x5df   :  { %22 = sbr.rel (!%p20_p1) target bundleno = 1 (0x1), region = 104 }
 0x5e6   :  { %1189 = vsyncpa [#allocation3], 1 }
 0x5e7   :  { %1191 = vsyncpa [#allocation3 + $0x1], 1 }

// kernel: _lambda_.13
= control target key start
LH: loop header
LB: loop body
LE: loop exit
PB: predicated region body
PF: predicated region fallthrough
CT: control target
= control target key end

     0   :  { %17 = vsyncpa [#allocation3], 0  ;;  %s1662_s21 = smov 0   ;;  %s2063_s0 = inlined_call_operand.vmem [shape: f32[2,6,128], index: 0, kind: input, shape index: {}]   ;;  %s2064_s1 = inlined_call_operand.vmem [shape: f32[6,128], index: 1, kind: input, shape index: {}]   ;;  %s2065_s2 = inlined_call_operand.vmem [shape: f32[128,256], index: 2, kind: input, shape index: {}]   ;;  %s2066_s3 = inlined_call_operand.vmem [shape: f32[1,256], index: 3, kind: input, shape index: {}]   ;;  %s2067_s4 = inlined_call_operand.vmem [shape: f32[2], index: 4, kind: input, shape index: {}]   ;;  %s2068_s5 = inlined_call_operand.vmem [shape: f32[2,6,6], index: 5, kind: input, shape index: {}]   ;;  %s2069_s6 = inlined_call_operand.vmem [shape: f32[256,128], index: 6, kind: input, shape index: {}]   ;;  %s2070_s7 = inlined_call_operand.vmem [shape: f32[1,128], index: 7, kind: input, shape index: {}]   ;;  %s2071_s8 = inlined_call_operand.vmem [shape: f32[128,128], index: 8, kind: input, shape index: {}]   ;;  %s2072_s9 = inlined_call_operand.vmem [shape: f32[1,128], index: 9, kind: input, shape index: {}]   ;;  %s2073_s10 = inlined_call_operand.vmem [shape: f32[128,128], index: 10, kind: input, shape index: {}]   ;;  %s2074_s11 = inlined_call_operand.vmem [shape: f32[1,128], index: 11, kind: input, shape index: {}]   ;;  %s2075_s12 = inlined_call_operand.vmem [shape: f32[2,6,128], index: 12, kind: output, shape index: {}]  }
   0x1 LB: > { %s1668_s22 = sadd.s32 4294967295, %s1590_s21   ;;  %p1237_p0 = scmp.ge.s32.totalorder %s1590_s21, 1  ;;  %s1590_s21 = sphi %s1662_s21, %s23_s21  }
   0x2   : > { %p311_p1 = scmp.lt.s32.totalorder %s1590_s21, 3  ;;  %s333_s25 = sshll.u32 %s2067_s4, 4  ;;  %s334_s25 = int_to_ptr.vmem [resolvable:$true] %s333_s25 }
   0x3   : > { %p1546_p3 = scmp.eq.s32.totalorder %s1668_s22, 0  ;;  %s1565_s27 = scalar_lea.vmem %s334_s25, 16 }
   0x4   : > { %p1675_p2 = pnand %p1237_p0, %p311_p1  ;;  %p1566_p6 = scmp.ne.s32.totalorder %s334_s25, %s1565_s27 }
   0x5   : > { %p1573_p10 = scmp.lt.s32.totalorder %s334_s25, %s334_s25  ;;  %p1574_p11 = scmp.lt.s32.totalorder %s1565_s27, %s1565_s27 }
   0x6   : > { %p1542_p4 = pneg %p1675_p2 }
   0x7   : > { %p1575_p12 = por %p1574_p11, %p1573_p10 }
   0x8   : > { %p1543_p5 = pnand %p1546_p3, %p1542_p4 }
   0xa   : > { %p1567_p7 = pneg %p1543_p5 }
   0xc   : > { %p1568_p8 = pnand %p1567_p7, %p1566_p6 }
   0xe   : > { %p1569_p9 = pneg %p1568_p8 }
  0x10   : > { %p1576_p13 = pnand %p1575_p12, %p1569_p9 }
  0x12   : > { %1579 = shalt.err (!%p1576_p13)
}
  0x13   : > { %s1592_s28 = smov [#allocation2]   ;;  %374 = sbr.rel (%p1675_p2) target bundleno = 1500 (0x5dc), region = 68 }
  0x14   : > { %1545 = dma.vmem_to_smem (!%p1543_p5), %s334_s25, 16, %s1592_s28, [#allocation3]  }
  0x1a   : > { %1585 = dma.done.wait (%p1546_p3), [#allocation3], 16  }
  0x1b   : > { %1587 = vsyncadd (%p1546_p3), [#allocation3], 4294967280 }
  0x1c   : > { %380 = sfence }
  0x1d   : > { %v427_v0 = vld [vmem:[%s2065_s2 + $0x8] sm:$0xff]  ;;  %v429_v1 = vld [vmem:[%s2065_s2 + $0x18] sm:$0xff]  ;;  %v426_v2 = vld [vmem:[%s2065_s2] sm:$0xff]  ;;  %v1593_v7 = vmov 0.0   ;;  %p415_p0 = scmp.lt.s32.totalorder %s1668_s22, 1  ;;  %vm1594_vm0 = vmmov 0   ;;  %v460_v52 = vlaneseq }
  0x1e   : > { %v1426_v3 = vpack.c.bf16 %v429_v1, %v427_v0  ;;  %v428_v4 = vld [vmem:[%s2065_s2 + $0x10] sm:$0xff]  ;;  %v431_v5 = vld [vmem:[%s2065_s2 + $0x28] sm:$0xff]  ;;  %v433_v6 = vld [vmem:[%s2065_s2 + $0x38] sm:$0xff]  ;;  %534 = vmatprep.mubr.f32.mxu0 %v1593_v7  ;;  %1346 = vmatprep.subr.mxu1 %v1593_v7  ;;  %vm541_vm1 = vcmask 523264   ;;  %s1595_s19 = smov 64   ;;  %vm629_vm2 = vcmask 1045504  }
  0x1f   : > { %v1428_v8 = vpack.c.bf16 %v428_v4, %v426_v2  ;;  %v1430_v9 = vpack.c.bf16 %v433_v6, %v431_v5  ;;  %v430_v10 = vld [vmem:[%s2065_s2 + $0x20] sm:$0xff]  ;;  %v432_v11 = vld [vmem:[%s2065_s2 + $0x30] sm:$0xff]  ;;  %v435_v12 = vld [vmem:[%s2065_s2 + $0x48] sm:$0xff]  ;;  %s2078_s22 = smov (!%p415_p0, %s1668_s22), 1  ;;  %1348 = vmatprep.mubr.msk.f32.mxu1 %vm1594_vm0, %v1593_v7  ;;  %v461_v53 = vshrl.u32 %v460_v52, 7  ;;  %s620_s20 = sld [smem:[#allocation2]] }
  0x20   : > { %1427 = vmatprep.subr.bf16.mxu0 %v1426_v3  ;;  %v437_v13 = vld [vmem:[%s2065_s2 + $0x58] sm:$0xff]  ;;  %v1432_v14 = vpack.c.bf16 %v432_v11, %v430_v10  ;;  %v434_v16 = vld [vmem:[%s2065_s2 + $0x40] sm:$0xff]  ;;  %v436_v17 = vld [vmem:[%s2065_s2 + $0x50] sm:$0xff]  ;;  %s1242_s25 = sshll.u32 %s2078_s22, 3  ;;  %vm625_vm3 = vcmask 48128   ;;  %s1250_s30 = sld [smem:[#allocation2 + $0x1]] }
  0x21   : > { %1429 = vmatpush1.bf16.msra.mxu0 %v1428_v8  ;;  %v1434_v15 = vpack.c.bf16 %v437_v13, %v435_v12  ;;  %v439_v18 = vld [vmem:[%s2065_s2 + $0x68] sm:$0xff]  ;;  %v441_v19 = vld [vmem:[%s2065_s2 + $0x78] sm:$0xff]  ;;  %v1436_v20 = vpack.c.bf16 %v436_v17, %v434_v16  ;;  %v438_v22 = vld [vmem:[%s2065_s2 + $0x60] sm:$0xff]  ;;  %s418_s14 = scalar_lea.vmem %s2063_s0, %s1242_s25  ;;  %v462_v54 = vsub.s32 0, %v461_v53  ;;  %v466_v56 = vsub.s32 1, %v461_v53 }
  0x22   : > { %1431 = vmatprep.subr.bf16.mxu0 %v1430_v9  ;;  %v1438_v21 = vpack.c.bf16 %v441_v19, %v439_v18  ;;  %v440_v23 = vld [vmem:[%s2065_s2 + $0x70] sm:$0xff]  ;;  %v443_v24 = vld [vmem:[%s2065_s2 + $0x88] sm:$0xff]  ;;  %v445_v25 = vld [vmem:[%s2065_s2 + $0x98] sm:$0xff] }
  0x23   : > { %v1440_v26 = vpack.c.bf16 %v440_v23, %v438_v22  ;;  %v1442_v27 = vpack.c.bf16 %v445_v25, %v443_v24  ;;  %v442_v28 = vld [vmem:[%s2065_s2 + $0x80] sm:$0xff]  ;;  %v444_v29 = vld [vmem:[%s2065_s2 + $0x90] sm:$0xff]  ;;  %v447_v30 = vld [vmem:[%s2065_s2 + $0xa8] sm:$0xff] }
  0x24   : > { %v449_v31 = vld [vmem:[%s2065_s2 + $0xb8] sm:$0xff]  ;;  %v1444_v32 = vpack.c.bf16 %v444_v29, %v442_v28  ;;  %v446_v34 = vld [vmem:[%s2065_s2 + $0xa0] sm:$0xff]  ;;  %v448_v35 = vld [vmem:[%s2065_s2 + $0xb0] sm:$0xff] }
  0x25   : > { %1433 = vmatpush1.bf16.msra.mxu0 %v1432_v14  ;;  %v1446_v33 = vpack.c.bf16 %v449_v31, %v447_v30  ;;  %v451_v36 = vld [vmem:[%s2065_s2 + $0xc8] sm:$0xff]  ;;  %v453_v37 = vld [vmem:[%s2065_s2 + $0xd8] sm:$0xff]  ;;  %v1448_v38 = vpack.c.bf16 %v448_v35, %v446_v34  ;;  %v450_v40 = vld [vmem:[%s2065_s2 + $0xc0] sm:$0xff]  ;;  %v621_v4 = vstv %s620_s20 }
  0x26   : > { %1435 = vmatprep.subr.bf16.mxu0 %v1434_v15  ;;  %v1450_v39 = vpack.c.bf16 %v453_v37, %v451_v36  ;;  %v452_v41 = vld [vmem:[%s2065_s2 + $0xd0] sm:$0xff]  ;;  %v455_v42 = vld [vmem:[%s2065_s2 + $0xe8] sm:$0xff]  ;;  %v457_v43 = vld [vmem:[%s2065_s2 + $0xf8] sm:$0xff]  ;;  %v784_v16 = vstv %s1250_s30  ;;  %s422_s30 = scalar_lea.vmem %s2075_s12, %s1242_s25 }
  0x27   : > { %v1452_v44 = vpack.c.bf16 %v452_v41, %v450_v40  ;;  %v1454_v45 = vpack.c.bf16 %v457_v43, %v455_v42  ;;  %v454_v46 = vld [vmem:[%s2065_s2 + $0xe0] sm:$0xff]  ;;  %v456_v47 = vld [vmem:[%s2065_s2 + $0xf0] sm:$0xff]  ;;  %v879_v11 = vld [vmem:[%s2069_s6 + $0x88] sm:$0xff] }
  0x28   : > { %v1456_v48 = vpack.c.bf16 %v456_v47, %v454_v46  ;;  %v1798_v49 = vld [vmem:[%s418_s14] sm:$0x3f]  ;;  %v863_v18 = vld [vmem:[%s2069_s6 + $0x8] sm:$0xff]  ;;  %v881_v22 = vld [vmem:[%s2069_s6 + $0x98] sm:$0xff] }
  0x29   : > { %1437 = vmatpush1.bf16.msra.mxu0 %v1436_v20  ;;  %v424_v50 = vld [vmem:[%s2064_s1] sm:$0x3f]  ;;  %v1251_v20 = vld [vmem:[%s2068_s5 + $0x8] sm:$0x3f]  ;;  %v865_v28 = vld [vmem:[%s2069_s6 + $0x18] sm:$0xff] }
  0x2a   : > { %1439 = vmatprep.subr.bf16.mxu0 %v1438_v21  ;;  %v425_v51 = vadd.f32 %v424_v50, %v1798_v49  ;;  %v458_v55 = vld [vmem:[%s2066_s3] sm:$0x3]  ;;  %v880_v21 = vld [vmem:[%s2069_s6 + $0x90] sm:$0xff]  ;;  %v883_v30 = vld [vmem:[%s2069_s6 + $0xa8] sm:$0xff] }
  0x2b   : > { %v463_v57 = vrot.slane %v458_v55, %v462_v54  ;;  %v467_v59 = vrot.slane %v458_v55, %v466_v56  ;;  %v623_v6 = vld [vmem:[%s2068_s5] sm:$0x3f]  ;;  %v867_v34 = vld [vmem:[%s2069_s6 + $0x28] sm:$0xff]  ;;  %v884_v35 = vld [vmem:[%s2069_s6 + $0xb0] sm:$0xff] }
  0x2c   : > { %v878_v10 = vld [vmem:[%s2069_s6 + $0x80] sm:$0xff]  ;;  %v885_v36 = vld [vmem:[%s2069_s6 + $0xb8] sm:$0xff]  ;;  %v887_v42 = vld [vmem:[%s2069_s6 + $0xc8] sm:$0xff] }
  0x2d   : > { %1441 = vmatpush1.bf16.msra.mxu0 %v1440_v26  ;;  %v1458_v12 = vpack.c.bf16 %v879_v11, %v878_v10  ;;  %v862_v17 = vld [vmem:[%s2069_s6] sm:$0xff]  ;;  %v1462_v26 = vpack.c.bf16 %v881_v22, %v880_v21  ;;  %v869_v40 = vld [vmem:[%s2069_s6 + $0x38] sm:$0xff]  ;;  %v871_v46 = vld [vmem:[%s2069_s6 + $0x48] sm:$0xff] }
  0x2e   : > { %1443 = vmatprep.subr.bf16.mxu0 %v1442_v27  ;;  %v1460_v24 = vpack.c.bf16 %v863_v18, %v862_v17  ;;  %v864_v27 = vld [vmem:[%s2069_s6 + $0x10] sm:$0xff]  ;;  %v882_v29 = vld [vmem:[%s2069_s6 + $0xa0] sm:$0xff]  ;;  %v873_v53 = vld [vmem:[%s2069_s6 + $0x58] sm:$0xff] }
  0x2f   : > { %v1464_v31 = vpack.c.bf16 %v865_v28, %v864_v27  ;;  %v886_v41 = vld [vmem:[%s2069_s6 + $0xc0] sm:$0xff]  ;;  %v888_v47 = vld [vmem:[%s2069_s6 + $0xd0] sm:$0xff]  ;;  %v891_v55 = vld [vmem:[%s2069_s6 + $0xe8] sm:$0xff] }
  0x30   : > { %v872_v52 = vld [vmem:[%s2069_s6 + $0x50] sm:$0xff]  ;;  %v890_v54 = vld [vmem:[%s2069_s6 + $0xe0] sm:$0xff] }
  0x31   : > { %1445 = vmatpush1.bf16.msra.mxu0 %v1444_v32  ;;  %v1466_v32 = vpack.c.bf16 %v883_v30, %v882_v29  ;;  %v1480_v56 = vpack.c.bf16 %v873_v53, %v872_v52  ;;  %v979_v11 = vld [vmem:[%s2071_s8 + $0x20] sm:$0xff]  ;;  %v989_v29 = vld [vmem:[%s2071_s8 + $0x70] sm:$0xff]  ;;  %v990_v30 = vld [vmem:[%s2071_s8 + $0x78] sm:$0xff] }
  0x32   : > { %1447 = vmatprep.subr.bf16.mxu0 %v1446_v33  ;;  %v866_v33 = vld [vmem:[%s2069_s6 + $0x20] sm:$0xff] }
  0x33   : > { %v1468_v37 = vpack.c.bf16 %v867_v34, %v866_v33  ;;  %v987_v27 = vld [vmem:[%s2071_s8 + $0x60] sm:$0xff]  ;;  %v1073_v33 = vld [vmem:[%s2073_s10 + $0x8] sm:$0xff]  ;;  %v1074_v34 = vld [vmem:[%s2073_s10 + $0x10] sm:$0xff] }
  0x34   : > { %v1254_v52 = vld [vmem:[%s2070_s7] ss:$0 sm:$0xff] }
  0x35   : > { %1449 = vmatpush1.bf16.msra.mxu0 %v1448_v38  ;;  %v1470_v38 = vpack.c.bf16 %v885_v36, %v884_v35  ;;  %v1075_v36 = vld [vmem:[%s2073_s10 + $0x18] sm:$0xff] }
  0x36   : > { %1451 = vmatprep.subr.bf16.mxu0 %v1450_v39  ;;  %v868_v39 = vld [vmem:[%s2069_s6 + $0x30] sm:$0xff] }
  0x37   : > { %v1472_v43 = vpack.c.bf16 %v869_v40, %v868_v39  ;;  %v1077_v39 = vld [vmem:[%s2073_s10 + $0x28] sm:$0xff] }
  0x39   : > { %1453 = vmatpush1.bf16.msra.mxu0 %v1452_v44  ;;  %v1474_v44 = vpack.c.bf16 %v887_v42, %v886_v41  ;;  %v1078_v41 = vld [vmem:[%s2073_s10 + $0x30] sm:$0xff]  ;;  %v1079_v42 = vld [vmem:[%s2073_s10 + $0x38] sm:$0xff] }
  0x3a   : > { %1455 = vmatprep.subr.bf16.mxu0 %v1454_v45  ;;  %v870_v45 = vld [vmem:[%s2069_s6 + $0x40] sm:$0xff] }
  0x3b   : > { %v1476_v50 = vpack.c.bf16 %v871_v46, %v870_v45  ;;  %v1081_v45 = vld [vmem:[%s2073_s10 + $0x48] sm:$0xff] }
  0x3d   : > { %1457 = vmatpush1.bf16.msra.mxu0 %v1456_v48  ;;  %v889_v48 = vld [vmem:[%s2069_s6 + $0xd8] sm:$0xff] }
  0x3e   : > { %1336 = vmatprep.subr.mxu0 %v1593_v7 }
  0x40   : > { %535 = vmatmul.mubr.f32.vlgmr.msra.gmra.mrb[0].mxu0 %v425_v51  ;;  %v1478_v51 = vpack.c.bf16 %v889_v48, %v888_v47  ;;  %v1082_v47 = vld [vmem:[%s2073_s10 + $0x50] sm:$0xff]  ;;  %v1083_v48 = vld [vmem:[%s2073_s10 + $0x58] sm:$0xff] }
  0x41   : > { %1338 = vmatprep.mubr.msk.f32.mxu0 %vm1594_vm0, %v1593_v7 }
 0x113   : > { %v536_v58 = vpop.f32.mrb[0].mxu0 }
 0x114   : > { %v537_v60 = vadd.f32 %v536_v58, %v463_v57  ;;  %v538_v61 = vpop.f32.mrb[1].mxu0  ;;  %v1482_v57 = vpack.c.bf16 %v891_v55, %v890_v54  ;;  %v874_v58 = vld [vmem:[%s2069_s6 + $0x60] sm:$0xff] }
 0x115   : > { %v539_v62 = vadd.f32 %v538_v61, %v467_v59  ;;  %v875_v59 = vld [vmem:[%s2069_s6 + $0x68] sm:$0xff]  ;;  %v893_v61 = vld [vmem:[%s2069_s6 + $0xf8] sm:$0xff] }
 0x116   : > { %705 = vrot.lane.b32.xlu0 %v537_v60, %s1595_s19  ;;  %1337 = vmatpush3.xpose.msk.msra.mxu0 %vm541_vm1, %v537_v60  ;;  %v892_v60 = vld [vmem:[%s2069_s6 + $0xf0] sm:$0xff] }
 0x117   : > { %1341 = vmatprep.subr.mxu0 %v1593_v7 }
 0x119   : > { %1339 = vmatmul.mubr.msk.f32.vlgmr.msra.gmra.mrb[2].mxu0 %vm541_vm1, %v539_v62 }
 0x11a   : > { %703 = vrot.lane.b32.xlu0 %v539_v62, %s1595_s19  ;;  %1343 = vmatprep.mubr.msk.f32.mxu0 %vm1594_vm0, %v1593_v7  ;;  %v1484_v62 = vpack.c.bf16 %v875_v59, %v874_v58  ;;  %v1084_v59 = vld [vmem:[%s2073_s10 + $0x60] sm:$0xff] }
 0x11b   : > { %1342 = vmatpush3.msk.msra.mxu0 %vm629_vm2, %v1798_v49 }
 0x188   : > { %v706_v63 = vpop.permute.xlu0 %705 }
 0x189   : > { %1347 = vmatpush3.xpose.msk.msra.mxu1 %vm541_vm1, %v706_v63  ;;  %v1486_v63 = vpack.c.bf16 %v893_v61, %v892_v60  ;;  %v1085_v60 = vld [vmem:[%s2073_s10 + $0x68] sm:$0xff] }
 0x18a   : > { %1351 = vmatprep.subr.mxu1 %v1593_v7  ;;  %v1533_v61 = vpack.c.bf16 %v1085_v60, %v1084_v59 }
 0x18c   : > { %v704_v0 = vpop.permute.xlu0 %703 }
 0x18d   : > { %1349 = vmatmul.mubr.msk.f32.vlgmr.msra.gmra.mrb[0].mxu1 %vm541_vm1, %v704_v0  ;;  %v876_v0 = vld [vmem:[%s2069_s6 + $0x70] sm:$0xff] }
 0x18e   : > { %1352 = vmatpush3.msk.msra.mxu1 %vm629_vm2, %v1798_v49  ;;  %1353 = vmatprep.mubr.msk.f32.mxu1 %vm1594_vm0, %v1593_v7 }
 0x18f   : > { %1459 = vmatprep.subr.bf16.mxu1 %v1458_v12  ;;  %v980_v12 = vld [vmem:[%s2071_s8 + $0x28] sm:$0xff] }
 0x1ec   : > { %v614_v1 = vpop.f32.mrb[2].mxu0 }
 0x1ed   : > { %v618_v2 = vmul.f32 0.015625, %v614_v1  ;;  %v1340_v3 = vpop.f32.mrb[3].mxu0  ;;  %v877_v1 = vld [vmem:[%s2069_s6 + $0x78] sm:$0xff] }
 0x1ee   : > { %v975_v3 = vld [vmem:[%s2071_s8] sm:$0xff] }
 0x1ef   : > { %1561 = vtanh.f32 %v618_v2  ;;  %v1488_v2 = vpack.c.bf16 %v877_v1, %v876_v0  ;;  %v1255_v1 = vld [vmem:[%s2072_s9] ss:$0 sm:$0xff] }
 0x1f9   : > { %v1562_v5 = vpop.eup %1561 }
 0x1fa   : > { %v622_v8 = vmul.f32 %v1562_v5, %v621_v4  ;;  %v976_v4 = vld [vmem:[%s2071_s8 + $0x8] sm:$0xff]  ;;  %v977_v5 = vld [vmem:[%s2071_s8 + $0x10] sm:$0xff] }
 0x1fc   : > { %v624_v9 = vadd.f32 %v623_v6, %v622_v8  ;;  %v1596_v6 = vmov 0.0|0.0   ;;  %v1491_v8 = vpack.c.bf16 %v976_v4, %v975_v3 }
 0x1fd   : > { %1490 = vmatprep.subr.bf16.mxu0 %v1596_v6 }
 0x1fe   : > { %1344 = vmatmul.mubr.msk.f32.vlgmr.msra.gmra.mrb[4].mxu0 %vm625_vm3, %v624_v9  ;;  %v978_v9 = vld [vmem:[%s2071_s8 + $0x18] sm:$0xff] }
 0x1ff   : > { %1388 = vmatprep.mubr.msk.f32.mxu0 %vm1594_vm0, %v1593_v7  ;;  %1492 = vmatpush3.bf16.msra.mxu0 %v1491_v8  ;;  %v1494_v10 = vpack.c.bf16 %v978_v9, %v977_v5  ;;  %v1256_v9 = vld [vmem:[%s2074_s11] ss:$0 sm:$0xff] }
 0x200   : > { %1493 = vmatprep.subr.bf16.mxu0 %v1596_v6 }
 0x203   : > { %1495 = vmatpush3.bf16.msra.mxu0 %v1494_v10 }
 0x204   : > { %1496 = vmatprep.subr.bf16.mxu0 %v1596_v6 }
 0x260   : > { %v777_v13 = vpop.f32.mrb[0].mxu1 }
 0x261   : > { %v781_v14 = vmul.f32 0.015625, %v777_v13  ;;  %v1350_v15 = vpop.f32.mrb[1].mxu1  ;;  %v1497_v13 = vpack.c.bf16 %v980_v12, %v979_v11 }
 0x262   : > { %v982_v15 = vld [vmem:[%s2071_s8 + $0x38] sm:$0xff] }
 0x263   : > { %1563 = vtanh.f32 %v781_v14  ;;  %v981_v14 = vld [vmem:[%s2071_s8 + $0x30] sm:$0xff]  ;;  %1498 = vmatpush3.bf16.msra.mxu0 %v1497_v13 }
 0x264   : > { %v1500_v18 = vpack.c.bf16 %v982_v15, %v981_v14  ;;  %1499 = vmatprep.subr.bf16.mxu0 %v1596_v6 }
 0x267   : > { %1501 = vmatpush3.bf16.msra.mxu0 %v1500_v18 }
 0x268   : > { %1502 = vmatprep.subr.bf16.mxu0 %v1596_v6 }
 0x26d   : > { %v1564_v19 = vpop.eup %1563 }
 0x26e   : > { %v785_v23 = vmul.f32 %v1564_v19, %v784_v16  ;;  %v983_v19 = vld [vmem:[%s2071_s8 + $0x40] sm:$0xff] }
 0x270   : > { %v788_v25 = vadd.f32 %v1251_v20, %v785_v23  ;;  %v984_v20 = vld [vmem:[%s2071_s8 + $0x48] sm:$0xff] }
 0x271   : > { %v1503_v21 = vpack.c.bf16 %v984_v20, %v983_v19 }
 0x272   : > { %1354 = vmatmul.mubr.msk.f32.vlgmr.msra.gmra.mrb[2].mxu1 %vm625_vm3, %v788_v25  ;;  %v986_v25 = vld [vmem:[%s2071_s8 + $0x58] sm:$0xff] }
 0x273   : > { %1461 = vmatpush3.bf16.msra.mxu1 %v1460_v24  ;;  %1504 = vmatpush3.bf16.msra.mxu0 %v1503_v21  ;;  %v985_v24 = vld [vmem:[%s2071_s8 + $0x50] sm:$0xff] }
 0x274   : > { %1463 = vmatprep.subr.bf16.mxu1 %v1462_v26  ;;  %1505 = vmatprep.subr.bf16.mxu0 %v1596_v6  ;;  %v1506_v26 = vpack.c.bf16 %v986_v25, %v985_v24 }
 0x277   : > { %1465 = vmatpush3.bf16.msra.mxu1 %v1464_v31  ;;  %1507 = vmatpush3.bf16.msra.mxu0 %v1506_v26  ;;  %v1512_v31 = vpack.c.bf16 %v990_v30, %v989_v29 }
 0x278   : > { %1467 = vmatprep.subr.bf16.mxu1 %v1466_v32  ;;  %1508 = vmatprep.subr.bf16.mxu0 %v1596_v6  ;;  %v1072_v32 = vld [vmem:[%s2073_s10] sm:$0xff] }
 0x279   : > { %v1515_v35 = vpack.c.bf16 %v1073_v33, %v1072_v32 }
 0x27b   : > { %1469 = vmatpush3.bf16.msra.mxu1 %v1468_v37  ;;  %v1518_v37 = vpack.c.bf16 %v1075_v36, %v1074_v34 }
 0x27c   : > { %1471 = vmatprep.subr.bf16.mxu1 %v1470_v38  ;;  %v1076_v38 = vld [vmem:[%s2073_s10 + $0x20] sm:$0xff] }
 0x27d   : > { %v1521_v40 = vpack.c.bf16 %v1077_v39, %v1076_v38 }
 0x27f   : > { %1473 = vmatpush3.bf16.msra.mxu1 %v1472_v43  ;;  %v1524_v43 = vpack.c.bf16 %v1079_v42, %v1078_v41 }
 0x280   : > { %1475 = vmatprep.subr.bf16.mxu1 %v1474_v44  ;;  %v1080_v44 = vld [vmem:[%s2073_s10 + $0x40] sm:$0xff] }
 0x281   : > { %v1527_v46 = vpack.c.bf16 %v1081_v45, %v1080_v44 }
 0x283   : > { %1477 = vmatpush3.bf16.msra.mxu1 %v1476_v50  ;;  %v1530_v50 = vpack.c.bf16 %v1083_v48, %v1082_v47 }
 0x284   : > { %1479 = vmatprep.subr.bf16.mxu1 %v1478_v51 }
 0x287   : > { %1481 = vmatpush3.bf16.msra.mxu1 %v1480_v56 }
 0x288   : > { %1483 = vmatprep.subr.bf16.mxu1 %v1482_v57 }
 0x28b   : > { %1485 = vmatpush3.bf16.msra.mxu1 %v1484_v62  ;;  %v1086_v62 = vld [vmem:[%s2073_s10 + $0x70] sm:$0xff] }
 0x28c   : > { %1487 = vmatprep.subr.bf16.mxu1 %v1486_v63  ;;  %v1087_v63 = vld [vmem:[%s2073_s10 + $0x78] sm:$0xff] }
 0x28d   : > { %v1536_v0 = vpack.c.bf16 %v1087_v63, %v1086_v62 }
 0x28f   : > { %1489 = vmatpush3.bf16.msra.mxu1 %v1488_v2 }
 0x290   : > { %1514 = vmatprep.subr.bf16.mxu1 %v1596_v6 }
 0x2d1   : > { %v699_v16 = vpop.f32.mrb[4].mxu0 }
 0x2d2   : > { %v1345_v17 = vpop.f32.mrb[5].mxu0 }
 0x345   : > { %v858_v22 = vpop.f32.mrb[2].mxu1 }
 0x346   : > { %v1355_v23 = vpop.f32.mrb[3].mxu1  ;;  %965 = vmatprep.mubr.f32.mxu1 %v858_v22 }
 0x347   : > { %966 = vmatmul.mubr.f32.vlgmr.msra.gmra.mrb[4].mxu1 %v699_v16 }
 0x348   : > { %1423 = vmatprep.mubr.msk.f32.mxu1 %vm1594_vm0, %v1593_v7  ;;  %v988_v7 = vld [vmem:[%s2071_s8 + $0x68] sm:$0xff]  ;;  %1516 = vmatpush3.bf16.msra.mxu1 %v1515_v35 }
 0x349   : > { %v1509_v28 = vpack.c.bf16 %v988_v7, %v987_v27  ;;  %1517 = vmatprep.subr.bf16.mxu1 %v1596_v6 }
 0x34b   : > { %1510 = vmatpush3.bf16.msra.mxu0 %v1509_v28 }
 0x34c   : > { %1511 = vmatprep.subr.bf16.mxu0 %v1596_v6  ;;  %1519 = vmatpush3.bf16.msra.mxu1 %v1518_v37 }
 0x34d   : > { %1520 = vmatprep.subr.bf16.mxu1 %v1596_v6 }
 0x34f   : > { %1513 = vmatpush3.bf16.msra.mxu0 %v1512_v31 }
 0x350   : > { %1522 = vmatpush3.bf16.msra.mxu1 %v1521_v40 }
 0x351   : > { %1523 = vmatprep.subr.bf16.mxu1 %v1596_v6 }
 0x354   : > { %1525 = vmatpush3.bf16.msra.mxu1 %v1524_v43 }
 0x355   : > { %1526 = vmatprep.subr.bf16.mxu1 %v1596_v6 }
 0x358   : > { %1528 = vmatpush3.bf16.msra.mxu1 %v1527_v46 }
 0x359   : > { %1529 = vmatprep.subr.bf16.mxu1 %v1596_v6 }
 0x35c   : > { %1531 = vmatpush3.bf16.msra.mxu1 %v1530_v50 }
 0x35d   : > { %1532 = vmatprep.subr.bf16.mxu1 %v1596_v6 }
 0x360   : > { %1534 = vmatpush3.bf16.msra.mxu1 %v1533_v61 }
 0x361   : > { %1535 = vmatprep.subr.bf16.mxu1 %v1596_v6 }
 0x364   : > { %1537 = vmatpush3.bf16.msra.mxu1 %v1536_v0 }
 0x41a   : > { %v1299_v51 = vpop.f32.mrb[4].mxu1 }
 0x41b   : > { %v1300_v53 = vpop.f32.mrb[5].mxu1 }
 0x41c   : > { %v1301_v54 = vadd.f32 %v1300_v53, %v1299_v51 }
 0x41e   : > { %v968_v55 = vadd.f32 %v1301_v54, %v1254_v52 }
 0x420   : > { %v971_v56 = vadd.f32 %v968_v55, %v1798_v49 }
 0x422   : > { %vm972_vm4 = vcmp.ge.f32.partialorder %v971_v56, 0.0  ;;  %v973_v57 = vmul.f32 0.1, %v971_v56 }
 0x424   : > { %v974_v58 = vsel %vm972_vm4, %v971_v56, %v973_v57 }
 0x425   : > { %1389 = vmatmul.mubr.f32.vlgmr.msra.gmra.mrb[6].mxu0 %v974_v58 }
 0x4f8   : > { %v1064_v2 = vpop.f32.mrb[6].mxu0 }
 0x4f9   : > { %v1065_v3 = vadd.f32 %v1255_v1, %v1064_v2  ;;  %v1390_v4 = vpop.f32.mrb[7].mxu0 }
 0x4fb   : > { %v1068_v5 = vadd.f32 %v1065_v3, %v1798_v49 }
 0x4fd   : > { %v1070_v6 = vmul.f32 0.1, %v1068_v5  ;;  %vm1069_vm5 = vcmp.ge.f32.partialorder %v1068_v5, 0.0 }
 0x4ff   : > { %v1071_v8 = vsel %vm1069_vm5, %v1068_v5, %v1070_v6 }
 0x500   : > { %1424 = vmatmul.mubr.f32.vlgmr.msra.gmra.mrb[6].mxu1 %v1071_v8 }
 0x5d3   : > { %v1161_v10 = vpop.f32.mrb[6].mxu1 }
 0x5d4   : > { %v1162_v11 = vadd.f32 %v1256_v9, %v1161_v10  ;;  %v1425_v12 = vpop.f32.mrb[7].mxu1 }
 0x5d6   : > { %v1165_v13 = vadd.f32 %v1162_v11, %v1071_v8 }
 0x5d8   : > { %vm1166_vm6 = vcmp.ge.f32.partialorder %v1165_v13, 0.0  ;;  %v1167_v14 = vmul.f32 0.1, %v1165_v13 }
 0x5da   : > { %v1168_v49 = vsel %vm1166_vm6, %v1165_v13, %v1167_v14 }
 0x5db   : > { %1169 = vst [vmem:[%s422_s30] sm:$0x3f] %v1168_v49 }
 0x5dc PF: > { %s23_s21 = sadd.s32 1, %s1590_s21  }
 0x5dd   : > { %p20_p1 = scmp.ge.s32.totalorder %s23_s21, 4  }
 0x5df   :  { %22 = sbr.rel (!%p20_p1) target bundleno = 1 (0x1), region = 104 }
 0x5e6   :  { %1189 = vsyncpa [#allocation3], 1 }
 0x5e7   :  { %1191 = vsyncpa [#allocation3 + $0x1], 1 }

// kernel: _lambda_.12
= control target key start
LH: loop header
LB: loop body
LE: loop exit
PB: predicated region body
PF: predicated region fallthrough
CT: control target
= control target key end

     0   :  { %19 = vsyncpa [#allocation3], 0  ;;  %s1827_s29 = smov 0   ;;  %s2245_s0 = inlined_call_operand.vmem [shape: f32[2,6,16], index: 0, kind: input, shape index: {}]   ;;  %s2246_s1 = inlined_call_operand.vmem [shape: f32[16,128], index: 1, kind: input, shape index: {}]   ;;  %s2247_s2 = inlined_call_operand.vmem [shape: f32[1,128], index: 2, kind: input, shape index: {}]   ;;  %s2248_s3 = inlined_call_operand.vmem [shape: f32[6,128], index: 3, kind: input, shape index: {}]   ;;  %s2249_s4 = inlined_call_operand.vmem [shape: f32[128,256], index: 4, kind: input, shape index: {}]   ;;  %s2250_s5 = inlined_call_operand.vmem [shape: f32[1,256], index: 5, kind: input, shape index: {}]   ;;  %s2251_s6 = inlined_call_operand.vmem [shape: f32[2], index: 6, kind: input, shape index: {}]   ;;  %s2252_s7 = inlined_call_operand.vmem [shape: f32[2,6,6], index: 7, kind: input, shape index: {}]   ;;  %s2253_s8 = inlined_call_operand.vmem [shape: f32[256,128], index: 8, kind: input, shape index: {}]   ;;  %s2254_s9 = inlined_call_operand.vmem [shape: f32[1,128], index: 9, kind: input, shape index: {}]   ;;  %s2255_s10 = inlined_call_operand.vmem [shape: f32[128,128], index: 10, kind: input, shape index: {}]   ;;  %s2256_s11 = inlined_call_operand.vmem [shape: f32[1,128], index: 11, kind: input, shape index: {}]   ;;  %s2257_s12 = inlined_call_operand.vmem [shape: f32[128,128], index: 12, kind: input, shape index: {}]   ;;  %s2258_s13 = inlined_call_operand.vmem [shape: f32[1,128], index: 13, kind: input, shape index: {}]   ;;  %s2259_s14 = inlined_call_operand.vmem [shape: f32[2,6,128], index: 14, kind: output, shape index: {}]  }
   0x1 LB: > { %s1833_s30 = sadd.s32 4294967295, %s1745_s29   ;;  %p1377_p0 = scmp.ge.s32.totalorder %s1745_s29, 1  ;;  %s1745_s29 = sphi %s1827_s29, %s25_s29  }
   0x2   : > { %p355_p1 = scmp.lt.s32.totalorder %s1745_s29, 3  ;;  %s383_s17 = sshll.u32 %s2251_s6, 4  ;;  %s384_s17 = int_to_ptr.vmem [resolvable:$true] %s383_s17 }
   0x3   : > { %p1701_p3 = scmp.eq.s32.totalorder %s1833_s30, 0  ;;  %s1720_s19 = scalar_lea.vmem %s384_s17, 16 }
   0x4   : > { %p1840_p2 = pnand %p1377_p0, %p355_p1  ;;  %p1721_p6 = scmp.ne.s32.totalorder %s384_s17, %s1720_s19 }
   0x5   : > { %p1728_p10 = scmp.lt.s32.totalorder %s384_s17, %s384_s17  ;;  %p1729_p11 = scmp.lt.s32.totalorder %s1720_s19, %s1720_s19 }
   0x6   : > { %p1697_p4 = pneg %p1840_p2 }
   0x7   : > { %p1730_p12 = por %p1729_p11, %p1728_p10 }
   0x8   : > { %p1698_p5 = pnand %p1701_p3, %p1697_p4 }
   0xa   : > { %p1722_p7 = pneg %p1698_p5 }
   0xc   : > { %p1723_p8 = pnand %p1722_p7, %p1721_p6 }
   0xe   : > { %p1724_p9 = pneg %p1723_p8 }
  0x10   : > { %p1731_p13 = pnand %p1730_p12, %p1724_p9 }
  0x12   : > { %1734 = shalt.err (!%p1731_p13)
}
  0x13   : > { %s1747_s20 = smov [#allocation2]   ;;  %424 = sbr.rel (%p1840_p2) target bundleno = 1807 (0x70f), region = 76 }
  0x14   : > { %1700 = dma.vmem_to_smem (!%p1698_p5), %s384_s17, 16, %s1747_s20, [#allocation3]  }
  0x1a   : > { %1740 = dma.done.wait (%p1701_p3), [#allocation3], 16  }
  0x1b   : > { %1742 = vsyncadd (%p1701_p3), [#allocation3], 4294967280 }
  0x1c   : > { %430 = sfence }
  0x1d   : > { %v478_v0 = vld [vmem:[%s2246_s1] sm:$0xff]  ;;  %v479_v1 = vld [vmem:[%s2246_s1 + $0x8] sm:$0xff]  ;;  %p469_p0 = scmp.lt.s32.totalorder %s1833_s30, 1  ;;  %v1748_v2 = vmov 0.0|0.0   ;;  %vm1749_vm0 = vmmov 0   ;;  %v1750_v4 = vmov 0.0   ;;  %v600_v62 = vlaneseq }
  0x1e   : > { %1578 = vmatprep.subr.bf16.mxu1 %v1748_v2  ;;  %v1579_v3 = vpack.c.bf16 %v479_v1, %v478_v0  ;;  %1485 = vmatprep.mubr.msk.f32.mxu1 %vm1749_vm0, %v1750_v4  ;;  %v567_v5 = vld [vmem:[%s2249_s4 + $0x8] sm:$0xff]  ;;  %v569_v6 = vld [vmem:[%s2249_s4 + $0x18] sm:$0xff]  ;;  %v566_v7 = vld [vmem:[%s2249_s4] sm:$0xff]  ;;  %vm487_vm1 = vcmask 130048   ;;  %vm769_vm3 = vcmask 1045504   ;;  %vm681_vm4 = vcmask 523264  }
  0x1f   : > { %s2262_s30 = smov (!%p469_p0, %s1833_s30), 1  ;;  %v1581_v8 = vpack.c.bf16 %v569_v6, %v567_v5  ;;  %v568_v9 = vld [vmem:[%s2249_s4 + $0x10] sm:$0xff]  ;;  %v571_v10 = vld [vmem:[%s2249_s4 + $0x28] sm:$0xff]  ;;  %v573_v11 = vld [vmem:[%s2249_s4 + $0x38] sm:$0xff]  ;;  %1493 = vmatprep.subr.mxu0 %v1750_v4  ;;  %1495 = vmatprep.mubr.msk.f32.mxu0 %vm1749_vm0, %v1750_v4  ;;  %v601_v63 = vshrl.u32 %v600_v62, 7  ;;  %s1751_s19 = smov 64  }
  0x20   : > { %1580 = vmatpush3.bf16.msra.mxu1 %v1579_v3  ;;  %s1382_s23 = sshll.u32 %s2262_s30, 3  ;;  %v1583_v12 = vpack.c.bf16 %v568_v9, %v566_v7  ;;  %v1585_v13 = vpack.c.bf16 %v573_v11, %v571_v10  ;;  %v570_v14 = vld [vmem:[%s2249_s4 + $0x20] sm:$0xff]  ;;  %v572_v15 = vld [vmem:[%s2249_s4 + $0x30] sm:$0xff]  ;;  %v575_v17 = vld [vmem:[%s2249_s4 + $0x48] sm:$0xff]  ;;  %s760_s20 = sld [smem:[#allocation2]]  ;;  %vm765_vm5 = vcmask 48128  }
  0x21   : > { %1582 = vmatprep.subr.bf16.mxu1 %v1581_v8  ;;  %s472_s26 = scalar_lea.vmem %s2245_s0, %s1382_s23  ;;  %v577_v18 = vld [vmem:[%s2249_s4 + $0x58] sm:$0xff]  ;;  %v1587_v19 = vpack.c.bf16 %v572_v15, %v570_v14  ;;  %v574_v21 = vld [vmem:[%s2249_s4 + $0x40] sm:$0xff]  ;;  %v576_v22 = vld [vmem:[%s2249_s4 + $0x50] sm:$0xff]  ;;  %v602_v0 = vsub.s32 0, %v601_v63  ;;  %v606_v3 = vsub.s32 1, %v601_v63  ;;  %s1392_s28 = sld [smem:[#allocation2 + $0x1]] }
  0x22   : > { %v477_v16 = vld [vmem:[%s472_s26] sm:$0x3f]  ;;  %v1589_v20 = vpack.c.bf16 %v577_v18, %v575_v17  ;;  %v579_v23 = vld [vmem:[%s2249_s4 + $0x68] sm:$0xff]  ;;  %v581_v24 = vld [vmem:[%s2249_s4 + $0x78] sm:$0xff]  ;;  %v1591_v25 = vpack.c.bf16 %v576_v22, %v574_v21 }
  0x23   : > { %1486 = vmatmul.mubr.msk.f32.vlgmr.msra.gmra.mrb[0].mxu1 %vm487_vm1, %v477_v16  ;;  %v1593_v26 = vpack.c.bf16 %v581_v24, %v579_v23  ;;  %v578_v27 = vld [vmem:[%s2249_s4 + $0x60] sm:$0xff]  ;;  %v580_v28 = vld [vmem:[%s2249_s4 + $0x70] sm:$0xff]  ;;  %v583_v29 = vld [vmem:[%s2249_s4 + $0x88] sm:$0xff] }
  0x24   : > { %1584 = vmatpush1.bf16.msra.mxu1 %v1583_v12  ;;  %674 = vmatprep.mubr.f32.mxu1 %v1750_v4  ;;  %v585_v30 = vld [vmem:[%s2249_s4 + $0x98] sm:$0xff]  ;;  %v1595_v31 = vpack.c.bf16 %v580_v28, %v578_v27  ;;  %v582_v33 = vld [vmem:[%s2249_s4 + $0x80] sm:$0xff]  ;;  %v584_v34 = vld [vmem:[%s2249_s4 + $0x90] sm:$0xff] }
  0x25   : > { %1586 = vmatprep.subr.bf16.mxu1 %v1585_v13  ;;  %v1597_v32 = vpack.c.bf16 %v585_v30, %v583_v29  ;;  %v587_v35 = vld [vmem:[%s2249_s4 + $0xa8] sm:$0xff]  ;;  %v589_v36 = vld [vmem:[%s2249_s4 + $0xb8] sm:$0xff]  ;;  %v1599_v37 = vpack.c.bf16 %v584_v34, %v582_v33  ;;  %v586_v39 = vld [vmem:[%s2249_s4 + $0xa0] sm:$0xff] }
  0x26   : > { %v1601_v38 = vpack.c.bf16 %v589_v36, %v587_v35  ;;  %v588_v40 = vld [vmem:[%s2249_s4 + $0xb0] sm:$0xff]  ;;  %v591_v42 = vld [vmem:[%s2249_s4 + $0xc8] sm:$0xff]  ;;  %v593_v43 = vld [vmem:[%s2249_s4 + $0xd8] sm:$0xff]  ;;  %v761_v14 = vstv %s760_s20 }
  0x27   : > { %v1603_v41 = vpack.c.bf16 %v588_v40, %v586_v39  ;;  %v1605_v44 = vpack.c.bf16 %v593_v43, %v591_v42  ;;  %v590_v45 = vld [vmem:[%s2249_s4 + $0xc0] sm:$0xff]  ;;  %v592_v46 = vld [vmem:[%s2249_s4 + $0xd0] sm:$0xff]  ;;  %v595_v48 = vld [vmem:[%s2249_s4 + $0xe8] sm:$0xff]  ;;  %v924_v29 = vstv %s1392_s28 }
  0x28   : > { %1588 = vmatpush1.bf16.msra.mxu1 %v1587_v19  ;;  %v1607_v47 = vpack.c.bf16 %v592_v46, %v590_v45  ;;  %v597_v49 = vld [vmem:[%s2249_s4 + $0xf8] sm:$0xff]  ;;  %v594_v51 = vld [vmem:[%s2249_s4 + $0xe0] sm:$0xff]  ;;  %v596_v52 = vld [vmem:[%s2249_s4 + $0xf0] sm:$0xff] }
  0x29   : > { %1590 = vmatprep.subr.bf16.mxu1 %v1589_v20  ;;  %v1609_v50 = vpack.c.bf16 %v597_v49, %v595_v48  ;;  %v1611_v53 = vpack.c.bf16 %v596_v52, %v594_v51  ;;  %v1384_v54 = vld [vmem:[%s2247_s2] ss:$0 sm:$0xff]  ;;  %v1019_v22 = vld [vmem:[%s2253_s8 + $0x88] sm:$0xff]  ;;  %v1020_v34 = vld [vmem:[%s2253_s8 + $0x90] sm:$0xff] }
  0x2a   : > { %v564_v59 = vld [vmem:[%s2248_s3] sm:$0x3f]  ;;  %v1393_v33 = vld [vmem:[%s2252_s7 + $0x8] sm:$0x3f]  ;;  %v1021_v35 = vld [vmem:[%s2253_s8 + $0x98] sm:$0xff] }
  0x2b   : > { %v598_v1 = vld [vmem:[%s2250_s5] sm:$0x3]  ;;  %v1617_v39 = vpack.c.bf16 %v1021_v35, %v1020_v34  ;;  %v1004_v40 = vld [vmem:[%s2253_s8 + $0x10] sm:$0xff]  ;;  %v1023_v43 = vld [vmem:[%s2253_s8 + $0xa8] sm:$0xff] }
  0x2c   : > { %1592 = vmatpush1.bf16.msra.mxu1 %v1591_v25  ;;  %v603_v5 = vrot.slane %v598_v1, %v602_v0  ;;  %v607_v7 = vrot.slane %v598_v1, %v606_v3  ;;  %v763_v16 = vld [vmem:[%s2252_s7] sm:$0x3f]  ;;  %v1024_v48 = vld [vmem:[%s2253_s8 + $0xb0] sm:$0xff]  ;;  %v1025_v49 = vld [vmem:[%s2253_s8 + $0xb8] sm:$0xff] }
  0x2d   : > { %1594 = vmatprep.subr.bf16.mxu1 %v1593_v26  ;;  %v1018_v21 = vld [vmem:[%s2253_s8 + $0x80] sm:$0xff]  ;;  %v1625_v51 = vpack.c.bf16 %v1025_v49, %v1024_v48  ;;  %v1008_v52 = vld [vmem:[%s2253_s8 + $0x30] sm:$0xff]  ;;  %v1029_v62 = vld [vmem:[%s2253_s8 + $0xd8] sm:$0xff] }
  0x2e   : > { %v1613_v23 = vpack.c.bf16 %v1019_v22, %v1018_v21  ;;  %v1002_v30 = vld [vmem:[%s2253_s8] sm:$0xff]  ;;  %v1012_v1 = vld [vmem:[%s2253_s8 + $0x50] sm:$0xff]  ;;  %v1013_v3 = vld [vmem:[%s2253_s8 + $0x58] sm:$0xff] }
  0x2f   : > { %v1022_v42 = vld [vmem:[%s2253_s8 + $0xa0] sm:$0xff]  ;;  %v1118_v22 = vld [vmem:[%s2255_s10 + $0x18] sm:$0xff] }
  0x30   : > { %1596 = vmatpush1.bf16.msra.mxu1 %v1595_v31  ;;  %v1003_v31 = vld [vmem:[%s2253_s8 + $0x8] sm:$0xff]  ;;  %v1621_v45 = vpack.c.bf16 %v1023_v43, %v1022_v42  ;;  %v1006_v46 = vld [vmem:[%s2253_s8 + $0x20] sm:$0xff] }
  0x31   : > { %1598 = vmatprep.subr.bf16.mxu1 %v1597_v32  ;;  %v1212_v43 = vld [vmem:[%s2257_s12] sm:$0xff] }
  0x32   : > { %v1216_v49 = vld [vmem:[%s2257_s12 + $0x20] sm:$0xff] }
  0x34   : > { %1600 = vmatpush1.bf16.msra.mxu1 %v1599_v37  ;;  %v1615_v37 = vpack.c.bf16 %v1003_v31, %v1002_v30  ;;  %v1123_v31 = vld [vmem:[%s2255_s10 + $0x40] sm:$0xff] }
  0x35   : > { %1602 = vmatprep.subr.bf16.mxu1 %v1601_v38 }
  0x38   : > { %1604 = vmatpush1.bf16.msra.mxu1 %v1603_v41  ;;  %v1005_v41 = vld [vmem:[%s2253_s8 + $0x18] sm:$0xff] }
  0x39   : > { %1606 = vmatprep.subr.bf16.mxu1 %v1605_v44  ;;  %v1619_v44 = vpack.c.bf16 %v1005_v41, %v1004_v40  ;;  %v1129_v40 = vld [vmem:[%s2255_s10 + $0x70] sm:$0xff]  ;;  %v1130_v41 = vld [vmem:[%s2255_s10 + $0x78] sm:$0xff] }
  0x3a   : > { %v1667_v42 = vpack.c.bf16 %v1130_v41, %v1129_v40 }
  0x3c   : > { %1608 = vmatpush1.bf16.msra.mxu1 %v1607_v47  ;;  %v1007_v47 = vld [vmem:[%s2253_s8 + $0x28] sm:$0xff] }
  0x3d   : > { %1610 = vmatprep.subr.bf16.mxu1 %v1609_v50  ;;  %v1623_v50 = vpack.c.bf16 %v1007_v47, %v1006_v46  ;;  %v1215_v47 = vld [vmem:[%s2257_s12 + $0x18] sm:$0xff] }
  0x40   : > { %1612 = vmatpush1.bf16.msra.mxu1 %v1611_v53  ;;  %v1009_v53 = vld [vmem:[%s2253_s8 + $0x38] sm:$0xff] }
  0x41   : > { %1488 = vmatprep.subr.mxu1 %v1750_v4 }
  0xf6   : > { %v557_v55 = vpop.f32.mrb[0].mxu1 }
  0xf7   : > { %v558_v56 = vadd.f32 %v1384_v54, %v557_v55  ;;  %v1487_v57 = vpop.f32.mrb[1].mxu1  ;;  %v1026_v54 = vld [vmem:[%s2253_s8 + $0xc0] sm:$0xff]  ;;  %v1027_v55 = vld [vmem:[%s2253_s8 + $0xc8] sm:$0xff] }
  0xf8   : > { %v1629_v57 = vpack.c.bf16 %v1027_v55, %v1026_v54  ;;  %v1220_v55 = vld [vmem:[%s2257_s12 + $0x40] sm:$0xff] }
  0xf9   : > { %vm561_vm2 = vcmp.ge.f32.partialorder %v558_v56, 0.0  ;;  %v562_v58 = vmul.f32 0.1, %v558_v56 }
  0xfb   : > { %v1981_v60 = vsel %vm561_vm2, %v558_v56, %v562_v58  ;;  %v1627_v56 = vpack.c.bf16 %v1009_v53, %v1008_v52  ;;  %v1010_v58 = vld [vmem:[%s2253_s8 + $0x40] sm:$0xff]  ;;  %v1218_v52 = vld [vmem:[%s2257_s12 + $0x30] sm:$0xff]  ;;  %v1219_v53 = vld [vmem:[%s2257_s12 + $0x38] sm:$0xff] }
  0xfc   : > { %1494 = vmatpush3.msk.msra.mxu0 %vm769_vm3, %v1981_v60  ;;  %v565_v61 = vadd.f32 %v564_v59, %v1981_v60  ;;  %v1011_v59 = vld [vmem:[%s2253_s8 + $0x48] sm:$0xff]  ;;  %v1679_v54 = vpack.c.bf16 %v1219_v53, %v1218_v52 }
  0xfd   : > { %1498 = vmatprep.subr.mxu0 %v1750_v4  ;;  %v1631_v63 = vpack.c.bf16 %v1011_v59, %v1010_v58  ;;  %v1222_v58 = vld [vmem:[%s2257_s12 + $0x50] sm:$0xff]  ;;  %v1223_v59 = vld [vmem:[%s2257_s12 + $0x58] sm:$0xff] }
  0xfe   : > { %675 = vmatmul.mubr.f32.vlgmr.msra.gmra.mrb[2].mxu1 %v565_v61  ;;  %v1028_v61 = vld [vmem:[%s2253_s8 + $0xd0] sm:$0xff] }
  0xff   : > { %1490 = vmatprep.mubr.msk.f32.mxu1 %vm1749_vm0, %v1750_v4  ;;  %v1633_v0 = vpack.c.bf16 %v1029_v62, %v1028_v61  ;;  %v1685_v61 = vpack.c.bf16 %v1223_v59, %v1222_v58 }
 0x1d1   : > { %v676_v6 = vpop.f32.mrb[2].mxu1 }
 0x1d2   : > { %v677_v8 = vadd.f32 %v676_v6, %v603_v5  ;;  %v678_v9 = vpop.f32.mrb[3].mxu1  ;;  %v1030_v5 = vld [vmem:[%s2253_s8 + $0xe0] sm:$0xff]  ;;  %v1031_v6 = vld [vmem:[%s2253_s8 + $0xe8] sm:$0xff] }
 0x1d3   : > { %v679_v10 = vadd.f32 %v678_v9, %v607_v7  ;;  %v1635_v7 = vpack.c.bf16 %v1013_v3, %v1012_v1  ;;  %v1014_v9 = vld [vmem:[%s2253_s8 + $0x60] sm:$0xff] }
 0x1d4   : > { %845 = vrot.lane.b32.xlu0 %v677_v8, %s1751_s19  ;;  %1489 = vmatpush3.xpose.msk.msra.mxu1 %vm681_vm4, %v677_v8  ;;  %v1637_v8 = vpack.c.bf16 %v1031_v6, %v1030_v5 }
 0x1d5   : > { %1645 = vmatprep.subr.bf16.mxu1 %v1748_v2 }
 0x1d7   : > { %1491 = vmatmul.mubr.msk.f32.vlgmr.msra.gmra.mrb[4].mxu1 %vm681_vm4, %v679_v10 }
 0x1d8   : > { %843 = vrot.lane.b32.xlu0 %v679_v10, %s1751_s19  ;;  %1540 = vmatprep.mubr.msk.f32.mxu1 %vm1749_vm0, %v1750_v4  ;;  %v1015_v10 = vld [vmem:[%s2253_s8 + $0x68] sm:$0xff]  ;;  %s476_s19 = scalar_lea.vmem %s2259_s14, %s1382_s23 }
 0x246   : > { %v846_v18 = vpop.permute.xlu0 %845 }
 0x24a   : > { %v844_v20 = vpop.permute.xlu0 %843 }
 0x2aa   : > { %v754_v11 = vpop.f32.mrb[4].mxu1 }
 0x2ab   : > { %v758_v12 = vmul.f32 0.015625, %v754_v11  ;;  %v1492_v13 = vpop.f32.mrb[5].mxu1  ;;  %v1032_v11 = vld [vmem:[%s2253_s8 + $0xf0] sm:$0xff] }
 0x2ac   : > { %v1639_v13 = vpack.c.bf16 %v1015_v10, %v1014_v9  ;;  %v1225_v9 = vld [vmem:[%s2257_s12 + $0x68] sm:$0xff] }
 0x2ad   : > { %1716 = vtanh.f32 %v758_v12  ;;  %v1033_v12 = vld [vmem:[%s2253_s8 + $0xf8] sm:$0xff] }
 0x2b7   : > { %v1717_v15 = vpop.eup %1716 }
 0x2b8   : > { %v762_v17 = vmul.f32 %v1717_v15, %v761_v14  ;;  %v1641_v14 = vpack.c.bf16 %v1033_v12, %v1032_v11  ;;  %v1016_v15 = vld [vmem:[%s2253_s8 + $0x70] sm:$0xff]  ;;  %v1227_v12 = vld [vmem:[%s2257_s12 + $0x78] sm:$0xff] }
 0x2b9   : > { %v1226_v11 = vld [vmem:[%s2257_s12 + $0x70] sm:$0xff] }
 0x2ba   : > { %v764_v19 = vadd.f32 %v763_v16, %v762_v17  ;;  %v1017_v16 = vld [vmem:[%s2253_s8 + $0x78] sm:$0xff] }
 0x2bb   : > { %v1643_v17 = vpack.c.bf16 %v1017_v16, %v1016_v15 }
 0x2bc   : > { %1496 = vmatmul.mubr.msk.f32.vlgmr.msra.gmra.mrb[0].mxu0 %vm765_vm5, %v764_v19  ;;  %v1116_v19 = vld [vmem:[%s2255_s10 + $0x8] sm:$0xff] }
 0x2bd   : > { %1499 = vmatpush3.xpose.msk.msra.mxu0 %vm681_vm4, %v846_v18  ;;  %1500 = vmatprep.mubr.msk.f32.mxu0 %vm1749_vm0, %v1750_v4  ;;  %v1115_v18 = vld [vmem:[%s2255_s10] sm:$0xff] }
 0x2be   : > { %1503 = vmatprep.subr.mxu0 %v1750_v4  ;;  %v1646_v21 = vpack.c.bf16 %v1116_v19, %v1115_v18 }
 0x2c0   : > { %1501 = vmatmul.mubr.msk.f32.vlgmr.msra.gmra.mrb[2].mxu0 %vm681_vm4, %v844_v20  ;;  %v1117_v20 = vld [vmem:[%s2255_s10 + $0x10] sm:$0xff]  ;;  %1647 = vmatpush3.bf16.msra.mxu1 %v1646_v21 }
 0x2c1   : > { %1504 = vmatpush3.msk.msra.mxu0 %vm769_vm3, %v1981_v60  ;;  %1505 = vmatprep.mubr.msk.f32.mxu0 %vm1749_vm0, %v1750_v4 }
 0x2c2   : > { %1614 = vmatprep.subr.bf16.mxu0 %v1613_v23  ;;  %v1649_v23 = vpack.c.bf16 %v1118_v22, %v1117_v20  ;;  %1648 = vmatprep.subr.bf16.mxu1 %v1748_v2  ;;  %v1398_v20 = vld [vmem:[%s2258_s13] ss:$0 sm:$0xff] }
 0x2c4   : > { %1650 = vmatpush3.bf16.msra.mxu1 %v1649_v23 }
 0x2c5   : > { %1651 = vmatprep.subr.bf16.mxu1 %v1748_v2 }
 0x38f   : > { %v2016_v24 = vpop.f32.mrb[0].mxu0 }
 0x390   : > { %v1497_v25 = vpop.f32.mrb[1].mxu0 }
 0x391   : > { %v1119_v25 = vld [vmem:[%s2255_s10 + $0x20] sm:$0xff] }
 0x393   : > { %v917_v26 = vpop.f32.mrb[2].mxu0 }
 0x394   : > { %v921_v27 = vmul.f32 0.015625, %v917_v26  ;;  %v1502_v28 = vpop.f32.mrb[3].mxu0  ;;  %v1120_v26 = vld [vmem:[%s2255_s10 + $0x28] sm:$0xff] }
 0x395   : > { %v1121_v28 = vld [vmem:[%s2255_s10 + $0x30] sm:$0xff] }
 0x396   : > { %1718 = vtanh.f32 %v921_v27  ;;  %v1652_v27 = vpack.c.bf16 %v1120_v26, %v1119_v25 }
 0x398   : > { %1653 = vmatpush3.bf16.msra.mxu1 %v1652_v27 }
 0x399   : > { %1654 = vmatprep.subr.bf16.mxu1 %v1748_v2 }
 0x3a0   : > { %v1719_v32 = vpop.eup %1718 }
 0x3a1   : > { %v925_v36 = vmul.f32 %v1719_v32, %v924_v29  ;;  %v1122_v29 = vld [vmem:[%s2255_s10 + $0x38] sm:$0xff]  ;;  %v1124_v32 = vld [vmem:[%s2255_s10 + $0x48] sm:$0xff] }
 0x3a2   : > { %v1655_v30 = vpack.c.bf16 %v1122_v29, %v1121_v28 }
 0x3a3   : > { %v928_v38 = vadd.f32 %v1393_v33, %v925_v36  ;;  %v1658_v33 = vpack.c.bf16 %v1124_v32, %v1123_v31  ;;  %v1125_v36 = vld [vmem:[%s2255_s10 + $0x50] sm:$0xff] }
 0x3a4   : > { %1656 = vmatpush3.bf16.msra.mxu1 %v1655_v30 }
 0x3a5   : > { %1506 = vmatmul.mubr.msk.f32.vlgmr.msra.gmra.mrb[4].mxu0 %vm765_vm5, %v928_v38  ;;  %1657 = vmatprep.subr.bf16.mxu1 %v1748_v2 }
 0x3a6   : > { %1616 = vmatpush3.bf16.msra.mxu0 %v1615_v37  ;;  %v1126_v37 = vld [vmem:[%s2255_s10 + $0x58] sm:$0xff] }
 0x3a7   : > { %1618 = vmatprep.subr.bf16.mxu0 %v1617_v39  ;;  %v1661_v38 = vpack.c.bf16 %v1126_v37, %v1125_v36  ;;  %v1127_v39 = vld [vmem:[%s2255_s10 + $0x60] sm:$0xff] }
 0x3a8   : > { %1659 = vmatpush3.bf16.msra.mxu1 %v1658_v33 }
 0x3a9   : > { %1660 = vmatprep.subr.bf16.mxu1 %v1748_v2 }
 0x3aa   : > { %1620 = vmatpush3.bf16.msra.mxu0 %v1619_v44  ;;  %v1213_v44 = vld [vmem:[%s2257_s12 + $0x8] sm:$0xff] }
 0x3ab   : > { %1622 = vmatprep.subr.bf16.mxu0 %v1621_v45  ;;  %v1214_v45 = vld [vmem:[%s2257_s12 + $0x10] sm:$0xff]  ;;  %v1670_v46 = vpack.c.bf16 %v1213_v44, %v1212_v43 }
 0x3ac   : > { %1662 = vmatpush3.bf16.msra.mxu1 %v1661_v38  ;;  %v1673_v48 = vpack.c.bf16 %v1215_v47, %v1214_v45 }
 0x3ad   : > { %1663 = vmatprep.subr.bf16.mxu1 %v1748_v2 }
 0x3ae   : > { %1624 = vmatpush3.bf16.msra.mxu0 %v1623_v50  ;;  %v1217_v50 = vld [vmem:[%s2257_s12 + $0x28] sm:$0xff] }
 0x3af   : > { %1626 = vmatprep.subr.bf16.mxu0 %v1625_v51  ;;  %v1676_v51 = vpack.c.bf16 %v1217_v50, %v1216_v49 }
 0x3b2   : > { %1628 = vmatpush3.bf16.msra.mxu0 %v1627_v56  ;;  %v1221_v56 = vld [vmem:[%s2257_s12 + $0x48] sm:$0xff] }
 0x3b3   : > { %1630 = vmatprep.subr.bf16.mxu0 %v1629_v57  ;;  %v1682_v57 = vpack.c.bf16 %v1221_v56, %v1220_v55 }
 0x3b6   : > { %1632 = vmatpush3.bf16.msra.mxu0 %v1631_v63  ;;  %v1396_v63 = vld [vmem:[%s2254_s9] ss:$0 sm:$0xff] }
 0x3b7   : > { %1634 = vmatprep.subr.bf16.mxu0 %v1633_v0 }
 0x3ba   : > { %1636 = vmatpush3.bf16.msra.mxu0 %v1635_v7 }
 0x3bb   : > { %1638 = vmatprep.subr.bf16.mxu0 %v1637_v8  ;;  %v1224_v8 = vld [vmem:[%s2257_s12 + $0x60] sm:$0xff] }
 0x3bc   : > { %v1688_v10 = vpack.c.bf16 %v1225_v9, %v1224_v8 }
 0x3be   : > { %1640 = vmatpush3.bf16.msra.mxu0 %v1639_v13  ;;  %v1691_v13 = vpack.c.bf16 %v1227_v12, %v1226_v11 }
 0x3bf   : > { %1642 = vmatprep.subr.bf16.mxu0 %v1641_v14  ;;  %v1397_v14 = vld [vmem:[%s2256_s11] ss:$0 sm:$0xff] }
 0x3c2   : > { %1644 = vmatpush3.bf16.msra.mxu0 %v1643_v17 }
 0x3c3   : > { %1669 = vmatprep.subr.bf16.mxu0 %v1748_v2 }
 0x478   : > { %v998_v34 = vpop.f32.mrb[4].mxu0 }
 0x479   : > { %v1507_v35 = vpop.f32.mrb[5].mxu0  ;;  %1105 = vmatprep.mubr.f32.mxu0 %v998_v34 }
 0x47a   : > { %1106 = vmatmul.mubr.f32.vlgmr.msra.gmra.mrb[6].mxu0 %v2016_v24 }
 0x47b   : > { %1575 = vmatprep.mubr.msk.f32.mxu0 %vm1749_vm0, %v1750_v4  ;;  %v1128_v4 = vld [vmem:[%s2255_s10 + $0x68] sm:$0xff]  ;;  %1671 = vmatpush3.bf16.msra.mxu0 %v1670_v46 }
 0x47c   : > { %v1664_v24 = vpack.c.bf16 %v1128_v4, %v1127_v39  ;;  %1672 = vmatprep.subr.bf16.mxu0 %v1748_v2 }
 0x47e   : > { %1665 = vmatpush3.bf16.msra.mxu1 %v1664_v24 }
 0x47f   : > { %1666 = vmatprep.subr.bf16.mxu1 %v1748_v2  ;;  %1674 = vmatpush3.bf16.msra.mxu0 %v1673_v48 }
 0x480   : > { %1675 = vmatprep.subr.bf16.mxu0 %v1748_v2 }
 0x482   : > { %1668 = vmatpush3.bf16.msra.mxu1 %v1667_v42 }
 0x483   : > { %1677 = vmatpush3.bf16.msra.mxu0 %v1676_v51 }
 0x484   : > { %1678 = vmatprep.subr.bf16.mxu0 %v1748_v2 }
 0x487   : > { %1680 = vmatpush3.bf16.msra.mxu0 %v1679_v54 }
 0x488   : > { %1681 = vmatprep.subr.bf16.mxu0 %v1748_v2 }
 0x48b   : > { %1683 = vmatpush3.bf16.msra.mxu0 %v1682_v57 }
 0x48c   : > { %1684 = vmatprep.subr.bf16.mxu0 %v1748_v2 }
 0x48f   : > { %1686 = vmatpush3.bf16.msra.mxu0 %v1685_v61 }
 0x490   : > { %1687 = vmatprep.subr.bf16.mxu0 %v1748_v2 }
 0x493   : > { %1689 = vmatpush3.bf16.msra.mxu0 %v1688_v10 }
 0x494   : > { %1690 = vmatprep.subr.bf16.mxu0 %v1748_v2 }
 0x497   : > { %1692 = vmatpush3.bf16.msra.mxu0 %v1691_v13 }
 0x54d   : > { %v1444_v62 = vpop.f32.mrb[6].mxu0 }
 0x54e   : > { %v1445_v0 = vpop.f32.mrb[7].mxu0 }
 0x54f   : > { %v1446_v1 = vadd.f32 %v1445_v0, %v1444_v62 }
 0x551   : > { %v1108_v3 = vadd.f32 %v1446_v1, %v1396_v63 }
 0x553   : > { %v1111_v5 = vadd.f32 %v1108_v3, %v1981_v60 }
 0x555   : > { %vm1112_vm6 = vcmp.ge.f32.partialorder %v1111_v5, 0.0  ;;  %v1113_v6 = vmul.f32 0.1, %v1111_v5 }
 0x557   : > { %v1114_v7 = vsel %vm1112_vm6, %v1111_v5, %v1113_v6 }
 0x558   : > { %1541 = vmatmul.mubr.f32.vlgmr.msra.gmra.mrb[6].mxu1 %v1114_v7 }
 0x62b   : > { %v1204_v15 = vpop.f32.mrb[6].mxu1 }
 0x62c   : > { %v1205_v16 = vadd.f32 %v1397_v14, %v1204_v15  ;;  %v1542_v17 = vpop.f32.mrb[7].mxu1 }
 0x62e   : > { %v1208_v2 = vadd.f32 %v1205_v16, %v1981_v60 }
 0x630   : > { %v1210_v18 = vmul.f32 0.1, %v1208_v2  ;;  %vm1209_vm7 = vcmp.ge.f32.partialorder %v1208_v2, 0.0 }
 0x632   : > { %v1211_v19 = vsel %vm1209_vm7, %v1208_v2, %v1210_v18 }
 0x633   : > { %1576 = vmatmul.mubr.f32.vlgmr.msra.gmra.mrb[8].mxu0 %v1211_v19 }
 0x706   : > { %v1301_v21 = vpop.f32.mrb[8].mxu0 }
 0x707   : > { %v1302_v22 = vadd.f32 %v1398_v20, %v1301_v21  ;;  %v1577_v23 = vpop.f32.mrb[9].mxu0 }
 0x709   : > { %v1305_v25 = vadd.f32 %v1302_v22, %v1211_v19 }
 0x70b   : > { %vm1306_vm8 = vcmp.ge.f32.partialorder %v1305_v25, 0.0  ;;  %v1307_v26 = vmul.f32 0.1, %v1305_v25 }
 0x70d   : > { %v1308_v60 = vsel %vm1306_vm8, %v1305_v25, %v1307_v26 }
 0x70e   : > { %1309 = vst [vmem:[%s476_s19] sm:$0x3f] %v1308_v60 }
 0x70f PF: > { %s25_s29 = sadd.s32 1, %s1745_s29  }
 0x710   : > { %p22_p1 = scmp.ge.s32.totalorder %s25_s29, 4  }
 0x712   :  { %24 = sbr.rel (!%p22_p1) target bundleno = 1 (0x1), region = 112 }
 0x719   :  { %1329 = vsyncpa [#allocation3], 1 }
 0x71a   :  { %1331 = vsyncpa [#allocation3 + $0x1], 1 }

</bundles_post_ra>
